<compile_context>
chip_gen: v6e
topology: v6e:2x2x1
jax: 0.10.0
libtpu: 0.0.40
codegen_flags: <defaults>
</compile_context>

<pallas_src>
import math
import functools

import jax
import jax.numpy as jnp
import numpy as np
from jax.experimental import pallas as pl
from jax.experimental.pallas import tpu as pltpu

EPS = 1e-5  # torch.nn.LayerNorm default


# ----------------------------- in-kernel math helpers -----------------------------

def _layernorm(x, eps=EPS):
    """LayerNorm over the last axis, no affine (biased variance, like torch)."""
    mu = jnp.mean(x, axis=-1, keepdims=True)
    var = jnp.mean(jnp.square(x - mu), axis=-1, keepdims=True)
    return (x - mu) * jax.lax.rsqrt(var + eps)


def _erf_approx(x):
    # Abramowitz & Stegun 7.1.26 rational approximation (max abs err ~1.5e-7).
    # Exact divide (not the approx EUP reciprocal): the degree-5 polynomial would
    # otherwise amplify the ~2^-12 reciprocal error into ~1e-3 GELU error.
    a1, a2, a3, a4, a5 = 0.254829592, -0.284496736, 1.421413741, -1.453152027, 1.061405429
    p = 0.3275911
    sgn = jnp.where(x >= 0.0, 1.0, -1.0)
    ax = jnp.abs(x)
    t = 1.0 / (1.0 + p * ax)
    poly = ((((a5 * t + a4) * t + a3) * t + a2) * t + a1) * t
    return sgn * (1.0 - poly * jnp.exp(-ax * ax))


def _gelu_exact(x):
    # F.gelu default ("none"): 0.5 * x * (1 + erf(x / sqrt(2)))
    return 0.5 * x * (1.0 + _erf_approx(x * (1.0 / math.sqrt(2.0))))


# ----------------------------- fused encoder kernel -----------------------------

def encoder_kernel(x_ref, mask_ref, wqkv_ref, bqkv_ref, wo_ref, bo_ref,
                   gamma_ref, beta_ref, w1p_ref, w2p_ref, out_ref,
                   *, num_heads, ff_dim):
    """Whole encoder (all layers + output norm) on a single VMEM-resident block.

    x_ref:    (B*S, H)         f32   activations, batch folded into rows
    mask_ref: (B, 1, S)        f32   additive key-padding bias (0 or -1e30)
    wqkv_ref: (L, H, 3H)       bf16  fused in-projection (transposed, Q cols pre-scaled)
    wo_ref:   (L, nH, hd, H)   bf16  out-projection split per head (summed out-proj)
    w1p_ref:  (L, H, 2*f_pad)  bf16  FF1, value half lanes [0,F), gate half [f_pad,f_pad+F)
    w2p_ref:  (L, f_pad, H)    bf16  FF2, rows >= F are zero
    bqkv/bo/gamma/beta:        f32   biases and post-attention LN affine
    """
    f32 = jnp.float32
    bf16 = jnp.bfloat16

    BS, H = x_ref.shape
    B, _, S = mask_ref.shape
    L = wqkv_ref.shape[0]
    hd = H // num_heads
    f_pad = w2p_ref.shape[1]
    inv_f = 1.0 / float(ff_dim)

    x = x_ref[...]                       # (B*S, H) f32 residual, stays vreg/VMEM resident
    kp_bias = mask_ref[...]              # (B, 1, S), broadcasts over queries for free

    for l in range(L):                   # static layer loop
        # ------------- attention block: x += LN_affine(MHA(LN(x))) -------------
        ln = _layernorm(x).astype(bf16)
        # Fused QKV in-projection; 1/sqrt(hd) is already folded into the Q columns.
        qkv = jnp.dot(ln, wqkv_ref[l], preferred_element_type=f32) + bqkv_ref[l]
        qkv = qkv.astype(bf16)                                      # (B*S, 3H)

        proj = jnp.zeros((BS, H), f32)
        for h in range(num_heads):       # short static head loop, batched over B inside
            c = h * hd
            q_h = qkv[:, c:c + hd].reshape(B, S, hd)
            k_h = qkv[:, H + c:H + c + hd].reshape(B, S, hd)
            v_h = qkv[:, 2 * H + c:2 * H + c + hd].reshape(B, S, hd)
            s = jnp.einsum('bqd,bkd->bqk', q_h, k_h,
                           preferred_element_type=f32) + kp_bias    # (B, S, S)
            s = s - jnp.max(s, axis=-1, keepdims=True)
            e = jnp.exp(s)
            pr = e * pl.reciprocal(jnp.sum(e, axis=-1, keepdims=True), approx=True)
            ctx = jnp.einsum('bqk,bkd->bqd', pr.astype(bf16), v_h,
                             preferred_element_type=f32)            # (B, S, hd)
            # concat(heads) @ Wo  ==  sum_h  ctx_h @ Wo[h*hd:(h+1)*hd, :]
            proj = proj + jnp.dot(ctx.reshape(BS, hd).astype(bf16), wo_ref[l, h],
                                  preferred_element_type=f32)
        proj = proj + bo_ref[l]
        x = x + (_layernorm(proj) * gamma_ref[l] + beta_ref[l])

        # ------------- feed-forward block: x += FF(LN(x)) -------------
        ln2 = _layernorm(x).astype(bf16)
        h1 = jnp.dot(ln2, w1p_ref[l], preferred_element_type=f32)   # (B*S, 2*f_pad)
        val = h1[:, :f_pad]              # value half; lanes >= ff_dim are exactly 0
        gate = h1[:, f_pad:]             # gate half;  lanes >= ff_dim are exactly 0
        z = val * _gelu_exact(gate)      # padded lanes stay exactly 0
        # LayerNorm over the true ff_dim features: padded zeros don't perturb the
        # sums; E[x^2] - mu^2 equals torch.LayerNorm's biased variance.
        mu = jnp.sum(z, axis=-1, keepdims=True) * inv_f
        var = jnp.sum(z * z, axis=-1, keepdims=True) * inv_f - mu * mu
        zn = (z - mu) * jax.lax.rsqrt(var + EPS)
        # Rows >= ff_dim of w2 are zero, so padded lanes of zn are inert in the dot.
        x = x + jnp.dot(zn.astype(bf16), w2p_ref[l], preferred_element_type=f32)

    out_ref[...] = _layernorm(x).astype(out_ref.dtype)              # final output norm


# ----------------------------- wrapper -----------------------------

def encoder_forward(x_sbh, padding_mask, params, num_heads):
    """PyTorch-faithful forward.  x_sbh: (S, B, H) f32 (batch_first=False),
    padding_mask: (B, S) bool, True = padded key position."""
    S, B, H = x_sbh.shape
    x = jnp.transpose(x_sbh, (1, 0, 2)).reshape(B * S, H).astype(jnp.float32)
    mask_neg = jnp.where(padding_mask, jnp.float32(-1e30),
                         jnp.float32(0.0)).reshape(B, 1, S)

    vmem = pltpu.MemorySpace.VMEM
    out = pl.pallas_call(
        functools.partial(encoder_kernel, num_heads=num_heads, ff_dim=H * 4 // 3),
        out_shape=jax.ShapeDtypeStruct((B * S, H), jnp.float32),
        in_specs=[pl.BlockSpec(memory_space=vmem)] * 10,
        out_specs=pl.BlockSpec(memory_space=vmem),
        compiler_params=pltpu.CompilerParams(vmem_limit_bytes=32 * 1024 * 1024),
    )(x, mask_neg,
      params["wqkv_t"], params["bqkv"],
      params["wo_t"], params["bo"],
      params["gamma"], params["beta"],
      params["w1p_t"], params["w2p_t"])

    return jnp.transpose(out.reshape(B, S, H), (1, 0, 2))            # back to (S, B, H)


# ----------------------------- deterministic parameter init -----------------------------

def _trunc_normal(key, shape, std):
    return jax.random.truncated_normal(key, -2.0, 2.0, shape, dtype=jnp.float32) * std


def init_encoder_params(key, num_layers, hidden, num_heads):
    """Same shapes / init scheme as the PyTorch module, repacked for the kernel:
       wqkv_t (L,H,3H) in_proj^T with Q cols pre-scaled by 1/sqrt(hd);
       wo_t   (L,nH,hd,H) out_proj^T split per head;
       w1p_t  (L,H,2*f_pad) lane-dense packed value/gate halves (zero-padded);
       w2p_t  (L,f_pad,H) with rows >= F zero."""
    F_ = hidden * 4 // 3
    f_pad = ((F_ + 63) // 64) * 64
    hd = hidden // num_heads
    std = math.sqrt(2.0 / (5.0 * hidden))
    qscale = 1.0 / math.sqrt(hd)

    wqkv_t, wo_t, w1p_t, w2p_t = [], [], [], []
    for i in range(num_layers):
        key, k1, k2, k3, k4 = jax.random.split(key, 5)
        in_proj = _trunc_normal(k1, (3 * hidden, hidden), std)       # in_proj_weight (3H, H)
        # Fold the 1/sqrt(head_dim) scale into the Q rows (one-time host cost).
        # (A nonzero in_proj_bias's Q third would need the same scaling; it is zero here.)
        in_proj = in_proj.at[:hidden].multiply(qscale)
        wo = _trunc_normal(k2, (hidden, hidden), std)                # out_proj.weight (H, H)
        w1 = _trunc_normal(k3, (2 * F_, hidden), std)                # linear_1.weight (2F, H)
        w2 = _trunc_normal(k4, (hidden, F_), std)                    # linear_2.weight (H, F)
        ff_scale = math.sqrt(1.0 / (2.0 * (1 + i)))                  # Encoder.__init__ rescale
        w1 = w1 * ff_scale
        w2 = w2 * ff_scale

        wqkv_t.append(in_proj.T)                                     # (H, 3H): y = x @ W^T
        wo_t.append(wo.T.reshape(num_heads, hd, hidden))             # (nH, hd, H)

        w1pack = jnp.zeros((hidden, 2 * f_pad), jnp.float32)
        w1pack = w1pack.at[:, :F_].set(w1[:F_].T)                    # chunk(2,-1) value half
        w1pack = w1pack.at[:, f_pad:f_pad + F_].set(w1[F_:].T)       # gate half
        w1p_t.append(w1pack)

        w2pack = jnp.zeros((f_pad, hidden), jnp.float32)
        w2pack = w2pack.at[:F_, :].set(w2.T)
        w2p_t.append(w2pack)

    L = num_layers
    return dict(
        wqkv_t=jnp.stack(wqkv_t).astype(jnp.bfloat16),
        bqkv=jnp.zeros((L, 1, 3 * hidden), jnp.float32),             # in_proj_bias (zero-init)
        wo_t=jnp.stack(wo_t).astype(jnp.bfloat16),
        bo=jnp.zeros((L, 1, hidden), jnp.float32),                   # out_proj.bias (zero-init)
        gamma=jnp.ones((L, 1, hidden), jnp.float32),                 # post-attn LN affine
        beta=jnp.zeros((L, 1, hidden), jnp.float32),
        w1p_t=jnp.stack(w1p_t).astype(jnp.bfloat16),
        w2p_t=jnp.stack(w2p_t).astype(jnp.bfloat16),
    )


# ----------------------------- pure-JAX reference (for verification) -----------------------------

def encoder_ref(x_sbh, padding_mask, params, num_heads):
    x = jnp.transpose(x_sbh, (1, 0, 2)).astype(jnp.float32)
    B, S, H = x.shape
    L = params["wqkv_t"].shape[0]
    hd = H // num_heads
    F_ = H * 4 // 3
    f_pad = params["w2p_t"].shape[1]
    neg = jnp.where(padding_mask, -1e30, 0.0)[:, None, None, :]      # (B,1,1,S)
    for l in range(L):
        wqkv = params["wqkv_t"][l].astype(jnp.float32)
        wo = params["wo_t"][l].reshape(H, H).astype(jnp.float32)
        w1a = params["w1p_t"][l, :, :F_].astype(jnp.float32)
        w1b = params["w1p_t"][l, :, f_pad:f_pad + F_].astype(jnp.float32)
        w2 = params["w2p_t"][l, :F_, :].astype(jnp.float32)

        ln = _layernorm(x)
        qkv = ln @ wqkv + params["bqkv"][l]
        q, k, v = qkv[..., :H], qkv[..., H:2 * H], qkv[..., 2 * H:]

        def split(t):
            return t.reshape(B, S, num_heads, hd).transpose(0, 2, 1, 3)
        qh, kh, vh = split(q), split(k), split(v)
        s = qh @ kh.transpose(0, 1, 3, 2) + neg    # 1/sqrt(hd) already folded into wqkv
        attn = jax.nn.softmax(s, axis=-1)
        o = (attn @ vh).transpose(0, 2, 1, 3).reshape(B, S, H)
        proj = o @ wo + params["bo"][l]
        x = x + (_layernorm(proj) * params["gamma"][l] + params["beta"][l])

        ln2 = _layernorm(x)
        val, gate = ln2 @ w1a, ln2 @ w1b
        z = _layernorm(val * jax.nn.gelu(gate, approximate=False))
        x = x + z @ w2
    return jnp.transpose(_layernorm(x), (1, 0, 2))


# ----------------------------- main -----------------------------

if __name__ == "__main__":
    num_layers, hidden, num_heads = 2, 32, 4
    S, B = 8, 2
    # TODO(synk): dropout / attention_dropout are eval-mode identities here (inference semantics).

    key = jax.random.PRNGKey(0)
    kx, kp = jax.random.split(key)
    x = jax.random.normal(kx, (S, B, hidden), dtype=jnp.float32)     # (S, B, H), batch_first=False
    padding_mask = jnp.zeros((B, S), dtype=bool).at[1, -2:].set(True)

    params = init_encoder_params(kp, num_layers, hidden, num_heads)

    fwd = jax.jit(functools.partial(encoder_forward, num_heads=num_heads))
    out = jax.block_until_ready(fwd(x, padding_mask, params))

    ref = encoder_ref(x, padding_mask, params, num_heads)
    np.testing.assert_allclose(np.asarray(out), np.asarray(ref), rtol=2e-2, atol=2e-2)
    assert out.shape == (S, B, hidden)
    print("KERNEL_OK")
</pallas_src>

<mosaic_0001>
module attributes {stable_mosaic.version = 11 : i64} {
  func.func @encoder_kernel(%arg0: memref<16x32xf32, #tpu.memory_space<vmem>>, %arg1: memref<2x1x8xf32, #tpu.memory_space<vmem>>, %arg2: memref<2x32x96xbf16, #tpu.memory_space<vmem>>, %arg3: memref<2x1x96xf32, #tpu.memory_space<vmem>>, %arg4: memref<2x4x8x32xbf16, #tpu.memory_space<vmem>>, %arg5: memref<2x1x32xf32, #tpu.memory_space<vmem>>, %arg6: memref<2x1x32xf32, #tpu.memory_space<vmem>>, %arg7: memref<2x1x32xf32, #tpu.memory_space<vmem>>, %arg8: memref<2x32x128xbf16, #tpu.memory_space<vmem>>, %arg9: memref<2x64x32xbf16, #tpu.memory_space<vmem>>, %arg10: memref<16x32xf32, #tpu.memory_space<vmem>>) attributes {dimension_semantics = [], scalar_prefetch = 0 : i64, scratch_operands = 0 : i64, tpu.core_type = #tpu.core_type<tc>} {
    %c0 = arith.constant 0 : index
    %c0_0 = arith.constant 0 : index
    %0 = vector.load %arg0[%c0, %c0_0] : memref<16x32xf32, #tpu.memory_space<vmem>>, vector<16x32xf32>
    %c0_1 = arith.constant 0 : index
    %c0_2 = arith.constant 0 : index
    %c0_3 = arith.constant 0 : index
    %1 = vector.load %arg1[%c0_1, %c0_2, %c0_3] : memref<2x1x8xf32, #tpu.memory_space<vmem>>, vector<2x1x8xf32>
    %cst = arith.constant dense<0.000000e+00> : vector<16xf32>
    %2 = vector.multi_reduction <add>, %0, %cst [1] : vector<16x32xf32> to vector<16xf32>
    %3 = vector.shape_cast %2 : vector<16xf32> to vector<16x1xf32>
    %cst_4 = arith.constant 3.200000e+01 : f32
    %4 = vector.broadcast %cst_4 : f32 to vector<16x1xf32>
    %5 = arith.divf %3, %4 : vector<16x1xf32>
    %6 = vector.broadcast %5 : vector<16x1xf32> to vector<16x32xf32>
    %7 = arith.subf %0, %6 : vector<16x32xf32>
    %8 = arith.mulf %7, %7 : vector<16x32xf32>
    %cst_5 = arith.constant dense<0.000000e+00> : vector<16xf32>
    %9 = vector.multi_reduction <add>, %8, %cst_5 [1] : vector<16x32xf32> to vector<16xf32>
    %10 = vector.shape_cast %9 : vector<16xf32> to vector<16x1xf32>
    %cst_6 = arith.constant 3.200000e+01 : f32
    %11 = vector.broadcast %cst_6 : f32 to vector<16x1xf32>
    %12 = arith.divf %10, %11 : vector<16x1xf32>
    %13 = vector.broadcast %5 : vector<16x1xf32> to vector<16x32xf32>
    %14 = arith.subf %0, %13 : vector<16x32xf32>
    %cst_7 = arith.constant 9.99999974E-6 : f32
    %15 = vector.broadcast %cst_7 : f32 to vector<16x1xf32>
    %16 = arith.addf %12, %15 : vector<16x1xf32>
    %17 = math.rsqrt %16 : vector<16x1xf32>
    %18 = vector.broadcast %17 : vector<16x1xf32> to vector<16x32xf32>
    %19 = arith.mulf %14, %18 : vector<16x32xf32>
    %20 = arith.truncf %19 : vector<16x32xf32> to vector<16x32xbf16>
    %c0_8 = arith.constant 0 : index
    %c0_9 = arith.constant 0 : index
    %c0_10 = arith.constant 0 : index
    %21 = vector.load %arg2[%c0_8, %c0_9, %c0_10] : memref<2x32x96xbf16, #tpu.memory_space<vmem>>, vector<1x32x96xbf16>
    %22 = vector.shape_cast %21 : vector<1x32x96xbf16> to vector<32x96xbf16>
    %cst_11 = arith.constant dense<0.000000e+00> : vector<16x96xf32>
    %23 = tpu.matmul %20, %22, %cst_11 {dimension_numbers = #tpu.dot_dimension_numbers<[1], [0], [0], [1], [0, 0, 1, 1], [], []>} : vector<16x32xbf16>, vector<32x96xbf16>, vector<16x96xf32> -> vector<16x96xf32>
    %c0_12 = arith.constant 0 : index
    %c0_13 = arith.constant 0 : index
    %c0_14 = arith.constant 0 : index
    %24 = vector.load %arg3[%c0_12, %c0_13, %c0_14] : memref<2x1x96xf32, #tpu.memory_space<vmem>>, vector<1x1x96xf32>
    %25 = vector.shape_cast %24 : vector<1x1x96xf32> to vector<1x96xf32>
    %26 = vector.broadcast %25 : vector<1x96xf32> to vector<16x96xf32>
    %27 = arith.addf %23, %26 : vector<16x96xf32>
    %28 = arith.truncf %27 : vector<16x96xf32> to vector<16x96xbf16>
    %cst_15 = arith.constant 0.000000e+00 : f32
    %29 = vector.broadcast %cst_15 : f32 to vector<16x32xf32>
    %30 = vector.extract_strided_slice %28 {offsets = [0, 0], sizes = [16, 8], strides = [1, 1]} : vector<16x96xbf16> to vector<16x8xbf16>
    %31 = vector.shape_cast %30 : vector<16x8xbf16> to vector<2x8x8xbf16>
    %32 = vector.extract_strided_slice %28 {offsets = [0, 32], sizes = [16, 8], strides = [1, 1]} : vector<16x96xbf16> to vector<16x8xbf16>
    %33 = vector.shape_cast %32 : vector<16x8xbf16> to vector<2x8x8xbf16>
    %34 = vector.extract_strided_slice %28 {offsets = [0, 64], sizes = [16, 8], strides = [1, 1]} : vector<16x96xbf16> to vector<16x8xbf16>
    %35 = vector.shape_cast %34 : vector<16x8xbf16> to vector<2x8x8xbf16>
    "tpu.trace_start"() <{level = 10 : i32, message = "bqd,bkd->bqk"}> : () -> ()
    %cst_16 = arith.constant dense<0.000000e+00> : vector<2x8x8xf32>
    %36 = tpu.matmul %31, %33, %cst_16 {dimension_numbers = #tpu.dot_dimension_numbers<[2], [2], [1], [1], [0, 0, 0, 1, 1, 1], [0], [0]>} : vector<2x8x8xbf16>, vector<2x8x8xbf16>, vector<2x8x8xf32> -> vector<2x8x8xf32>
    "tpu.trace_stop"() : () -> ()
    %37 = vector.broadcast %1 : vector<2x1x8xf32> to vector<2x8x8xf32>
    %38 = arith.addf %36, %37 : vector<2x8x8xf32>
    %cst_17 = arith.constant dense<0xFF800000> : vector<2x8xf32>
    %39 = vector.multi_reduction <maximumf>, %38, %cst_17 [2] : vector<2x8x8xf32> to vector<2x8xf32>
    %40 = vector.shape_cast %39 : vector<2x8xf32> to vector<2x8x1xf32>
    %41 = vector.broadcast %40 : vector<2x8x1xf32> to vector<2x8x8xf32>
    %42 = arith.subf %38, %41 : vector<2x8x8xf32>
    %43 = math.exp %42 : vector<2x8x8xf32>
    %cst_18 = arith.constant dense<0.000000e+00> : vector<2x8xf32>
    %44 = vector.multi_reduction <add>, %43, %cst_18 [2] : vector<2x8x8xf32> to vector<2x8xf32>
    %45 = vector.shape_cast %44 : vector<2x8xf32> to vector<2x8x1xf32>
    %46 = tpu.reciprocal %45 {approx = true} : vector<2x8x1xf32> -> vector<2x8x1xf32>
    %47 = vector.broadcast %46 : vector<2x8x1xf32> to vector<2x8x8xf32>
    %48 = arith.mulf %43, %47 : vector<2x8x8xf32>
    %49 = arith.truncf %48 : vector<2x8x8xf32> to vector<2x8x8xbf16>
    "tpu.trace_start"() <{level = 10 : i32, message = "bqk,bkd->bqd"}> : () -> ()
    %cst_19 = arith.constant dense<0.000000e+00> : vector<2x8x8xf32>
    %50 = tpu.matmul %49, %35, %cst_19 {dimension_numbers = #tpu.dot_dimension_numbers<[2], [1], [1], [2], [0, 0, 0, 1, 1, 2], [0], [0]>} : vector<2x8x8xbf16>, vector<2x8x8xbf16>, vector<2x8x8xf32> -> vector<2x8x8xf32>
    "tpu.trace_stop"() : () -> ()
    %51 = vector.shape_cast %50 : vector<2x8x8xf32> to vector<16x8xf32>
    %52 = arith.truncf %51 : vector<16x8xf32> to vector<16x8xbf16>
    %c0_20 = arith.constant 0 : index
    %c0_21 = arith.constant 0 : index
    %c0_22 = arith.constant 0 : index
    %c0_23 = arith.constant 0 : index
    %53 = vector.load %arg4[%c0_20, %c0_21, %c0_22, %c0_23] : memref<2x4x8x32xbf16, #tpu.memory_space<vmem>>, vector<1x1x8x32xbf16>
    %54 = vector.shape_cast %53 : vector<1x1x8x32xbf16> to vector<8x32xbf16>
    %cst_24 = arith.constant dense<0.000000e+00> : vector<16x32xf32>
    %55 = tpu.matmul %52, %54, %cst_24 {dimension_numbers = #tpu.dot_dimension_numbers<[1], [0], [0], [1], [0, 0, 1, 1], [], []>} : vector<16x8xbf16>, vector<8x32xbf16>, vector<16x32xf32> -> vector<16x32xf32>
    %56 = arith.addf %29, %55 : vector<16x32xf32>
    %57 = vector.extract_strided_slice %28 {offsets = [0, 8], sizes = [16, 8], strides = [1, 1]} : vector<16x96xbf16> to vector<16x8xbf16>
    %58 = vector.shape_cast %57 : vector<16x8xbf16> to vector<2x8x8xbf16>
    %59 = vector.extract_strided_slice %28 {offsets = [0, 40], sizes = [16, 8], strides = [1, 1]} : vector<16x96xbf16> to vector<16x8xbf16>
    %60 = vector.shape_cast %59 : vector<16x8xbf16> to vector<2x8x8xbf16>
    %61 = vector.extract_strided_slice %28 {offsets = [0, 72], sizes = [16, 8], strides = [1, 1]} : vector<16x96xbf16> to vector<16x8xbf16>
    %62 = vector.shape_cast %61 : vector<16x8xbf16> to vector<2x8x8xbf16>
    "tpu.trace_start"() <{level = 10 : i32, message = "bqd,bkd->bqk"}> : () -> ()
    %cst_25 = arith.constant dense<0.000000e+00> : vector<2x8x8xf32>
    %63 = tpu.matmul %58, %60, %cst_25 {dimension_numbers = #tpu.dot_dimension_numbers<[2], [2], [1], [1], [0, 0, 0, 1, 1, 1], [0], [0]>} : vector<2x8x8xbf16>, vector<2x8x8xbf16>, vector<2x8x8xf32> -> vector<2x8x8xf32>
    "tpu.trace_stop"() : () -> ()
    %64 = vector.broadcast %1 : vector<2x1x8xf32> to vector<2x8x8xf32>
    %65 = arith.addf %63, %64 : vector<2x8x8xf32>
    %cst_26 = arith.constant dense<0xFF800000> : vector<2x8xf32>
    %66 = vector.multi_reduction <maximumf>, %65, %cst_26 [2] : vector<2x8x8xf32> to vector<2x8xf32>
    %67 = vector.shape_cast %66 : vector<2x8xf32> to vector<2x8x1xf32>
    %68 = vector.broadcast %67 : vector<2x8x1xf32> to vector<2x8x8xf32>
    %69 = arith.subf %65, %68 : vector<2x8x8xf32>
    %70 = math.exp %69 : vector<2x8x8xf32>
    %cst_27 = arith.constant dense<0.000000e+00> : vector<2x8xf32>
    %71 = vector.multi_reduction <add>, %70, %cst_27 [2] : vector<2x8x8xf32> to vector<2x8xf32>
    %72 = vector.shape_cast %71 : vector<2x8xf32> to vector<2x8x1xf32>
    %73 = tpu.reciprocal %72 {approx = true} : vector<2x8x1xf32> -> vector<2x8x1xf32>
    %74 = vector.broadcast %73 : vector<2x8x1xf32> to vector<2x8x8xf32>
    %75 = arith.mulf %70, %74 : vector<2x8x8xf32>
    %76 = arith.truncf %75 : vector<2x8x8xf32> to vector<2x8x8xbf16>
    "tpu.trace_start"() <{level = 10 : i32, message = "bqk,bkd->bqd"}> : () -> ()
    %cst_28 = arith.constant dense<0.000000e+00> : vector<2x8x8xf32>
    %77 = tpu.matmul %76, %62, %cst_28 {dimension_numbers = #tpu.dot_dimension_numbers<[2], [1], [1], [2], [0, 0, 0, 1, 1, 2], [0], [0]>} : vector<2x8x8xbf16>, vector<2x8x8xbf16>, vector<2x8x8xf32> -> vector<2x8x8xf32>
    "tpu.trace_stop"() : () -> ()
    %78 = vector.shape_cast %77 : vector<2x8x8xf32> to vector<16x8xf32>
    %79 = arith.truncf %78 : vector<16x8xf32> to vector<16x8xbf16>
    %c0_29 = arith.constant 0 : index
    %c1 = arith.constant 1 : index
    %c0_30 = arith.constant 0 : index
    %c0_31 = arith.constant 0 : index
    %80 = vector.load %arg4[%c0_29, %c1, %c0_30, %c0_31] : memref<2x4x8x32xbf16, #tpu.memory_space<vmem>>, vector<1x1x8x32xbf16>
    %81 = vector.shape_cast %80 : vector<1x1x8x32xbf16> to vector<8x32xbf16>
    %cst_32 = arith.constant dense<0.000000e+00> : vector<16x32xf32>
    %82 = tpu.matmul %79, %81, %cst_32 {dimension_numbers = #tpu.dot_dimension_numbers<[1], [0], [0], [1], [0, 0, 1, 1], [], []>} : vector<16x8xbf16>, vector<8x32xbf16>, vector<16x32xf32> -> vector<16x32xf32>
    %83 = arith.addf %56, %82 : vector<16x32xf32>
    %84 = vector.extract_strided_slice %28 {offsets = [0, 16], sizes = [16, 8], strides = [1, 1]} : vector<16x96xbf16> to vector<16x8xbf16>
    %85 = vector.shape_cast %84 : vector<16x8xbf16> to vector<2x8x8xbf16>
    %86 = vector.extract_strided_slice %28 {offsets = [0, 48], sizes = [16, 8], strides = [1, 1]} : vector<16x96xbf16> to vector<16x8xbf16>
    %87 = vector.shape_cast %86 : vector<16x8xbf16> to vector<2x8x8xbf16>
    %88 = vector.extract_strided_slice %28 {offsets = [0, 80], sizes = [16, 8], strides = [1, 1]} : vector<16x96xbf16> to vector<16x8xbf16>
    %89 = vector.shape_cast %88 : vector<16x8xbf16> to vector<2x8x8xbf16>
    "tpu.trace_start"() <{level = 10 : i32, message = "bqd,bkd->bqk"}> : () -> ()
    %cst_33 = arith.constant dense<0.000000e+00> : vector<2x8x8xf32>
    %90 = tpu.matmul %85, %87, %cst_33 {dimension_numbers = #tpu.dot_dimension_numbers<[2], [2], [1], [1], [0, 0, 0, 1, 1, 1], [0], [0]>} : vector<2x8x8xbf16>, vector<2x8x8xbf16>, vector<2x8x8xf32> -> vector<2x8x8xf32>
    "tpu.trace_stop"() : () -> ()
    %91 = vector.broadcast %1 : vector<2x1x8xf32> to vector<2x8x8xf32>
    %92 = arith.addf %90, %91 : vector<2x8x8xf32>
    %cst_34 = arith.constant dense<0xFF800000> : vector<2x8xf32>
    %93 = vector.multi_reduction <maximumf>, %92, %cst_34 [2] : vector<2x8x8xf32> to vector<2x8xf32>
    %94 = vector.shape_cast %93 : vector<2x8xf32> to vector<2x8x1xf32>
    %95 = vector.broadcast %94 : vector<2x8x1xf32> to vector<2x8x8xf32>
    %96 = arith.subf %92, %95 : vector<2x8x8xf32>
    %97 = math.exp %96 : vector<2x8x8xf32>
    %cst_35 = arith.constant dense<0.000000e+00> : vector<2x8xf32>
    %98 = vector.multi_reduction <add>, %97, %cst_35 [2] : vector<2x8x8xf32> to vector<2x8xf32>
    %99 = vector.shape_cast %98 : vector<2x8xf32> to vector<2x8x1xf32>
    %100 = tpu.reciprocal %99 {approx = true} : vector<2x8x1xf32> -> vector<2x8x1xf32>
    %101 = vector.broadcast %100 : vector<2x8x1xf32> to vector<2x8x8xf32>
    %102 = arith.mulf %97, %101 : vector<2x8x8xf32>
    %103 = arith.truncf %102 : vector<2x8x8xf32> to vector<2x8x8xbf16>
    "tpu.trace_start"() <{level = 10 : i32, message = "bqk,bkd->bqd"}> : () -> ()
    %cst_36 = arith.constant dense<0.000000e+00> : vector<2x8x8xf32>
    %104 = tpu.matmul %103, %89, %cst_36 {dimension_numbers = #tpu.dot_dimension_numbers<[2], [1], [1], [2], [0, 0, 0, 1, 1, 2], [0], [0]>} : vector<2x8x8xbf16>, vector<2x8x8xbf16>, vector<2x8x8xf32> -> vector<2x8x8xf32>
    "tpu.trace_stop"() : () -> ()
    %105 = vector.shape_cast %104 : vector<2x8x8xf32> to vector<16x8xf32>
    %106 = arith.truncf %105 : vector<16x8xf32> to vector<16x8xbf16>
    %c0_37 = arith.constant 0 : index
    %c2 = arith.constant 2 : index
    %c0_38 = arith.constant 0 : index
    %c0_39 = arith.constant 0 : index
    %107 = vector.load %arg4[%c0_37, %c2, %c0_38, %c0_39] : memref<2x4x8x32xbf16, #tpu.memory_space<vmem>>, vector<1x1x8x32xbf16>
    %108 = vector.shape_cast %107 : vector<1x1x8x32xbf16> to vector<8x32xbf16>
    %cst_40 = arith.constant dense<0.000000e+00> : vector<16x32xf32>
    %109 = tpu.matmul %106, %108, %cst_40 {dimension_numbers = #tpu.dot_dimension_numbers<[1], [0], [0], [1], [0, 0, 1, 1], [], []>} : vector<16x8xbf16>, vector<8x32xbf16>, vector<16x32xf32> -> vector<16x32xf32>
    %110 = arith.addf %83, %109 : vector<16x32xf32>
    %111 = vector.extract_strided_slice %28 {offsets = [0, 24], sizes = [16, 8], strides = [1, 1]} : vector<16x96xbf16> to vector<16x8xbf16>
    %112 = vector.shape_cast %111 : vector<16x8xbf16> to vector<2x8x8xbf16>
    %113 = vector.extract_strided_slice %28 {offsets = [0, 56], sizes = [16, 8], strides = [1, 1]} : vector<16x96xbf16> to vector<16x8xbf16>
    %114 = vector.shape_cast %113 : vector<16x8xbf16> to vector<2x8x8xbf16>
    %115 = vector.extract_strided_slice %28 {offsets = [0, 88], sizes = [16, 8], strides = [1, 1]} : vector<16x96xbf16> to vector<16x8xbf16>
    %116 = vector.shape_cast %115 : vector<16x8xbf16> to vector<2x8x8xbf16>
    "tpu.trace_start"() <{level = 10 : i32, message = "bqd,bkd->bqk"}> : () -> ()
    %cst_41 = arith.constant dense<0.000000e+00> : vector<2x8x8xf32>
    %117 = tpu.matmul %112, %114, %cst_41 {dimension_numbers = #tpu.dot_dimension_numbers<[2], [2], [1], [1], [0, 0, 0, 1, 1, 1], [0], [0]>} : vector<2x8x8xbf16>, vector<2x8x8xbf16>, vector<2x8x8xf32> -> vector<2x8x8xf32>
    "tpu.trace_stop"() : () -> ()
    %118 = vector.broadcast %1 : vector<2x1x8xf32> to vector<2x8x8xf32>
    %119 = arith.addf %117, %118 : vector<2x8x8xf32>
    %cst_42 = arith.constant dense<0xFF800000> : vector<2x8xf32>
    %120 = vector.multi_reduction <maximumf>, %119, %cst_42 [2] : vector<2x8x8xf32> to vector<2x8xf32>
    %121 = vector.shape_cast %120 : vector<2x8xf32> to vector<2x8x1xf32>
    %122 = vector.broadcast %121 : vector<2x8x1xf32> to vector<2x8x8xf32>
    %123 = arith.subf %119, %122 : vector<2x8x8xf32>
    %124 = math.exp %123 : vector<2x8x8xf32>
    %cst_43 = arith.constant dense<0.000000e+00> : vector<2x8xf32>
    %125 = vector.multi_reduction <add>, %124, %cst_43 [2] : vector<2x8x8xf32> to vector<2x8xf32>
    %126 = vector.shape_cast %125 : vector<2x8xf32> to vector<2x8x1xf32>
    %127 = tpu.reciprocal %126 {approx = true} : vector<2x8x1xf32> -> vector<2x8x1xf32>
    %128 = vector.broadcast %127 : vector<2x8x1xf32> to vector<2x8x8xf32>
    %129 = arith.mulf %124, %128 : vector<2x8x8xf32>
    %130 = arith.truncf %129 : vector<2x8x8xf32> to vector<2x8x8xbf16>
    "tpu.trace_start"() <{level = 10 : i32, message = "bqk,bkd->bqd"}> : () -> ()
    %cst_44 = arith.constant dense<0.000000e+00> : vector<2x8x8xf32>
    %131 = tpu.matmul %130, %116, %cst_44 {dimension_numbers = #tpu.dot_dimension_numbers<[2], [1], [1], [2], [0, 0, 0, 1, 1, 2], [0], [0]>} : vector<2x8x8xbf16>, vector<2x8x8xbf16>, vector<2x8x8xf32> -> vector<2x8x8xf32>
    "tpu.trace_stop"() : () -> ()
    %132 = vector.shape_cast %131 : vector<2x8x8xf32> to vector<16x8xf32>
    %133 = arith.truncf %132 : vector<16x8xf32> to vector<16x8xbf16>
    %c0_45 = arith.constant 0 : index
    %c3 = arith.constant 3 : index
    %c0_46 = arith.constant 0 : index
    %c0_47 = arith.constant 0 : index
    %134 = vector.load %arg4[%c0_45, %c3, %c0_46, %c0_47] : memref<2x4x8x32xbf16, #tpu.memory_space<vmem>>, vector<1x1x8x32xbf16>
    %135 = vector.shape_cast %134 : vector<1x1x8x32xbf16> to vector<8x32xbf16>
    %cst_48 = arith.constant dense<0.000000e+00> : vector<16x32xf32>
    %136 = tpu.matmul %133, %135, %cst_48 {dimension_numbers = #tpu.dot_dimension_numbers<[1], [0], [0], [1], [0, 0, 1, 1], [], []>} : vector<16x8xbf16>, vector<8x32xbf16>, vector<16x32xf32> -> vector<16x32xf32>
    %137 = arith.addf %110, %136 : vector<16x32xf32>
    %c0_49 = arith.constant 0 : index
    %c0_50 = arith.constant 0 : index
    %c0_51 = arith.constant 0 : index
    %138 = vector.load %arg5[%c0_49, %c0_50, %c0_51] : memref<2x1x32xf32, #tpu.memory_space<vmem>>, vector<1x1x32xf32>
    %139 = vector.shape_cast %138 : vector<1x1x32xf32> to vector<1x32xf32>
    %140 = vector.broadcast %139 : vector<1x32xf32> to vector<16x32xf32>
    %141 = arith.addf %137, %140 : vector<16x32xf32>
    %cst_52 = arith.constant dense<0.000000e+00> : vector<16xf32>
    %142 = vector.multi_reduction <add>, %141, %cst_52 [1] : vector<16x32xf32> to vector<16xf32>
    %143 = vector.shape_cast %142 : vector<16xf32> to vector<16x1xf32>
    %cst_53 = arith.constant 3.200000e+01 : f32
    %144 = vector.broadcast %cst_53 : f32 to vector<16x1xf32>
    %145 = arith.divf %143, %144 : vector<16x1xf32>
    %146 = vector.broadcast %145 : vector<16x1xf32> to vector<16x32xf32>
    %147 = arith.subf %141, %146 : vector<16x32xf32>
    %148 = arith.mulf %147, %147 : vector<16x32xf32>
    %cst_54 = arith.constant dense<0.000000e+00> : vector<16xf32>
    %149 = vector.multi_reduction <add>, %148, %cst_54 [1] : vector<16x32xf32> to vector<16xf32>
    %150 = vector.shape_cast %149 : vector<16xf32> to vector<16x1xf32>
    %cst_55 = arith.constant 3.200000e+01 : f32
    %151 = vector.broadcast %cst_55 : f32 to vector<16x1xf32>
    %152 = arith.divf %150, %151 : vector<16x1xf32>
    %153 = vector.broadcast %145 : vector<16x1xf32> to vector<16x32xf32>
    %154 = arith.subf %141, %153 : vector<16x32xf32>
    %cst_56 = arith.constant 9.99999974E-6 : f32
    %155 = vector.broadcast %cst_56 : f32 to vector<16x1xf32>
    %156 = arith.addf %152, %155 : vector<16x1xf32>
    %157 = math.rsqrt %156 : vector<16x1xf32>
    %158 = vector.broadcast %157 : vector<16x1xf32> to vector<16x32xf32>
    %159 = arith.mulf %154, %158 : vector<16x32xf32>
    %c0_57 = arith.constant 0 : index
    %c0_58 = arith.constant 0 : index
    %c0_59 = arith.constant 0 : index
    %160 = vector.load %arg6[%c0_57, %c0_58, %c0_59] : memref<2x1x32xf32, #tpu.memory_space<vmem>>, vector<1x1x32xf32>
    %161 = vector.shape_cast %160 : vector<1x1x32xf32> to vector<1x32xf32>
    %162 = vector.broadcast %161 : vector<1x32xf32> to vector<16x32xf32>
    %163 = arith.mulf %159, %162 : vector<16x32xf32>
    %c0_60 = arith.constant 0 : index
    %c0_61 = arith.constant 0 : index
    %c0_62 = arith.constant 0 : index
    %164 = vector.load %arg7[%c0_60, %c0_61, %c0_62] : memref<2x1x32xf32, #tpu.memory_space<vmem>>, vector<1x1x32xf32>
    %165 = vector.shape_cast %164 : vector<1x1x32xf32> to vector<1x32xf32>
    %166 = vector.broadcast %165 : vector<1x32xf32> to vector<16x32xf32>
    %167 = arith.addf %163, %166 : vector<16x32xf32>
    %168 = arith.addf %0, %167 : vector<16x32xf32>
    %cst_63 = arith.constant dense<0.000000e+00> : vector<16xf32>
    %169 = vector.multi_reduction <add>, %168, %cst_63 [1] : vector<16x32xf32> to vector<16xf32>
    %170 = vector.shape_cast %169 : vector<16xf32> to vector<16x1xf32>
    %cst_64 = arith.constant 3.200000e+01 : f32
    %171 = vector.broadcast %cst_64 : f32 to vector<16x1xf32>
    %172 = arith.divf %170, %171 : vector<16x1xf32>
    %173 = vector.broadcast %172 : vector<16x1xf32> to vector<16x32xf32>
    %174 = arith.subf %168, %173 : vector<16x32xf32>
    %175 = arith.mulf %174, %174 : vector<16x32xf32>
    %cst_65 = arith.constant dense<0.000000e+00> : vector<16xf32>
    %176 = vector.multi_reduction <add>, %175, %cst_65 [1] : vector<16x32xf32> to vector<16xf32>
    %177 = vector.shape_cast %176 : vector<16xf32> to vector<16x1xf32>
    %cst_66 = arith.constant 3.200000e+01 : f32
    %178 = vector.broadcast %cst_66 : f32 to vector<16x1xf32>
    %179 = arith.divf %177, %178 : vector<16x1xf32>
    %180 = vector.broadcast %172 : vector<16x1xf32> to vector<16x32xf32>
    %181 = arith.subf %168, %180 : vector<16x32xf32>
    %cst_67 = arith.constant 9.99999974E-6 : f32
    %182 = vector.broadcast %cst_67 : f32 to vector<16x1xf32>
    %183 = arith.addf %179, %182 : vector<16x1xf32>
    %184 = math.rsqrt %183 : vector<16x1xf32>
    %185 = vector.broadcast %184 : vector<16x1xf32> to vector<16x32xf32>
    %186 = arith.mulf %181, %185 : vector<16x32xf32>
    %187 = arith.truncf %186 : vector<16x32xf32> to vector<16x32xbf16>
    %c0_68 = arith.constant 0 : index
    %c0_69 = arith.constant 0 : index
    %c0_70 = arith.constant 0 : index
    %188 = vector.load %arg8[%c0_68, %c0_69, %c0_70] : memref<2x32x128xbf16, #tpu.memory_space<vmem>>, vector<1x32x128xbf16>
    %189 = vector.shape_cast %188 : vector<1x32x128xbf16> to vector<32x128xbf16>
    %cst_71 = arith.constant dense<0.000000e+00> : vector<16x128xf32>
    %190 = tpu.matmul %187, %189, %cst_71 {dimension_numbers = #tpu.dot_dimension_numbers<[1], [0], [0], [1], [0, 0, 1, 1], [], []>} : vector<16x32xbf16>, vector<32x128xbf16>, vector<16x128xf32> -> vector<16x128xf32>
    %191 = vector.extract_strided_slice %190 {offsets = [0, 0], sizes = [16, 64], strides = [1, 1]} : vector<16x128xf32> to vector<16x64xf32>
    %192 = vector.extract_strided_slice %190 {offsets = [0, 64], sizes = [16, 64], strides = [1, 1]} : vector<16x128xf32> to vector<16x64xf32>
    %cst_72 = arith.constant 5.000000e-01 : f32
    %193 = vector.broadcast %cst_72 : f32 to vector<16x64xf32>
    %194 = arith.mulf %193, %192 : vector<16x64xf32>
    %cst_73 = arith.constant 0.707106769 : f32
    %195 = vector.broadcast %cst_73 : f32 to vector<16x64xf32>
    %196 = arith.mulf %192, %195 : vector<16x64xf32>
    %cst_74 = arith.constant 0.000000e+00 : f32
    %197 = vector.broadcast %cst_74 : f32 to vector<16x64xf32>
    %198 = arith.cmpf oge, %196, %197 : vector<16x64xf32>
    %cst_75 = arith.constant 1.000000e+00 : f32
    %cst_76 = arith.constant -1.000000e+00 : f32
    %199 = vector.broadcast %cst_75 : f32 to vector<16x64xf32>
    %200 = vector.broadcast %cst_76 : f32 to vector<16x64xf32>
    %201 = arith.select %198, %199, %200 : vector<16x64xi1>, vector<16x64xf32>
    %202 = math.absf %196 : vector<16x64xf32>
    %cst_77 = arith.constant 0.327591091 : f32
    %203 = vector.broadcast %cst_77 : f32 to vector<16x64xf32>
    %204 = arith.mulf %203, %202 : vector<16x64xf32>
    %cst_78 = arith.constant 1.000000e+00 : f32
    %205 = vector.broadcast %cst_78 : f32 to vector<16x64xf32>
    %206 = arith.addf %205, %204 : vector<16x64xf32>
    %cst_79 = arith.constant 1.000000e+00 : f32
    %207 = vector.broadcast %cst_79 : f32 to vector<16x64xf32>
    %208 = arith.divf %207, %206 : vector<16x64xf32>
    %cst_80 = arith.constant 1.06140542 : f32
    %209 = vector.broadcast %cst_80 : f32 to vector<16x64xf32>
    %210 = arith.mulf %209, %208 : vector<16x64xf32>
    %cst_81 = arith.constant -1.45315206 : f32
    %211 = vector.broadcast %cst_81 : f32 to vector<16x64xf32>
    %212 = arith.addf %210, %211 : vector<16x64xf32>
    %213 = arith.mulf %212, %208 : vector<16x64xf32>
    %cst_82 = arith.constant 1.42141378 : f32
    %214 = vector.broadcast %cst_82 : f32 to vector<16x64xf32>
    %215 = arith.addf %213, %214 : vector<16x64xf32>
    %216 = arith.mulf %215, %208 : vector<16x64xf32>
    %cst_83 = arith.constant -0.284496725 : f32
    %217 = vector.broadcast %cst_83 : f32 to vector<16x64xf32>
    %218 = arith.addf %216, %217 : vector<16x64xf32>
    %219 = arith.mulf %218, %208 : vector<16x64xf32>
    %cst_84 = arith.constant 0.254829586 : f32
    %220 = vector.broadcast %cst_84 : f32 to vector<16x64xf32>
    %221 = arith.addf %219, %220 : vector<16x64xf32>
    %222 = arith.mulf %221, %208 : vector<16x64xf32>
    %cst_85 = arith.constant 0.000000e+00 : f32
    %223 = vector.broadcast %cst_85 : f32 to vector<16x64xf32>
    %224 = arith.subf %223, %202 : vector<16x64xf32>
    %225 = arith.mulf %224, %202 : vector<16x64xf32>
    %226 = math.exp %225 : vector<16x64xf32>
    %227 = arith.mulf %222, %226 : vector<16x64xf32>
    %cst_86 = arith.constant 1.000000e+00 : f32
    %228 = vector.broadcast %cst_86 : f32 to vector<16x64xf32>
    %229 = arith.subf %228, %227 : vector<16x64xf32>
    %230 = arith.mulf %201, %229 : vector<16x64xf32>
    %cst_87 = arith.constant 1.000000e+00 : f32
    %231 = vector.broadcast %cst_87 : f32 to vector<16x64xf32>
    %232 = arith.addf %231, %230 : vector<16x64xf32>
    %233 = arith.mulf %194, %232 : vector<16x64xf32>
    %234 = arith.mulf %191, %233 : vector<16x64xf32>
    %cst_88 = arith.constant dense<0.000000e+00> : vector<16xf32>
    %235 = vector.multi_reduction <add>, %234, %cst_88 [1] : vector<16x64xf32> to vector<16xf32>
    %236 = vector.shape_cast %235 : vector<16xf32> to vector<16x1xf32>
    %cst_89 = arith.constant 0.0238095243 : f32
    %237 = vector.broadcast %cst_89 : f32 to vector<16x1xf32>
    %238 = arith.mulf %236, %237 : vector<16x1xf32>
    %239 = arith.mulf %234, %234 : vector<16x64xf32>
    %cst_90 = arith.constant dense<0.000000e+00> : vector<16xf32>
    %240 = vector.multi_reduction <add>, %239, %cst_90 [1] : vector<16x64xf32> to vector<16xf32>
    %241 = vector.shape_cast %240 : vector<16xf32> to vector<16x1xf32>
    %cst_91 = arith.constant 0.0238095243 : f32
    %242 = vector.broadcast %cst_91 : f32 to vector<16x1xf32>
    %243 = arith.mulf %241, %242 : vector<16x1xf32>
    %244 = arith.mulf %238, %238 : vector<16x1xf32>
    %245 = arith.subf %243, %244 : vector<16x1xf32>
    %246 = vector.broadcast %238 : vector<16x1xf32> to vector<16x64xf32>
    %247 = arith.subf %234, %246 : vector<16x64xf32>
    %cst_92 = arith.constant 9.99999974E-6 : f32
    %248 = vector.broadcast %cst_92 : f32 to vector<16x1xf32>
    %249 = arith.addf %245, %248 : vector<16x1xf32>
    %250 = math.rsqrt %249 : vector<16x1xf32>
    %251 = vector.broadcast %250 : vector<16x1xf32> to vector<16x64xf32>
    %252 = arith.mulf %247, %251 : vector<16x64xf32>
    %253 = arith.truncf %252 : vector<16x64xf32> to vector<16x64xbf16>
    %c0_93 = arith.constant 0 : index
    %c0_94 = arith.constant 0 : index
    %c0_95 = arith.constant 0 : index
    %254 = vector.load %arg9[%c0_93, %c0_94, %c0_95] : memref<2x64x32xbf16, #tpu.memory_space<vmem>>, vector<1x64x32xbf16>
    %255 = vector.shape_cast %254 : vector<1x64x32xbf16> to vector<64x32xbf16>
    %cst_96 = arith.constant dense<0.000000e+00> : vector<16x32xf32>
    %256 = tpu.matmul %253, %255, %cst_96 {dimension_numbers = #tpu.dot_dimension_numbers<[1], [0], [0], [1], [0, 0, 1, 1], [], []>} : vector<16x64xbf16>, vector<64x32xbf16>, vector<16x32xf32> -> vector<16x32xf32>
    %257 = arith.addf %168, %256 : vector<16x32xf32>
    %cst_97 = arith.constant dense<0.000000e+00> : vector<16xf32>
    %258 = vector.multi_reduction <add>, %257, %cst_97 [1] : vector<16x32xf32> to vector<16xf32>
    %259 = vector.shape_cast %258 : vector<16xf32> to vector<16x1xf32>
    %cst_98 = arith.constant 3.200000e+01 : f32
    %260 = vector.broadcast %cst_98 : f32 to vector<16x1xf32>
    %261 = arith.divf %259, %260 : vector<16x1xf32>
    %262 = vector.broadcast %261 : vector<16x1xf32> to vector<16x32xf32>
    %263 = arith.subf %257, %262 : vector<16x32xf32>
    %264 = arith.mulf %263, %263 : vector<16x32xf32>
    %cst_99 = arith.constant dense<0.000000e+00> : vector<16xf32>
    %265 = vector.multi_reduction <add>, %264, %cst_99 [1] : vector<16x32xf32> to vector<16xf32>
    %266 = vector.shape_cast %265 : vector<16xf32> to vector<16x1xf32>
    %cst_100 = arith.constant 3.200000e+01 : f32
    %267 = vector.broadcast %cst_100 : f32 to vector<16x1xf32>
    %268 = arith.divf %266, %267 : vector<16x1xf32>
    %269 = vector.broadcast %261 : vector<16x1xf32> to vector<16x32xf32>
    %270 = arith.subf %257, %269 : vector<16x32xf32>
    %cst_101 = arith.constant 9.99999974E-6 : f32
    %271 = vector.broadcast %cst_101 : f32 to vector<16x1xf32>
    %272 = arith.addf %268, %271 : vector<16x1xf32>
    %273 = math.rsqrt %272 : vector<16x1xf32>
    %274 = vector.broadcast %273 : vector<16x1xf32> to vector<16x32xf32>
    %275 = arith.mulf %270, %274 : vector<16x32xf32>
    %276 = arith.truncf %275 : vector<16x32xf32> to vector<16x32xbf16>
    %c1_102 = arith.constant 1 : index
    %c0_103 = arith.constant 0 : index
    %c0_104 = arith.constant 0 : index
    %277 = vector.load %arg2[%c1_102, %c0_103, %c0_104] : memref<2x32x96xbf16, #tpu.memory_space<vmem>>, vector<1x32x96xbf16>
    %278 = vector.shape_cast %277 : vector<1x32x96xbf16> to vector<32x96xbf16>
    %cst_105 = arith.constant dense<0.000000e+00> : vector<16x96xf32>
    %279 = tpu.matmul %276, %278, %cst_105 {dimension_numbers = #tpu.dot_dimension_numbers<[1], [0], [0], [1], [0, 0, 1, 1], [], []>} : vector<16x32xbf16>, vector<32x96xbf16>, vector<16x96xf32> -> vector<16x96xf32>
    %c1_106 = arith.constant 1 : index
    %c0_107 = arith.constant 0 : index
    %c0_108 = arith.constant 0 : index
    %280 = vector.load %arg3[%c1_106, %c0_107, %c0_108] : memref<2x1x96xf32, #tpu.memory_space<vmem>>, vector<1x1x96xf32>
    %281 = vector.shape_cast %280 : vector<1x1x96xf32> to vector<1x96xf32>
    %282 = vector.broadcast %281 : vector<1x96xf32> to vector<16x96xf32>
    %283 = arith.addf %279, %282 : vector<16x96xf32>
    %284 = arith.truncf %283 : vector<16x96xf32> to vector<16x96xbf16>
    %cst_109 = arith.constant 0.000000e+00 : f32
    %285 = vector.broadcast %cst_109 : f32 to vector<16x32xf32>
    %286 = vector.extract_strided_slice %284 {offsets = [0, 0], sizes = [16, 8], strides = [1, 1]} : vector<16x96xbf16> to vector<16x8xbf16>
    %287 = vector.shape_cast %286 : vector<16x8xbf16> to vector<2x8x8xbf16>
    %288 = vector.extract_strided_slice %284 {offsets = [0, 32], sizes = [16, 8], strides = [1, 1]} : vector<16x96xbf16> to vector<16x8xbf16>
    %289 = vector.shape_cast %288 : vector<16x8xbf16> to vector<2x8x8xbf16>
    %290 = vector.extract_strided_slice %284 {offsets = [0, 64], sizes = [16, 8], strides = [1, 1]} : vector<16x96xbf16> to vector<16x8xbf16>
    %291 = vector.shape_cast %290 : vector<16x8xbf16> to vector<2x8x8xbf16>
    "tpu.trace_start"() <{level = 10 : i32, message = "bqd,bkd->bqk"}> : () -> ()
    %cst_110 = arith.constant dense<0.000000e+00> : vector<2x8x8xf32>
    %292 = tpu.matmul %287, %289, %cst_110 {dimension_numbers = #tpu.dot_dimension_numbers<[2], [2], [1], [1], [0, 0, 0, 1, 1, 1], [0], [0]>} : vector<2x8x8xbf16>, vector<2x8x8xbf16>, vector<2x8x8xf32> -> vector<2x8x8xf32>
    "tpu.trace_stop"() : () -> ()
    %293 = vector.broadcast %1 : vector<2x1x8xf32> to vector<2x8x8xf32>
    %294 = arith.addf %292, %293 : vector<2x8x8xf32>
    %cst_111 = arith.constant dense<0xFF800000> : vector<2x8xf32>
    %295 = vector.multi_reduction <maximumf>, %294, %cst_111 [2] : vector<2x8x8xf32> to vector<2x8xf32>
    %296 = vector.shape_cast %295 : vector<2x8xf32> to vector<2x8x1xf32>
    %297 = vector.broadcast %296 : vector<2x8x1xf32> to vector<2x8x8xf32>
    %298 = arith.subf %294, %297 : vector<2x8x8xf32>
    %299 = math.exp %298 : vector<2x8x8xf32>
    %cst_112 = arith.constant dense<0.000000e+00> : vector<2x8xf32>
    %300 = vector.multi_reduction <add>, %299, %cst_112 [2] : vector<2x8x8xf32> to vector<2x8xf32>
    %301 = vector.shape_cast %300 : vector<2x8xf32> to vector<2x8x1xf32>
    %302 = tpu.reciprocal %301 {approx = true} : vector<2x8x1xf32> -> vector<2x8x1xf32>
    %303 = vector.broadcast %302 : vector<2x8x1xf32> to vector<2x8x8xf32>
    %304 = arith.mulf %299, %303 : vector<2x8x8xf32>
    %305 = arith.truncf %304 : vector<2x8x8xf32> to vector<2x8x8xbf16>
    "tpu.trace_start"() <{level = 10 : i32, message = "bqk,bkd->bqd"}> : () -> ()
    %cst_113 = arith.constant dense<0.000000e+00> : vector<2x8x8xf32>
    %306 = tpu.matmul %305, %291, %cst_113 {dimension_numbers = #tpu.dot_dimension_numbers<[2], [1], [1], [2], [0, 0, 0, 1, 1, 2], [0], [0]>} : vector<2x8x8xbf16>, vector<2x8x8xbf16>, vector<2x8x8xf32> -> vector<2x8x8xf32>
    "tpu.trace_stop"() : () -> ()
    %307 = vector.shape_cast %306 : vector<2x8x8xf32> to vector<16x8xf32>
    %308 = arith.truncf %307 : vector<16x8xf32> to vector<16x8xbf16>
    %c1_114 = arith.constant 1 : index
    %c0_115 = arith.constant 0 : index
    %c0_116 = arith.constant 0 : index
    %c0_117 = arith.constant 0 : index
    %309 = vector.load %arg4[%c1_114, %c0_115, %c0_116, %c0_117] : memref<2x4x8x32xbf16, #tpu.memory_space<vmem>>, vector<1x1x8x32xbf16>
    %310 = vector.shape_cast %309 : vector<1x1x8x32xbf16> to vector<8x32xbf16>
    %cst_118 = arith.constant dense<0.000000e+00> : vector<16x32xf32>
    %311 = tpu.matmul %308, %310, %cst_118 {dimension_numbers = #tpu.dot_dimension_numbers<[1], [0], [0], [1], [0, 0, 1, 1], [], []>} : vector<16x8xbf16>, vector<8x32xbf16>, vector<16x32xf32> -> vector<16x32xf32>
    %312 = arith.addf %285, %311 : vector<16x32xf32>
    %313 = vector.extract_strided_slice %284 {offsets = [0, 8], sizes = [16, 8], strides = [1, 1]} : vector<16x96xbf16> to vector<16x8xbf16>
    %314 = vector.shape_cast %313 : vector<16x8xbf16> to vector<2x8x8xbf16>
    %315 = vector.extract_strided_slice %284 {offsets = [0, 40], sizes = [16, 8], strides = [1, 1]} : vector<16x96xbf16> to vector<16x8xbf16>
    %316 = vector.shape_cast %315 : vector<16x8xbf16> to vector<2x8x8xbf16>
    %317 = vector.extract_strided_slice %284 {offsets = [0, 72], sizes = [16, 8], strides = [1, 1]} : vector<16x96xbf16> to vector<16x8xbf16>
    %318 = vector.shape_cast %317 : vector<16x8xbf16> to vector<2x8x8xbf16>
    "tpu.trace_start"() <{level = 10 : i32, message = "bqd,bkd->bqk"}> : () -> ()
    %cst_119 = arith.constant dense<0.000000e+00> : vector<2x8x8xf32>
    %319 = tpu.matmul %314, %316, %cst_119 {dimension_numbers = #tpu.dot_dimension_numbers<[2], [2], [1], [1], [0, 0, 0, 1, 1, 1], [0], [0]>} : vector<2x8x8xbf16>, vector<2x8x8xbf16>, vector<2x8x8xf32> -> vector<2x8x8xf32>
    "tpu.trace_stop"() : () -> ()
    %320 = vector.broadcast %1 : vector<2x1x8xf32> to vector<2x8x8xf32>
    %321 = arith.addf %319, %320 : vector<2x8x8xf32>
    %cst_120 = arith.constant dense<0xFF800000> : vector<2x8xf32>
    %322 = vector.multi_reduction <maximumf>, %321, %cst_120 [2] : vector<2x8x8xf32> to vector<2x8xf32>
    %323 = vector.shape_cast %322 : vector<2x8xf32> to vector<2x8x1xf32>
    %324 = vector.broadcast %323 : vector<2x8x1xf32> to vector<2x8x8xf32>
    %325 = arith.subf %321, %324 : vector<2x8x8xf32>
    %326 = math.exp %325 : vector<2x8x8xf32>
    %cst_121 = arith.constant dense<0.000000e+00> : vector<2x8xf32>
    %327 = vector.multi_reduction <add>, %326, %cst_121 [2] : vector<2x8x8xf32> to vector<2x8xf32>
    %328 = vector.shape_cast %327 : vector<2x8xf32> to vector<2x8x1xf32>
    %329 = tpu.reciprocal %328 {approx = true} : vector<2x8x1xf32> -> vector<2x8x1xf32>
    %330 = vector.broadcast %329 : vector<2x8x1xf32> to vector<2x8x8xf32>
    %331 = arith.mulf %326, %330 : vector<2x8x8xf32>
    %332 = arith.truncf %331 : vector<2x8x8xf32> to vector<2x8x8xbf16>
    "tpu.trace_start"() <{level = 10 : i32, message = "bqk,bkd->bqd"}> : () -> ()
    %cst_122 = arith.constant dense<0.000000e+00> : vector<2x8x8xf32>
    %333 = tpu.matmul %332, %318, %cst_122 {dimension_numbers = #tpu.dot_dimension_numbers<[2], [1], [1], [2], [0, 0, 0, 1, 1, 2], [0], [0]>} : vector<2x8x8xbf16>, vector<2x8x8xbf16>, vector<2x8x8xf32> -> vector<2x8x8xf32>
    "tpu.trace_stop"() : () -> ()
    %334 = vector.shape_cast %333 : vector<2x8x8xf32> to vector<16x8xf32>
    %335 = arith.truncf %334 : vector<16x8xf32> to vector<16x8xbf16>
    %c1_123 = arith.constant 1 : index
    %c1_124 = arith.constant 1 : index
    %c0_125 = arith.constant 0 : index
    %c0_126 = arith.constant 0 : index
    %336 = vector.load %arg4[%c1_123, %c1_124, %c0_125, %c0_126] : memref<2x4x8x32xbf16, #tpu.memory_space<vmem>>, vector<1x1x8x32xbf16>
    %337 = vector.shape_cast %336 : vector<1x1x8x32xbf16> to vector<8x32xbf16>
    %cst_127 = arith.constant dense<0.000000e+00> : vector<16x32xf32>
    %338 = tpu.matmul %335, %337, %cst_127 {dimension_numbers = #tpu.dot_dimension_numbers<[1], [0], [0], [1], [0, 0, 1, 1], [], []>} : vector<16x8xbf16>, vector<8x32xbf16>, vector<16x32xf32> -> vector<16x32xf32>
    %339 = arith.addf %312, %338 : vector<16x32xf32>
    %340 = vector.extract_strided_slice %284 {offsets = [0, 16], sizes = [16, 8], strides = [1, 1]} : vector<16x96xbf16> to vector<16x8xbf16>
    %341 = vector.shape_cast %340 : vector<16x8xbf16> to vector<2x8x8xbf16>
    %342 = vector.extract_strided_slice %284 {offsets = [0, 48], sizes = [16, 8], strides = [1, 1]} : vector<16x96xbf16> to vector<16x8xbf16>
    %343 = vector.shape_cast %342 : vector<16x8xbf16> to vector<2x8x8xbf16>
    %344 = vector.extract_strided_slice %284 {offsets = [0, 80], sizes = [16, 8], strides = [1, 1]} : vector<16x96xbf16> to vector<16x8xbf16>
    %345 = vector.shape_cast %344 : vector<16x8xbf16> to vector<2x8x8xbf16>
    "tpu.trace_start"() <{level = 10 : i32, message = "bqd,bkd->bqk"}> : () -> ()
    %cst_128 = arith.constant dense<0.000000e+00> : vector<2x8x8xf32>
    %346 = tpu.matmul %341, %343, %cst_128 {dimension_numbers = #tpu.dot_dimension_numbers<[2], [2], [1], [1], [0, 0, 0, 1, 1, 1], [0], [0]>} : vector<2x8x8xbf16>, vector<2x8x8xbf16>, vector<2x8x8xf32> -> vector<2x8x8xf32>
    "tpu.trace_stop"() : () -> ()
    %347 = vector.broadcast %1 : vector<2x1x8xf32> to vector<2x8x8xf32>
    %348 = arith.addf %346, %347 : vector<2x8x8xf32>
    %cst_129 = arith.constant dense<0xFF800000> : vector<2x8xf32>
    %349 = vector.multi_reduction <maximumf>, %348, %cst_129 [2] : vector<2x8x8xf32> to vector<2x8xf32>
    %350 = vector.shape_cast %349 : vector<2x8xf32> to vector<2x8x1xf32>
    %351 = vector.broadcast %350 : vector<2x8x1xf32> to vector<2x8x8xf32>
    %352 = arith.subf %348, %351 : vector<2x8x8xf32>
    %353 = math.exp %352 : vector<2x8x8xf32>
    %cst_130 = arith.constant dense<0.000000e+00> : vector<2x8xf32>
    %354 = vector.multi_reduction <add>, %353, %cst_130 [2] : vector<2x8x8xf32> to vector<2x8xf32>
    %355 = vector.shape_cast %354 : vector<2x8xf32> to vector<2x8x1xf32>
    %356 = tpu.reciprocal %355 {approx = true} : vector<2x8x1xf32> -> vector<2x8x1xf32>
    %357 = vector.broadcast %356 : vector<2x8x1xf32> to vector<2x8x8xf32>
    %358 = arith.mulf %353, %357 : vector<2x8x8xf32>
    %359 = arith.truncf %358 : vector<2x8x8xf32> to vector<2x8x8xbf16>
    "tpu.trace_start"() <{level = 10 : i32, message = "bqk,bkd->bqd"}> : () -> ()
    %cst_131 = arith.constant dense<0.000000e+00> : vector<2x8x8xf32>
    %360 = tpu.matmul %359, %345, %cst_131 {dimension_numbers = #tpu.dot_dimension_numbers<[2], [1], [1], [2], [0, 0, 0, 1, 1, 2], [0], [0]>} : vector<2x8x8xbf16>, vector<2x8x8xbf16>, vector<2x8x8xf32> -> vector<2x8x8xf32>
    "tpu.trace_stop"() : () -> ()
    %361 = vector.shape_cast %360 : vector<2x8x8xf32> to vector<16x8xf32>
    %362 = arith.truncf %361 : vector<16x8xf32> to vector<16x8xbf16>
    %c1_132 = arith.constant 1 : index
    %c2_133 = arith.constant 2 : index
    %c0_134 = arith.constant 0 : index
    %c0_135 = arith.constant 0 : index
    %363 = vector.load %arg4[%c1_132, %c2_133, %c0_134, %c0_135] : memref<2x4x8x32xbf16, #tpu.memory_space<vmem>>, vector<1x1x8x32xbf16>
    %364 = vector.shape_cast %363 : vector<1x1x8x32xbf16> to vector<8x32xbf16>
    %cst_136 = arith.constant dense<0.000000e+00> : vector<16x32xf32>
    %365 = tpu.matmul %362, %364, %cst_136 {dimension_numbers = #tpu.dot_dimension_numbers<[1], [0], [0], [1], [0, 0, 1, 1], [], []>} : vector<16x8xbf16>, vector<8x32xbf16>, vector<16x32xf32> -> vector<16x32xf32>
    %366 = arith.addf %339, %365 : vector<16x32xf32>
    %367 = vector.extract_strided_slice %284 {offsets = [0, 24], sizes = [16, 8], strides = [1, 1]} : vector<16x96xbf16> to vector<16x8xbf16>
    %368 = vector.shape_cast %367 : vector<16x8xbf16> to vector<2x8x8xbf16>
    %369 = vector.extract_strided_slice %284 {offsets = [0, 56], sizes = [16, 8], strides = [1, 1]} : vector<16x96xbf16> to vector<16x8xbf16>
    %370 = vector.shape_cast %369 : vector<16x8xbf16> to vector<2x8x8xbf16>
    %371 = vector.extract_strided_slice %284 {offsets = [0, 88], sizes = [16, 8], strides = [1, 1]} : vector<16x96xbf16> to vector<16x8xbf16>
    %372 = vector.shape_cast %371 : vector<16x8xbf16> to vector<2x8x8xbf16>
    "tpu.trace_start"() <{level = 10 : i32, message = "bqd,bkd->bqk"}> : () -> ()
    %cst_137 = arith.constant dense<0.000000e+00> : vector<2x8x8xf32>
    %373 = tpu.matmul %368, %370, %cst_137 {dimension_numbers = #tpu.dot_dimension_numbers<[2], [2], [1], [1], [0, 0, 0, 1, 1, 1], [0], [0]>} : vector<2x8x8xbf16>, vector<2x8x8xbf16>, vector<2x8x8xf32> -> vector<2x8x8xf32>
    "tpu.trace_stop"() : () -> ()
    %374 = vector.broadcast %1 : vector<2x1x8xf32> to vector<2x8x8xf32>
    %375 = arith.addf %373, %374 : vector<2x8x8xf32>
    %cst_138 = arith.constant dense<0xFF800000> : vector<2x8xf32>
    %376 = vector.multi_reduction <maximumf>, %375, %cst_138 [2] : vector<2x8x8xf32> to vector<2x8xf32>
    %377 = vector.shape_cast %376 : vector<2x8xf32> to vector<2x8x1xf32>
    %378 = vector.broadcast %377 : vector<2x8x1xf32> to vector<2x8x8xf32>
    %379 = arith.subf %375, %378 : vector<2x8x8xf32>
    %380 = math.exp %379 : vector<2x8x8xf32>
    %cst_139 = arith.constant dense<0.000000e+00> : vector<2x8xf32>
    %381 = vector.multi_reduction <add>, %380, %cst_139 [2] : vector<2x8x8xf32> to vector<2x8xf32>
    %382 = vector.shape_cast %381 : vector<2x8xf32> to vector<2x8x1xf32>
    %383 = tpu.reciprocal %382 {approx = true} : vector<2x8x1xf32> -> vector<2x8x1xf32>
    %384 = vector.broadcast %383 : vector<2x8x1xf32> to vector<2x8x8xf32>
    %385 = arith.mulf %380, %384 : vector<2x8x8xf32>
    %386 = arith.truncf %385 : vector<2x8x8xf32> to vector<2x8x8xbf16>
    "tpu.trace_start"() <{level = 10 : i32, message = "bqk,bkd->bqd"}> : () -> ()
    %cst_140 = arith.constant dense<0.000000e+00> : vector<2x8x8xf32>
    %387 = tpu.matmul %386, %372, %cst_140 {dimension_numbers = #tpu.dot_dimension_numbers<[2], [1], [1], [2], [0, 0, 0, 1, 1, 2], [0], [0]>} : vector<2x8x8xbf16>, vector<2x8x8xbf16>, vector<2x8x8xf32> -> vector<2x8x8xf32>
    "tpu.trace_stop"() : () -> ()
    %388 = vector.shape_cast %387 : vector<2x8x8xf32> to vector<16x8xf32>
    %389 = arith.truncf %388 : vector<16x8xf32> to vector<16x8xbf16>
    %c1_141 = arith.constant 1 : index
    %c3_142 = arith.constant 3 : index
    %c0_143 = arith.constant 0 : index
    %c0_144 = arith.constant 0 : index
    %390 = vector.load %arg4[%c1_141, %c3_142, %c0_143, %c0_144] : memref<2x4x8x32xbf16, #tpu.memory_space<vmem>>, vector<1x1x8x32xbf16>
    %391 = vector.shape_cast %390 : vector<1x1x8x32xbf16> to vector<8x32xbf16>
    %cst_145 = arith.constant dense<0.000000e+00> : vector<16x32xf32>
    %392 = tpu.matmul %389, %391, %cst_145 {dimension_numbers = #tpu.dot_dimension_numbers<[1], [0], [0], [1], [0, 0, 1, 1], [], []>} : vector<16x8xbf16>, vector<8x32xbf16>, vector<16x32xf32> -> vector<16x32xf32>
    %393 = arith.addf %366, %392 : vector<16x32xf32>
    %c1_146 = arith.constant 1 : index
    %c0_147 = arith.constant 0 : index
    %c0_148 = arith.constant 0 : index
    %394 = vector.load %arg5[%c1_146, %c0_147, %c0_148] : memref<2x1x32xf32, #tpu.memory_space<vmem>>, vector<1x1x32xf32>
    %395 = vector.shape_cast %394 : vector<1x1x32xf32> to vector<1x32xf32>
    %396 = vector.broadcast %395 : vector<1x32xf32> to vector<16x32xf32>
    %397 = arith.addf %393, %396 : vector<16x32xf32>
    %cst_149 = arith.constant dense<0.000000e+00> : vector<16xf32>
    %398 = vector.multi_reduction <add>, %397, %cst_149 [1] : vector<16x32xf32> to vector<16xf32>
    %399 = vector.shape_cast %398 : vector<16xf32> to vector<16x1xf32>
    %cst_150 = arith.constant 3.200000e+01 : f32
    %400 = vector.broadcast %cst_150 : f32 to vector<16x1xf32>
    %401 = arith.divf %399, %400 : vector<16x1xf32>
    %402 = vector.broadcast %401 : vector<16x1xf32> to vector<16x32xf32>
    %403 = arith.subf %397, %402 : vector<16x32xf32>
    %404 = arith.mulf %403, %403 : vector<16x32xf32>
    %cst_151 = arith.constant dense<0.000000e+00> : vector<16xf32>
    %405 = vector.multi_reduction <add>, %404, %cst_151 [1] : vector<16x32xf32> to vector<16xf32>
    %406 = vector.shape_cast %405 : vector<16xf32> to vector<16x1xf32>
    %cst_152 = arith.constant 3.200000e+01 : f32
    %407 = vector.broadcast %cst_152 : f32 to vector<16x1xf32>
    %408 = arith.divf %406, %407 : vector<16x1xf32>
    %409 = vector.broadcast %401 : vector<16x1xf32> to vector<16x32xf32>
    %410 = arith.subf %397, %409 : vector<16x32xf32>
    %cst_153 = arith.constant 9.99999974E-6 : f32
    %411 = vector.broadcast %cst_153 : f32 to vector<16x1xf32>
    %412 = arith.addf %408, %411 : vector<16x1xf32>
    %413 = math.rsqrt %412 : vector<16x1xf32>
    %414 = vector.broadcast %413 : vector<16x1xf32> to vector<16x32xf32>
    %415 = arith.mulf %410, %414 : vector<16x32xf32>
    %c1_154 = arith.constant 1 : index
    %c0_155 = arith.constant 0 : index
    %c0_156 = arith.constant 0 : index
    %416 = vector.load %arg6[%c1_154, %c0_155, %c0_156] : memref<2x1x32xf32, #tpu.memory_space<vmem>>, vector<1x1x32xf32>
    %417 = vector.shape_cast %416 : vector<1x1x32xf32> to vector<1x32xf32>
    %418 = vector.broadcast %417 : vector<1x32xf32> to vector<16x32xf32>
    %419 = arith.mulf %415, %418 : vector<16x32xf32>
    %c1_157 = arith.constant 1 : index
    %c0_158 = arith.constant 0 : index
    %c0_159 = arith.constant 0 : index
    %420 = vector.load %arg7[%c1_157, %c0_158, %c0_159] : memref<2x1x32xf32, #tpu.memory_space<vmem>>, vector<1x1x32xf32>
    %421 = vector.shape_cast %420 : vector<1x1x32xf32> to vector<1x32xf32>
    %422 = vector.broadcast %421 : vector<1x32xf32> to vector<16x32xf32>
    %423 = arith.addf %419, %422 : vector<16x32xf32>
    %424 = arith.addf %257, %423 : vector<16x32xf32>
    %cst_160 = arith.constant dense<0.000000e+00> : vector<16xf32>
    %425 = vector.multi_reduction <add>, %424, %cst_160 [1] : vector<16x32xf32> to vector<16xf32>
    %426 = vector.shape_cast %425 : vector<16xf32> to vector<16x1xf32>
    %cst_161 = arith.constant 3.200000e+01 : f32
    %427 = vector.broadcast %cst_161 : f32 to vector<16x1xf32>
    %428 = arith.divf %426, %427 : vector<16x1xf32>
    %429 = vector.broadcast %428 : vector<16x1xf32> to vector<16x32xf32>
    %430 = arith.subf %424, %429 : vector<16x32xf32>
    %431 = arith.mulf %430, %430 : vector<16x32xf32>
    %cst_162 = arith.constant dense<0.000000e+00> : vector<16xf32>
    %432 = vector.multi_reduction <add>, %431, %cst_162 [1] : vector<16x32xf32> to vector<16xf32>
    %433 = vector.shape_cast %432 : vector<16xf32> to vector<16x1xf32>
    %cst_163 = arith.constant 3.200000e+01 : f32
    %434 = vector.broadcast %cst_163 : f32 to vector<16x1xf32>
    %435 = arith.divf %433, %434 : vector<16x1xf32>
    %436 = vector.broadcast %428 : vector<16x1xf32> to vector<16x32xf32>
    %437 = arith.subf %424, %436 : vector<16x32xf32>
    %cst_164 = arith.constant 9.99999974E-6 : f32
    %438 = vector.broadcast %cst_164 : f32 to vector<16x1xf32>
    %439 = arith.addf %435, %438 : vector<16x1xf32>
    %440 = math.rsqrt %439 : vector<16x1xf32>
    %441 = vector.broadcast %440 : vector<16x1xf32> to vector<16x32xf32>
    %442 = arith.mulf %437, %441 : vector<16x32xf32>
    %443 = arith.truncf %442 : vector<16x32xf32> to vector<16x32xbf16>
    %c1_165 = arith.constant 1 : index
    %c0_166 = arith.constant 0 : index
    %c0_167 = arith.constant 0 : index
    %444 = vector.load %arg8[%c1_165, %c0_166, %c0_167] : memref<2x32x128xbf16, #tpu.memory_space<vmem>>, vector<1x32x128xbf16>
    %445 = vector.shape_cast %444 : vector<1x32x128xbf16> to vector<32x128xbf16>
    %cst_168 = arith.constant dense<0.000000e+00> : vector<16x128xf32>
    %446 = tpu.matmul %443, %445, %cst_168 {dimension_numbers = #tpu.dot_dimension_numbers<[1], [0], [0], [1], [0, 0, 1, 1], [], []>} : vector<16x32xbf16>, vector<32x128xbf16>, vector<16x128xf32> -> vector<16x128xf32>
    %447 = vector.extract_strided_slice %446 {offsets = [0, 0], sizes = [16, 64], strides = [1, 1]} : vector<16x128xf32> to vector<16x64xf32>
    %448 = vector.extract_strided_slice %446 {offsets = [0, 64], sizes = [16, 64], strides = [1, 1]} : vector<16x128xf32> to vector<16x64xf32>
    %cst_169 = arith.constant 5.000000e-01 : f32
    %449 = vector.broadcast %cst_169 : f32 to vector<16x64xf32>
    %450 = arith.mulf %449, %448 : vector<16x64xf32>
    %cst_170 = arith.constant 0.707106769 : f32
    %451 = vector.broadcast %cst_170 : f32 to vector<16x64xf32>
    %452 = arith.mulf %448, %451 : vector<16x64xf32>
    %cst_171 = arith.constant 0.000000e+00 : f32
    %453 = vector.broadcast %cst_171 : f32 to vector<16x64xf32>
    %454 = arith.cmpf oge, %452, %453 : vector<16x64xf32>
    %cst_172 = arith.constant 1.000000e+00 : f32
    %cst_173 = arith.constant -1.000000e+00 : f32
    %455 = vector.broadcast %cst_172 : f32 to vector<16x64xf32>
    %456 = vector.broadcast %cst_173 : f32 to vector<16x64xf32>
    %457 = arith.select %454, %455, %456 : vector<16x64xi1>, vector<16x64xf32>
    %458 = math.absf %452 : vector<16x64xf32>
    %cst_174 = arith.constant 0.327591091 : f32
    %459 = vector.broadcast %cst_174 : f32 to vector<16x64xf32>
    %460 = arith.mulf %459, %458 : vector<16x64xf32>
    %cst_175 = arith.constant 1.000000e+00 : f32
    %461 = vector.broadcast %cst_175 : f32 to vector<16x64xf32>
    %462 = arith.addf %461, %460 : vector<16x64xf32>
    %cst_176 = arith.constant 1.000000e+00 : f32
    %463 = vector.broadcast %cst_176 : f32 to vector<16x64xf32>
    %464 = arith.divf %463, %462 : vector<16x64xf32>
    %cst_177 = arith.constant 1.06140542 : f32
    %465 = vector.broadcast %cst_177 : f32 to vector<16x64xf32>
    %466 = arith.mulf %465, %464 : vector<16x64xf32>
    %cst_178 = arith.constant -1.45315206 : f32
    %467 = vector.broadcast %cst_178 : f32 to vector<16x64xf32>
    %468 = arith.addf %466, %467 : vector<16x64xf32>
    %469 = arith.mulf %468, %464 : vector<16x64xf32>
    %cst_179 = arith.constant 1.42141378 : f32
    %470 = vector.broadcast %cst_179 : f32 to vector<16x64xf32>
    %471 = arith.addf %469, %470 : vector<16x64xf32>
    %472 = arith.mulf %471, %464 : vector<16x64xf32>
    %cst_180 = arith.constant -0.284496725 : f32
    %473 = vector.broadcast %cst_180 : f32 to vector<16x64xf32>
    %474 = arith.addf %472, %473 : vector<16x64xf32>
    %475 = arith.mulf %474, %464 : vector<16x64xf32>
    %cst_181 = arith.constant 0.254829586 : f32
    %476 = vector.broadcast %cst_181 : f32 to vector<16x64xf32>
    %477 = arith.addf %475, %476 : vector<16x64xf32>
    %478 = arith.mulf %477, %464 : vector<16x64xf32>
    %cst_182 = arith.constant 0.000000e+00 : f32
    %479 = vector.broadcast %cst_182 : f32 to vector<16x64xf32>
    %480 = arith.subf %479, %458 : vector<16x64xf32>
    %481 = arith.mulf %480, %458 : vector<16x64xf32>
    %482 = math.exp %481 : vector<16x64xf32>
    %483 = arith.mulf %478, %482 : vector<16x64xf32>
    %cst_183 = arith.constant 1.000000e+00 : f32
    %484 = vector.broadcast %cst_183 : f32 to vector<16x64xf32>
    %485 = arith.subf %484, %483 : vector<16x64xf32>
    %486 = arith.mulf %457, %485 : vector<16x64xf32>
    %cst_184 = arith.constant 1.000000e+00 : f32
    %487 = vector.broadcast %cst_184 : f32 to vector<16x64xf32>
    %488 = arith.addf %487, %486 : vector<16x64xf32>
    %489 = arith.mulf %450, %488 : vector<16x64xf32>
    %490 = arith.mulf %447, %489 : vector<16x64xf32>
    %cst_185 = arith.constant dense<0.000000e+00> : vector<16xf32>
    %491 = vector.multi_reduction <add>, %490, %cst_185 [1] : vector<16x64xf32> to vector<16xf32>
    %492 = vector.shape_cast %491 : vector<16xf32> to vector<16x1xf32>
    %cst_186 = arith.constant 0.0238095243 : f32
    %493 = vector.broadcast %cst_186 : f32 to vector<16x1xf32>
    %494 = arith.mulf %492, %493 : vector<16x1xf32>
    %495 = arith.mulf %490, %490 : vector<16x64xf32>
    %cst_187 = arith.constant dense<0.000000e+00> : vector<16xf32>
    %496 = vector.multi_reduction <add>, %495, %cst_187 [1] : vector<16x64xf32> to vector<16xf32>
    %497 = vector.shape_cast %496 : vector<16xf32> to vector<16x1xf32>
    %cst_188 = arith.constant 0.0238095243 : f32
    %498 = vector.broadcast %cst_188 : f32 to vector<16x1xf32>
    %499 = arith.mulf %497, %498 : vector<16x1xf32>
    %500 = arith.mulf %494, %494 : vector<16x1xf32>
    %501 = arith.subf %499, %500 : vector<16x1xf32>
    %502 = vector.broadcast %494 : vector<16x1xf32> to vector<16x64xf32>
    %503 = arith.subf %490, %502 : vector<16x64xf32>
    %cst_189 = arith.constant 9.99999974E-6 : f32
    %504 = vector.broadcast %cst_189 : f32 to vector<16x1xf32>
    %505 = arith.addf %501, %504 : vector<16x1xf32>
    %506 = math.rsqrt %505 : vector<16x1xf32>
    %507 = vector.broadcast %506 : vector<16x1xf32> to vector<16x64xf32>
    %508 = arith.mulf %503, %507 : vector<16x64xf32>
    %509 = arith.truncf %508 : vector<16x64xf32> to vector<16x64xbf16>
    %c1_190 = arith.constant 1 : index
    %c0_191 = arith.constant 0 : index
    %c0_192 = arith.constant 0 : index
    %510 = vector.load %arg9[%c1_190, %c0_191, %c0_192] : memref<2x64x32xbf16, #tpu.memory_space<vmem>>, vector<1x64x32xbf16>
    %511 = vector.shape_cast %510 : vector<1x64x32xbf16> to vector<64x32xbf16>
    %cst_193 = arith.constant dense<0.000000e+00> : vector<16x32xf32>
    %512 = tpu.matmul %509, %511, %cst_193 {dimension_numbers = #tpu.dot_dimension_numbers<[1], [0], [0], [1], [0, 0, 1, 1], [], []>} : vector<16x64xbf16>, vector<64x32xbf16>, vector<16x32xf32> -> vector<16x32xf32>
    %513 = arith.addf %424, %512 : vector<16x32xf32>
    %cst_194 = arith.constant dense<0.000000e+00> : vector<16xf32>
    %514 = vector.multi_reduction <add>, %513, %cst_194 [1] : vector<16x32xf32> to vector<16xf32>
    %515 = vector.shape_cast %514 : vector<16xf32> to vector<16x1xf32>
    %cst_195 = arith.constant 3.200000e+01 : f32
    %516 = vector.broadcast %cst_195 : f32 to vector<16x1xf32>
    %517 = arith.divf %515, %516 : vector<16x1xf32>
    %518 = vector.broadcast %517 : vector<16x1xf32> to vector<16x32xf32>
    %519 = arith.subf %513, %518 : vector<16x32xf32>
    %520 = arith.mulf %519, %519 : vector<16x32xf32>
    %cst_196 = arith.constant dense<0.000000e+00> : vector<16xf32>
    %521 = vector.multi_reduction <add>, %520, %cst_196 [1] : vector<16x32xf32> to vector<16xf32>
    %522 = vector.shape_cast %521 : vector<16xf32> to vector<16x1xf32>
    %cst_197 = arith.constant 3.200000e+01 : f32
    %523 = vector.broadcast %cst_197 : f32 to vector<16x1xf32>
    %524 = arith.divf %522, %523 : vector<16x1xf32>
    %525 = vector.broadcast %517 : vector<16x1xf32> to vector<16x32xf32>
    %526 = arith.subf %513, %525 : vector<16x32xf32>
    %cst_198 = arith.constant 9.99999974E-6 : f32
    %527 = vector.broadcast %cst_198 : f32 to vector<16x1xf32>
    %528 = arith.addf %524, %527 : vector<16x1xf32>
    %529 = math.rsqrt %528 : vector<16x1xf32>
    %530 = vector.broadcast %529 : vector<16x1xf32> to vector<16x32xf32>
    %531 = arith.mulf %526, %530 : vector<16x32xf32>
    %c0_199 = arith.constant 0 : index
    %c0_200 = arith.constant 0 : index
    %532 = vector.load %arg10[%c0_199, %c0_200] : memref<16x32xf32, #tpu.memory_space<vmem>>, vector<16x32xf32>
    tpu.vector_store %arg10[%c0_199, %c0_200], %531 {strides = array<i32>} : memref<16x32xf32, #tpu.memory_space<vmem>>, vector<16x32xf32>,
    return
  }
}

</mosaic_0001>

<bundles_post_ra>
// kernel: encoder_forward.1
= control target key start
LH: loop header
LB: loop body
LE: loop exit
PB: predicated region body
PF: predicated region fallthrough
CT: control target
= control target key end

     0   :  { %vm40_vm0 = vcmask 261120   ;;  %v3738_v14 = vmov 0.0   ;;  %vm3739_vm1 = vmmov 0   ;;  %s3740_s22 = smov 96   ;;  %vm156_vm2 = vcmask 64512   ;;  %s3741_s27 = smov 64   ;;  %s4471_s0 = inlined_call_operand.vmem [shape: f32[16,32], index: 0, kind: input, shape index: {}]   ;;  %s4472_s2 = inlined_call_operand.vmem [shape: bf16[2,32,96], index: 2, kind: input, shape index: {}]   ;;  %s4473_s3 = inlined_call_operand.vmem [shape: f32[2,1,96], index: 3, kind: input, shape index: {}]   ;;  %s4474_s1 = inlined_call_operand.vmem [shape: f32[2,1,8], index: 1, kind: input, shape index: {}]   ;;  %s4475_s4 = inlined_call_operand.vmem [shape: bf16[2,4,8,32], index: 4, kind: input, shape index: {}]   ;;  %s4476_s5 = inlined_call_operand.vmem [shape: f32[2,1,32], index: 5, kind: input, shape index: {}]   ;;  %s4477_s6 = inlined_call_operand.vmem [shape: f32[2,1,32], index: 6, kind: input, shape index: {}]   ;;  %s4478_s7 = inlined_call_operand.vmem [shape: f32[2,1,32], index: 7, kind: input, shape index: {}]   ;;  %s4479_s8 = inlined_call_operand.vmem [shape: bf16[2,32,128], index: 8, kind: input, shape index: {}]   ;;  %s4480_s9 = inlined_call_operand.vmem [shape: bf16[2,64,32], index: 9, kind: input, shape index: {}]   ;;  %s4481_s10 = inlined_call_operand.vmem [shape: f32[16,32], index: 10, kind: output, shape index: {}]  }
   0x1   :  { %v3810_v0 = vld [vmem:[%s4471_s0] sm:$0xff]  ;;  %v3815_v1 = vld [vmem:[%s4471_s0 + $0x8] sm:$0xff]  ;;  %3294 = vmatprep.subr.bf16.mxu1 %v3738_v14  ;;  %3298 = vmatprep.mubr.msk.bf16.mxu1 %vm3739_vm1, %v3738_v14  ;;  %s3742_s28 = smov 88   ;;  %vm280_vm3 = vcmask 1043456   ;;  %s3743_s29 = smov 120   ;;  %vm1441_vm6 = vcmask 523264  }
   0x2   :  { %v41_v2 = vsel %vm40_vm0, %v3810_v0, 0.0  ;;  %v44_v3 = vsel %vm40_vm0, %v3815_v1, 0.0  ;;  %v3604_v15 = vld [vmem:[%s4472_s2 + $0x8] sm:$0xff]   ;;  %v3605_v16 = vld [vmem:[%s4472_s2] sm:$0xff]   ;;  %3308 = vmatprep.subr.bf16.mxu0 %v3738_v14  ;;  %3310 = vmatprep.mubr.msk.bf16.mxu0 %vm3739_vm1, %v3738_v14  ;;  %s3744_s30 = smov 56   ;;  %s3745_s11 = smov 80  }
   0x3   :  { %42 = vadd.xlane.f32.xlu0 %v41_v2  ;;  %3295 = vmatpush3.bf16.msra.mxu1 %v3604_v15  ;;  %v3085_v28 = vld [vmem:[%s4473_s3] ss:$0 sm:$0xff]  ;;  %v3874_v45 = vld [vmem:[%s4474_s1 + $0x1] ss:$0 sm:$0xff]  ;;  %s3746_s12 = smov 112   ;;  %s3747_s0 = smov 48  }
   0x4   :  { %3296 = vmatprep.subr.bf16.mxu1 %v3738_v14  ;;  %v3868_v41 = vld [vmem:[%s4474_s1] ss:$0 sm:$0xff]  ;;  %s3748_s17 = smov 72   ;;  %s3749_s18 = smov 104  }
   0x5   :  { %s3750_s21 = smov 40  }
   0x7   :  { %45 = vadd.xlane.f32.xlu0 %v44_v3  ;;  %3297 = vmatpush3.bf16.msra.mxu1 %v3605_v16 }
   0x8   :  { %3302 = vmatprep.subr.bf16.mxu1 %v3738_v14 }
  0x8c   :  { %v43_v4 = vpop.xlane.xlu0 %42 }
  0x8d   :  { %v48_v5 = vmul.f32 0.03125, %v43_v4 }
  0x8f   :  { %v50_v6 = vsub.f32 %v3810_v0, %v48_v5 }
  0x90   :  { %v46_v7 = vpop.xlane.xlu0 %45 }
  0x91   :  { %v49_v8 = vmul.f32 0.03125, %v46_v7  ;;  %v52_v9 = vmul.f32 %v50_v6, %v50_v6 }
  0x93   :  { %v51_v10 = vsub.f32 %v3815_v1, %v49_v8  ;;  %v54_v11 = vsel %vm40_vm0, %v52_v9, 0.0 }
  0x94   :  { %55 = vadd.xlane.f32.xlu1 %v54_v11 }
  0x95   :  { %v53_v12 = vmul.f32 %v51_v10, %v51_v10 }
  0x97   :  { %v57_v13 = vsel %vm40_vm0, %v53_v12, 0.0 }
  0x98   :  { %58 = vadd.xlane.f32.xlu1 %v57_v13 }
 0x11d   :  { %v56_v17 = vpop.xlane.xlu1 %55 }
 0x11e   :  { %v60_v18 = vmul.f32 0.03125, %v56_v17 }
 0x120   :  { %v62_v19 = vadd.f32 1e-05, %v60_v18 }
 0x121   :  { %v59_v20 = vpop.xlane.xlu1 %58 }
 0x122   :  { %v61_v21 = vmul.f32 0.03125, %v59_v20  ;;  %3620 = vrsqrt.f32 %v62_v19 }
 0x124   :  { %v63_v22 = vadd.f32 1e-05, %v61_v21 }
 0x126   :  { %3622 = vrsqrt.f32 %v63_v22 }
 0x12f   :  { %v3621_v23 = vpop.eup %3620 }
 0x130   :  { %v66_v25 = vmul.f32 %v3621_v23, %v50_v6 }
 0x133   :  { %v3623_v24 = vpop.eup %3622 }
 0x134   :  { %v67_v26 = vmul.f32 %v3623_v24, %v51_v10 }
 0x136   :  { %v68_v27 = vpack.c.bf16 %v67_v26, %v66_v25 }
 0x138   :  { %3299 = vmatmul.mubr.msk.bf16.vlgmr.msra.gmra.mxu1 %vm40_vm0, %v68_v27 }
 0x139   :  { %3304 = vmatprep.mubr.msk.bf16.mxu1 %vm3739_vm1, %v3738_v14 }
 0x1f8   :  { %v129_v29 = vpop.f32.mrf.mxu1 }
 0x1f9   :  { %v130_v30 = vadd.f32 %v3085_v28, %v129_v29 }
 0x1fa   :  { %v3300_v31 = vpop.f32.mrf.mxu1 }
 0x1fb   :  { %v3845_v32 = vpack.c.bf16 %v130_v30, %v130_v30 }
 0x1fc   :  { %v132_v33 = vpop.f32.mrf.mxu1 }
 0x1fd   :  { %v133_v34 = vadd.f32 %v3085_v28, %v132_v33  ;;  %154 = vrot.lane.b32.xlu0 %v3845_v32, %s3740_s22 }
 0x1fe   :  { %v3301_v35 = vpop.f32.mrf.mxu1 }
 0x1ff   :  { %v3849_v36 = vpack.c.bf16 %v133_v34, %v133_v34 }
 0x201   :  { %203 = vrot.lane.b32.xlu1 %v3849_v36, %s3740_s22 }
 0x26f   :  { %v155_v37 = vpop.permute.xlu0 %154 }
 0x270   :  { %v161_v38 = vsel %vm156_vm2, %v155_v37, 0 }
 0x271   :  { %3303 = vmatpush3.bf16.xpose.msra.mxu1 %v161_v38 }
 0x272   :  { %3314 = vmatprep.subr.bf16.mxu1 %v3738_v14 }
 0x273   :  { %v204_v39 = vpop.permute.xlu1 %203 }
 0x274   :  { %v209_v40 = vsel %vm156_vm2, %v204_v39, 0 }
 0x275   :  { %3309 = vmatpush3.bf16.xpose.msra.mxu0 %v209_v40 }
 0x276   :  { %3320 = vmatprep.subr.bf16.mxu0 %v3738_v14 }
 0x278   :  { %3305 = vmatmul.mubr.msk.bf16.vlgmr.msra.gmra.mxu1 %vm156_vm2, %v3845_v32 }
 0x279   :  { %3316 = vmatprep.mubr.msk.bf16.mxu1 %vm3739_vm1, %v3738_v14 }
 0x27c   :  { %3311 = vmatmul.mubr.msk.bf16.vlgmr.msra.gmra.mxu0 %vm156_vm2, %v3849_v36 }
 0x27d   :  { %3322 = vmatprep.mubr.msk.bf16.mxu0 %vm3739_vm1, %v3738_v14 }
 0x338   :  { %v197_v42 = vpop.f32.mrf.mxu1 }
 0x339   :  { %v198_v43 = vadd.f32 %v3868_v41, %v197_v42 }
 0x33a   :  { %v3306_v44 = vpop.f32.mrf.mxu1 }
 0x33b   :  { %v251_v46 = vsel %vm156_vm2, %v198_v43, -inf }
 0x33c   :  { %v245_v47 = vpop.f32.mrf.mxu0  ;;  %252 = vmax.xlane.f32.xlu1 %v251_v46  ;;  %v200_v48 = vpop.f32.mrf.mxu1 }
 0x33d   :  { %v246_v49 = vadd.f32 %v3874_v45, %v245_v47 }
 0x33e   :  { %v3307_v50 = vpop.f32.mrf.mxu1  ;;  %v3312_v51 = vpop.f32.mrf.mxu0 }
 0x33f   :  { %v254_v52 = vsel %vm156_vm2, %v246_v49, -inf }
 0x340   :  { %255 = vmax.xlane.f32.xlu0 %v254_v52  ;;  %v248_v53 = vpop.f32.mrf.mxu0 }
 0x342   :  { %v3313_v54 = vpop.f32.mrf.mxu0 }
 0x34d   :  { %324 = vrot.lane.b32.xlu1 %v3849_v36, %s3741_s27 }
 0x351   :  { %376 = vrot.lane.b32.xlu1 %v3845_v32, %s3742_s28 }
 0x3c5   :  { %v253_v55 = vpop.xlane.xlu1 %252 }
 0x3c6   :  { %v257_v56 = vsub.f32 %v198_v43, %v253_v55 }
 0x3c8   :  { %v259_v57 = vmul.f32 1.442695, %v257_v56 }
 0x3c9   :  { %v256_v58 = vpop.xlane.xlu0 %255  ;;  %v325_v59 = vpop.permute.xlu1 %324 }
 0x3ca   :  { %3624 = vpow2.f32 %v259_v57  ;;  %v258_v60 = vsub.f32 %v246_v49, %v256_v58  ;;  %v330_v61 = vsel %vm280_vm3, %v325_v59, 0 }
 0x3cb   :  { %3321 = vmatpush3.bf16.msra.mxu0 %v330_v61 }
 0x3cc   :  { %v261_v62 = vmul.f32 1.442695, %v258_v60  ;;  %3332 = vmatprep.subr.bf16.mxu0 %v3738_v14 }
 0x3cd   :  { %v377_v5 = vpop.permute.xlu1 %376 }
 0x3ce   :  { %3626 = vpow2.f32 %v261_v62  ;;  %v382_v15 = vsel %vm156_vm2, %v377_v5, 0  ;;  %v373_v5 = vld [vmem:[%s4475_s4] sm:$0xf] }
 0x3d7   :  { %v3625_v63 = vpop.eup %3624 }
 0x3d8   :  { %v263_v2 = vsel %vm156_vm2, %v3625_v63, 0.0 }
 0x3d9   :  { %264 = vadd.xlane.f32.xlu0 %v263_v2 }
 0x3db   :  { %v3627_v3 = vpop.eup %3626 }
 0x3dc   :  { %v266_v4 = vsel %vm156_vm2, %v3627_v3, 0.0 }
 0x3dd   :  { %267 = vadd.xlane.f32.xlu1 %v266_v4 }
 0x3ee   :  { %426 = vrot.lane.b32.xlu1 %v3849_v36, %s3742_s28 }
 0x3ef   :  { %275 = vrot.lane.b32.xlu0 %v3845_v32, %s3741_s27 }
 0x3f2   :  { %424 = vrot.lane.b32.xlu1 %v3849_v36, %s3743_s29 }
 0x3f3   :  { %374 = vrot.lane.b32.xlu0 %v3845_v32, %s3743_s29 }
 0x462   :  { %v265_v6 = vpop.xlane.xlu0 %264 }
 0x463   :  { %3628 = vrcp.f32 %v265_v6 }
 0x466   :  { %v276_v7 = vpop.permute.xlu0 %275  ;;  %v268_v8 = vpop.xlane.xlu1 %267 }
 0x467   :  { %v282_v9 = vsel %vm280_vm3, %v276_v7, 0  ;;  %3630 = vrcp.f32 %v268_v8  ;;  %v648_v8 = vsel %vm280_vm3, %v373_v5, 0 }
 0x468   :  { %3315 = vmatpush3.bf16.msra.mxu1 %v282_v9 }
 0x469   :  { %3326 = vmatprep.subr.bf16.mxu1 %v3738_v14 }
 0x46a   :  { %v427_v17 = vpop.permute.xlu1 %426  ;;  %v375_v20 = vpop.permute.xlu0 %374 }
 0x46b   :  { %v432_v19 = vsel %vm156_vm2, %v427_v17, 0 }
 0x46e   :  { %v425_v21 = vpop.permute.xlu1 %424 }
 0x470   :  { %v3629_v10 = vpop.eup %3628 }
 0x471   :  { %v271_v11 = vmul.f32 %v3629_v10, %v3625_v63 }
 0x473   :  { %v273_v12 = vpack.c.bf16 %v271_v11, %v271_v11 }
 0x474   :  { %v3631_v13 = vpop.eup %3630 }
 0x475   :  { %3317 = vmatmul.mubr.msk.bf16.vlgmr.msra.gmra.mxu1 %vm156_vm2, %v273_v12  ;;  %v272_v16 = vmul.f32 %v3631_v13, %v3627_v3  ;;  %v3101_v13 = vld [vmem:[%s4475_s4 + $0x4] sm:$0xf] }
 0x476   :  { %3327 = vmatpush3.bf16.xpose.msra.mxu1 %v382_v15  ;;  %3328 = vmatprep.mubr.msk.bf16.mxu1 %vm3739_vm1, %v3738_v14  ;;  %v601_v15 = vsel %vm280_vm3, %v3101_v13, 0 }
 0x477   :  { %v274_v18 = vpack.c.bf16 %v272_v16, %v272_v16  ;;  %3338 = vmatprep.subr.bf16.mxu1 %v3738_v14 }
 0x479   :  { %3323 = vmatmul.mubr.msk.bf16.vlgmr.msra.gmra.mxu0 %vm156_vm2, %v274_v18 }
 0x47a   :  { %3333 = vmatpush3.bf16.xpose.msra.mxu0 %v432_v19  ;;  %3334 = vmatprep.mubr.msk.bf16.mxu0 %vm3739_vm1, %v3738_v14 }
 0x47b   :  { %3344 = vmatprep.subr.bf16.mxu0 %v3738_v14 }
 0x47d   :  { %3329 = vmatmul.mubr.msk.bf16.vlgmr.msra.gmra.mxu1 %vm156_vm2, %v375_v20 }
 0x47e   :  { %3340 = vmatprep.mubr.msk.bf16.mxu1 %vm3739_vm1, %v3738_v14 }
 0x481   :  { %3335 = vmatmul.mubr.msk.bf16.vlgmr.msra.gmra.mxu0 %vm156_vm2, %v425_v21 }
 0x482   :  { %3346 = vmatprep.mubr.msk.bf16.mxu0 %vm3739_vm1, %v3738_v14 }
 0x535   :  { %v3913_v22 = vpop.f32.mrf.mxu1 }
 0x537   :  { %v3318_v23 = vpop.f32.mrf.mxu1 }
 0x539   :  { %v321_v24 = vpop.f32.mrf.mxu1  ;;  %v3915_v25 = vpop.f32.mrf.mxu0 }
 0x53a   :  { %v372_v26 = vpack.c.bf16 %v3915_v25, %v3913_v22 }
 0x53b   :  { %v3319_v27 = vpop.f32.mrf.mxu1  ;;  %v3324_v28 = vpop.f32.mrf.mxu0 }
 0x53d   :  { %v369_v29 = vpop.f32.mrf.mxu0  ;;  %v418_v30 = vpop.f32.mrf.mxu1 }
 0x53e   :  { %v419_v31 = vadd.f32 %v3868_v41, %v418_v30 }
 0x53f   :  { %v3325_v33 = vpop.f32.mrf.mxu0  ;;  %v3330_v34 = vpop.f32.mrf.mxu1 }
 0x540   :  { %v474_v35 = vsel %vm156_vm2, %v419_v31, -inf }
 0x541   :  { %v468_v37 = vpop.f32.mrf.mxu0  ;;  %475 = vmax.xlane.f32.xlu0 %v474_v35  ;;  %v421_v38 = vpop.f32.mrf.mxu1 }
 0x542   :  { %v469_v39 = vadd.f32 %v3874_v45, %v468_v37 }
 0x543   :  { %v3331_v40 = vpop.f32.mrf.mxu1  ;;  %v3336_v42 = vpop.f32.mrf.mxu0 }
 0x544   :  { %v477_v43 = vsel %vm156_vm2, %v469_v39, -inf }
 0x545   :  { %478 = vmax.xlane.f32.xlu1 %v477_v43  ;;  %v471_v44 = vpop.f32.mrf.mxu0 }
 0x547   :  { %v3337_v46 = vpop.f32.mrf.mxu0 }
 0x556   :  { %546 = vrot.lane.b32.xlu1 %v3849_v36, %s3744_s30 }
 0x55a   :  { %693 = vrot.lane.b32.xlu1 %v3845_v32, %s3745_s11 }
 0x55e   :  { %743 = vrot.lane.b32.xlu1 %v3849_v36, %s3745_s11 }
 0x562   :  { %741 = vrot.lane.b32.xlu1 %v3849_v36, %s3746_s12 }
 0x5ca   :  { %v476_v47 = vpop.xlane.xlu0 %475 }
 0x5cb   :  { %v480_v48 = vsub.f32 %v419_v31, %v476_v47 }
 0x5cd   :  { %v482_v49 = vmul.f32 1.442695, %v480_v48 }
 0x5ce   :  { %v479_v50 = vpop.xlane.xlu1 %478 }
 0x5cf   :  { %3632 = vpow2.f32 %v482_v49  ;;  %v481_v51 = vsub.f32 %v469_v39, %v479_v50 }
 0x5d1   :  { %v484_v52 = vmul.f32 1.442695, %v481_v51 }
 0x5d2   :  { %v547_v53 = vpop.permute.xlu1 %546 }
 0x5d3   :  { %3634 = vpow2.f32 %v484_v52  ;;  %v552_v54 = vsel %vm280_vm3, %v547_v53, 0 }
 0x5d4   :  { %3345 = vmatpush3.bf16.msra.mxu0 %v552_v54 }
 0x5d5   :  { %3356 = vmatprep.subr.bf16.mxu0 %v3738_v14 }
 0x5d6   :  { %v694_v9 = vpop.permute.xlu1 %693 }
 0x5d7   :  { %v699_v23 = vsel %vm156_vm2, %v694_v9, 0 }
 0x5da   :  { %v744_v10 = vpop.permute.xlu1 %743 }
 0x5db   :  { %v749_v11 = vsel %vm156_vm2, %v744_v10, 0 }
 0x5dc   :  { %v3633_v55 = vpop.eup %3632 }
 0x5dd   :  { %v486_v56 = vsel %vm156_vm2, %v3633_v55, 0.0 }
 0x5de   :  { %487 = vadd.xlane.f32.xlu0 %v486_v56  ;;  %v742_v12 = vpop.permute.xlu1 %741 }
 0x5e0   :  { %v3635_v57 = vpop.eup %3634 }
 0x5e1   :  { %v489_v58 = vsel %vm156_vm2, %v3635_v57, 0.0 }
 0x5e2   :  { %490 = vadd.xlane.f32.xlu0 %v489_v58 }
 0x5f8   :  { %498 = vrot.lane.b32.xlu0 %v3845_v32, %s3744_s30 }
 0x5fc   :  { %691 = vrot.lane.b32.xlu0 %v3845_v32, %s3746_s12 }
 0x667   :  { %v488_v59 = vpop.xlane.xlu0 %487 }
 0x668   :  { %3636 = vrcp.f32 %v488_v59 }
 0x66b   :  { %v491_v60 = vpop.xlane.xlu0 %490 }
 0x66c   :  { %3638 = vrcp.f32 %v491_v60 }
 0x66f   :  { %v499_v61 = vpop.permute.xlu0 %498 }
 0x670   :  { %v504_v62 = vsel %vm280_vm3, %v499_v61, 0 }
 0x671   :  { %3339 = vmatpush3.bf16.msra.mxu1 %v504_v62 }
 0x672   :  { %3350 = vmatprep.subr.bf16.mxu1 %v3738_v14 }
 0x673   :  { %v692_v27 = vpop.permute.xlu0 %691 }
 0x675   :  { %v3637_v63 = vpop.eup %3636 }
 0x676   :  { %v494_v2 = vmul.f32 %v3637_v63, %v3633_v55 }
 0x678   :  { %v496_v3 = vpack.c.bf16 %v494_v2, %v494_v2 }
 0x679   :  { %v3639_v4 = vpop.eup %3638 }
 0x67a   :  { %3341 = vmatmul.mubr.msk.bf16.vlgmr.msra.gmra.mxu1 %vm156_vm2, %v496_v3  ;;  %v495_v6 = vmul.f32 %v3639_v4, %v3635_v57 }
 0x67b   :  { %3352 = vmatprep.mubr.msk.bf16.mxu1 %vm3739_vm1, %v3738_v14  ;;  %3351 = vmatpush3.bf16.msra.mxu1 %v601_v15 }
 0x67c   :  { %v497_v7 = vpack.c.bf16 %v495_v6, %v495_v6  ;;  %3362 = vmatprep.subr.bf16.mxu1 %v3738_v14 }
 0x67e   :  { %3347 = vmatmul.mubr.msk.bf16.vlgmr.msra.gmra.mxu0 %vm156_vm2, %v497_v7 }
 0x67f   :  { %3357 = vmatpush3.bf16.msra.mxu0 %v648_v8  ;;  %3358 = vmatprep.mubr.msk.bf16.mxu0 %vm3739_vm1, %v3738_v14 }
 0x680   :  { %3368 = vmatprep.subr.bf16.mxu0 %v3738_v14 }
 0x686   :  { %3359 = vmatmul.mubr.msk.bf16.vlgmr.msra.gmra.mxu0 %vm156_vm2, %v372_v26 }
 0x687   :  { %3369 = vmatpush3.bf16.xpose.msra.mxu0 %v749_v11  ;;  %3370 = vmatprep.mubr.msk.bf16.mxu0 %vm3739_vm1, %v3738_v14 }
 0x688   :  { %3380 = vmatprep.subr.bf16.mxu0 %v3738_v14 }
 0x68e   :  { %3371 = vmatmul.mubr.msk.bf16.vlgmr.msra.gmra.mxu0 %vm156_vm2, %v742_v12 }
 0x68f   :  { %3382 = vmatprep.mubr.msk.bf16.mxu0 %vm3739_vm1, %v3738_v14 }
 0x73a   :  { %v540_v16 = vpop.f32.mrf.mxu1 }
 0x73c   :  { %v3342_v17 = vpop.f32.mrf.mxu1 }
 0x73e   :  { %v543_v18 = vpop.f32.mrf.mxu1  ;;  %v588_v19 = vpop.f32.mrf.mxu0 }
 0x73f   :  { %v594_v20 = vpack.c.bf16 %v588_v19, %v540_v16  ;;  %v3108_v19 = vld [vmem:[%s4475_s4 + $0x8] sm:$0xf] }
 0x740   :  { %v3343_v21 = vpop.f32.mrf.mxu1  ;;  %v3348_v22 = vpop.f32.mrf.mxu0 }
 0x741   :  { %3353 = vmatmul.mubr.msk.bf16.vlgmr.msra.gmra.mxu1 %vm156_vm2, %v594_v20  ;;  %v918_v20 = vsel %vm280_vm3, %v3108_v19, 0 }
 0x742   :  { %3363 = vmatpush3.bf16.xpose.msra.mxu1 %v699_v23  ;;  %v591_v24 = vpop.f32.mrf.mxu0  ;;  %3364 = vmatprep.mubr.msk.bf16.mxu1 %vm3739_vm1, %v3738_v14 }
 0x743   :  { %3374 = vmatprep.subr.bf16.mxu1 %v3738_v14 }
 0x744   :  { %v3349_v25 = vpop.f32.mrf.mxu0 }
 0x746   :  { %v3973_v26 = vpop.f32.mrf.mxu0 }
 0x748   :  { %v3360_v28 = vpop.f32.mrf.mxu0 }
 0x749   :  { %3365 = vmatmul.mubr.msk.bf16.vlgmr.msra.gmra.mxu1 %vm156_vm2, %v692_v27 }
 0x74a   :  { %v3976_v29 = vpop.f32.mrf.mxu0  ;;  %3376 = vmatprep.mubr.msk.bf16.mxu1 %vm3739_vm1, %v3738_v14 }
 0x74c   :  { %v3361_v30 = vpop.f32.mrf.mxu0 }
 0x74e   :  { %v785_v31 = vpop.f32.mrf.mxu0 }
 0x74f   :  { %v786_v33 = vadd.f32 %v3874_v45, %v785_v31 }
 0x750   :  { %v3372_v34 = vpop.f32.mrf.mxu0 }
 0x751   :  { %v794_v35 = vsel %vm156_vm2, %v786_v33, -inf }
 0x752   :  { %795 = vmax.xlane.f32.xlu1 %v794_v35  ;;  %v788_v37 = vpop.f32.mrf.mxu0 }
 0x754   :  { %v3373_v38 = vpop.f32.mrf.mxu0 }
 0x763   :  { %863 = vrot.lane.b32.xlu1 %v3849_v36, %s3747_s0 }
 0x767   :  { %965 = vrot.lane.b32.xlu1 %v3845_v32, %s3748_s17 }
 0x76b   :  { %1015 = vrot.lane.b32.xlu1 %v3849_v36, %s3748_s17 }
 0x76f   :  { %1013 = vrot.lane.b32.xlu1 %v3849_v36, %s3749_s18 }
 0x7db   :  { %v796_v39 = vpop.xlane.xlu1 %795 }
 0x7dc   :  { %v798_v43 = vsub.f32 %v786_v33, %v796_v39 }
 0x7de   :  { %v801_v44 = vmul.f32 1.442695, %v798_v43 }
 0x7df   :  { %v864_v40 = vpop.permute.xlu1 %863 }
 0x7e0   :  { %v869_v42 = vsel %vm280_vm3, %v864_v40, 0  ;;  %3640 = vpow2.f32 %v801_v44 }
 0x7e1   :  { %3381 = vmatpush3.bf16.msra.mxu0 %v869_v42 }
 0x7e2   :  { %3392 = vmatprep.subr.bf16.mxu0 %v3738_v14 }
 0x7e3   :  { %v966_v4 = vpop.permute.xlu1 %965 }
 0x7e4   :  { %v971_v6 = vsel %vm156_vm2, %v966_v4, 0 }
 0x7e7   :  { %v1016_v28 = vpop.permute.xlu1 %1015 }
 0x7e8   :  { %v1021_v34 = vsel %vm156_vm2, %v1016_v28, 0 }
 0x7eb   :  { %v1014_v37 = vpop.permute.xlu1 %1013 }
 0x7ed   :  { %v3641_v54 = vpop.eup %3640 }
 0x7ee   :  { %v806_v57 = vsel %vm156_vm2, %v3641_v54, 0.0 }
 0x801   :  { %v3992_v46 = vpop.f32.mrf.mxu1 }
 0x802   :  { %v685_v44 = vadd.f32 %v3973_v26, %v3992_v46 }
 0x803   :  { %v3354_v47 = vpop.f32.mrf.mxu1 }
 0x805   :  { %v3994_v48 = vpop.f32.mrf.mxu1 }
 0x807   :  { %v3355_v49 = vpop.f32.mrf.mxu1 }
 0x809   :  { %v735_v50 = vpop.f32.mrf.mxu1 }
 0x80a   :  { %v736_v51 = vadd.f32 %v3868_v41, %v735_v50 }
 0x80b   :  { %v3366_v52 = vpop.f32.mrf.mxu1 }
 0x80c   :  { %v791_v53 = vsel %vm156_vm2, %v736_v51, -inf }
 0x80d   :  { %792 = vmax.xlane.f32.xlu0 %v791_v53  ;;  %v738_v55 = vpop.f32.mrf.mxu1 }
 0x80f   :  { %v3367_v56 = vpop.f32.mrf.mxu1 }
 0x811   :  { %807 = vadd.xlane.f32.xlu0 %v806_v57 }
 0x896   :  { %v793_v58 = vpop.xlane.xlu0 %792 }
 0x897   :  { %v797_v59 = vsub.f32 %v736_v51, %v793_v58  ;;  %v688_v51 = vadd.f32 %v3976_v29, %v3994_v48 }
 0x899   :  { %v799_v60 = vmul.f32 1.442695, %v797_v59 }
 0x89a   :  { %v808_v61 = vpop.xlane.xlu0 %807 }
 0x89b   :  { %3642 = vpow2.f32 %v799_v60 }
 0x89c   :  { %3644 = vrcp.f32 %v808_v61 }
 0x8a8   :  { %v3643_v62 = vpop.eup %3642 }
 0x8a9   :  { %v3645_v63 = vpop.eup %3644  ;;  %v803_v2 = vsel %vm156_vm2, %v3643_v62, 0.0 }
 0x8aa   :  { %804 = vadd.xlane.f32.xlu0 %v803_v2  ;;  %v812_v3 = vmul.f32 %v3645_v63, %v3641_v54 }
 0x8ac   :  { %v814_v5 = vpack.c.bf16 %v812_v3, %v812_v3 }
 0x8ae   :  { %3383 = vmatmul.mubr.msk.bf16.vlgmr.msra.gmra.mxu0 %vm156_vm2, %v814_v5 }
 0x8af   :  { %3393 = vmatpush3.bf16.xpose.msra.mxu0 %v971_v6  ;;  %3394 = vmatprep.mubr.msk.bf16.mxu0 %vm3739_vm1, %v3738_v14 }
 0x8b0   :  { %3404 = vmatprep.subr.bf16.mxu0 %v3738_v14 }
 0x8c0   :  { %815 = vrot.lane.b32.xlu0 %v3845_v32, %s3747_s0 }
 0x8c4   :  { %963 = vrot.lane.b32.xlu0 %v3845_v32, %s3749_s18 }
 0x933   :  { %v805_v7 = vpop.xlane.xlu0 %804 }
 0x934   :  { %3646 = vrcp.f32 %v805_v7 }
 0x937   :  { %v816_v8 = vpop.permute.xlu0 %815 }
 0x938   :  { %v821_v9 = vsel %vm280_vm3, %v816_v8, 0 }
 0x939   :  { %3375 = vmatpush3.bf16.msra.mxu1 %v821_v9  ;;  %v3114_v9 = vld [vmem:[%s4475_s4 + $0xc] sm:$0xf] }
 0x93a   :  { %3386 = vmatprep.subr.bf16.mxu1 %v3738_v14 }
 0x93b   :  { %v964_v10 = vpop.permute.xlu0 %963 }
 0x93c   :  { %3395 = vmatmul.mubr.msk.bf16.vlgmr.msra.gmra.mxu0 %vm156_vm2, %v964_v10  ;;  %v1190_v10 = vsel %vm280_vm3, %v3114_v9, 0  ;;  %v3607_v9 = vld [vmem:[%s4479_s8] sm:$0xff]  }
 0x93d   :  { %3406 = vmatprep.mubr.msk.bf16.mxu0 %vm3739_vm1, %v3738_v14 }
 0x941   :  { %v3647_v11 = vpop.eup %3646 }
 0x942   :  { %v811_v12 = vmul.f32 %v3647_v11, %v3643_v62 }
 0x944   :  { %v813_v13 = vpack.c.bf16 %v811_v12, %v811_v12 }
 0x946   :  { %3377 = vmatmul.mubr.msk.bf16.vlgmr.msra.gmra.mxu1 %vm156_vm2, %v813_v13 }
 0x947   :  { %3388 = vmatprep.mubr.msk.bf16.mxu1 %vm3739_vm1, %v3738_v14  ;;  %3387 = vmatpush3.bf16.msra.mxu1 %v918_v20 }
 0x948   :  { %3398 = vmatprep.subr.bf16.mxu1 %v3738_v14 }
 0x96e   :  { %v905_v15 = vpop.f32.mrf.mxu0 }
 0x970   :  { %v3384_v16 = vpop.f32.mrf.mxu0 }
 0x972   :  { %v908_v17 = vpop.f32.mrf.mxu0 }
 0x974   :  { %v3385_v18 = vpop.f32.mrf.mxu0 }
 0x9fc   :  { %v1007_v21 = vpop.f32.mrf.mxu0 }
 0x9fd   :  { %v1008_v22 = vadd.f32 %v3868_v41, %v1007_v21 }
 0x9fe   :  { %v3396_v23 = vpop.f32.mrf.mxu0 }
 0x9ff   :  { %v1063_v24 = vsel %vm156_vm2, %v1008_v22, -inf }
 0xa00   :  { %1064 = vmax.xlane.f32.xlu0 %v1063_v24  ;;  %v1010_v25 = vpop.f32.mrf.mxu0 }
 0xa02   :  { %v3397_v27 = vpop.f32.mrf.mxu0 }
 0xa06   :  { %v857_v30 = vpop.f32.mrf.mxu1 }
 0xa07   :  { %v911_v31 = vpack.c.bf16 %v905_v15, %v857_v30 }
 0xa08   :  { %v3378_v33 = vpop.f32.mrf.mxu1 }
 0xa09   :  { %3389 = vmatmul.mubr.msk.bf16.vlgmr.msra.gmra.mxu1 %vm156_vm2, %v911_v31 }
 0xa0a   :  { %3399 = vmatpush3.bf16.xpose.msra.mxu1 %v1021_v34  ;;  %v860_v35 = vpop.f32.mrf.mxu1  ;;  %3400 = vmatprep.mubr.msk.bf16.mxu1 %vm3739_vm1, %v3738_v14 }
 0xa0b   :  { %3410 = vmatprep.subr.bf16.mxu1 %v3738_v14 }
 0xa0c   :  { %v3379_v41 = vpop.f32.mrf.mxu1 }
 0xa11   :  { %3401 = vmatmul.mubr.msk.bf16.vlgmr.msra.gmra.mxu1 %vm156_vm2, %v1014_v37 }
 0xa12   :  { %3412 = vmatprep.mubr.msk.bf16.mxu1 %vm3739_vm1, %v3738_v14 }
 0xa89   :  { %v1065_v38 = vpop.xlane.xlu0 %1064 }
 0xa8a   :  { %v1069_v39 = vsub.f32 %v1008_v22, %v1065_v38  ;;  %v3116_v22 = vld [vmem:[%s4476_s5] ss:$0 sm:$0xff] }
 0xa8c   :  { %v1071_v40 = vmul.f32 1.442695, %v1069_v39 }
 0xa8e   :  { %3648 = vpow2.f32 %v1071_v40 }
 0xa9b   :  { %v3649_v42 = vpop.eup %3648 }
 0xa9c   :  { %v1075_v43 = vsel %vm156_vm2, %v3649_v42, 0.0 }
 0xa9d   :  { %1076 = vadd.xlane.f32.xlu0 %v1075_v43 }
 0xac9   :  { %v954_v47 = vpop.f32.mrf.mxu1 }
 0xaca   :  { %v4035_v49 = vadd.f32 %v954_v47, %v685_v44 }
 0xacb   :  { %v3390_v50 = vpop.f32.mrf.mxu1 }
 0xacd   :  { %v957_v52 = vpop.f32.mrf.mxu1 }
 0xace   :  { %v4039_v53 = vadd.f32 %v957_v52, %v688_v51 }
 0xacf   :  { %v3391_v54 = vpop.f32.mrf.mxu1 }
 0xad1   :  { %v1057_v55 = vpop.f32.mrf.mxu1 }
 0xad2   :  { %v1058_v56 = vadd.f32 %v3874_v45, %v1057_v55 }
 0xad3   :  { %v3402_v57 = vpop.f32.mrf.mxu1 }
 0xad4   :  { %v1066_v58 = vsel %vm156_vm2, %v1058_v56, -inf }
 0xad5   :  { %1067 = vmax.xlane.f32.xlu1 %v1066_v58  ;;  %v1060_v59 = vpop.f32.mrf.mxu1  ;;  %v3118_v58 = vld [vmem:[%s4478_s7] ss:$0 sm:$0xff] }
 0xad7   :  { %v3403_v26 = vpop.f32.mrf.mxu1 }
 0xae6   :  { %1135 = vrot.lane.b32.xlu1 %v3849_v36, %s3750_s21 }
 0xb26   :  { %v1077_v63 = vpop.xlane.xlu0 %1076 }
 0xb5e   :  { %v1068_v46 = vpop.xlane.xlu1 %1067 }
 0xb5f   :  { %v1070_v60 = vsub.f32 %v1058_v56, %v1068_v46  ;;  %v3117_v56 = vld [vmem:[%s4477_s6] ss:$0 sm:$0xff] }
 0xb61   :  { %v1073_v29 = vmul.f32 1.442695, %v1070_v60 }
 0xb62   :  { %v1136_v48 = vpop.permute.xlu1 %1135 }
 0xb63   :  { %3650 = vpow2.f32 %v1073_v29  ;;  %v1141_v61 = vsel %vm280_vm3, %v1136_v48, 0 }
 0xb64   :  { %3411 = vmatpush3.bf16.msra.mxu1 %v1141_v61  ;;  %3652 = vrcp.f32 %v1077_v63 }
 0xb65   :  { %3422 = vmatprep.subr.bf16.mxu1 %v3738_v14 }
 0xb70   :  { %v3651_v45 = vpop.eup %3650 }
 0xb71   :  { %v1078_v62 = vsel %vm156_vm2, %v3651_v45, 0.0  ;;  %v3653_v36 = vpop.eup %3652 }
 0xb72   :  { %1079 = vadd.xlane.f32.xlu0 %v1078_v62  ;;  %v1083_v3 = vmul.f32 %v3653_v36, %v3649_v42 }
 0xb74   :  { %v1085_v6 = vpack.c.bf16 %v1083_v3, %v1083_v3 }
 0xb88   :  { %1087 = vrot.lane.b32.xlu0 %v3845_v32, %s3750_s21 }
 0xbfb   :  { %v1080_v2 = vpop.xlane.xlu0 %1079 }
 0xbfc   :  { %3654 = vrcp.f32 %v1080_v2 }
 0xbff   :  { %v1088_v4 = vpop.permute.xlu0 %1087 }
 0xc00   :  { %v1093_v5 = vsel %vm280_vm3, %v1088_v4, 0 }
 0xc01   :  { %3405 = vmatpush3.bf16.msra.mxu0 %v1093_v5 }
 0xc02   :  { %3416 = vmatprep.subr.bf16.mxu0 %v3738_v14 }
 0xc04   :  { %3407 = vmatmul.mubr.msk.bf16.vlgmr.msra.gmra.mxu0 %vm156_vm2, %v1085_v6 }
 0xc05   :  { %3418 = vmatprep.mubr.msk.bf16.mxu0 %vm3739_vm1, %v3738_v14  ;;  %3417 = vmatpush3.bf16.msra.mxu0 %v1190_v10 }
 0xc06   :  { %3430 = vmatprep.subr.bf16.mxu0 %v3738_v14 }
 0xc09   :  { %v3655_v7 = vpop.eup %3654 }
 0xc0a   :  { %v1084_v32 = vmul.f32 %v3655_v7, %v3651_v45 }
 0xc0c   :  { %v1086_v8 = vpack.c.bf16 %v1084_v32, %v1084_v32 }
 0xc0e   :  { %3413 = vmatmul.mubr.msk.bf16.vlgmr.msra.gmra.mxu1 %vm156_vm2, %v1086_v8  ;;  %v3606_v8 = vld [vmem:[%s4479_s8 + $0x8] sm:$0xff]  }
 0xc0f   :  { %3426 = vmatprep.mubr.msk.bf16.mxu1 %vm3739_vm1, %v3738_v14  ;;  %3423 = vmatpush3.bf16.msra.mxu1 %v3606_v8 }
 0xc10   :  { %3424 = vmatprep.subr.bf16.mxu1 %v3738_v14 }
 0xc13   :  { %3425 = vmatpush3.bf16.msra.mxu1 %v3607_v9 }
 0xc14   :  { %3442 = vmatprep.subr.bf16.mxu1 %v3738_v14 }
 0xcc4   :  { %v1129_v11 = vpop.f32.mrf.mxu0 }
 0xcc6   :  { %v3408_v12 = vpop.f32.mrf.mxu0 }
 0xcc8   :  { %v1132_v13 = vpop.f32.mrf.mxu0 }
 0xcca   :  { %v3409_v15 = vpop.f32.mrf.mxu0 }
 0xcce   :  { %v1177_v16 = vpop.f32.mrf.mxu1 }
 0xccf   :  { %v1183_v17 = vpack.c.bf16 %v1177_v16, %v1129_v11 }
 0xcd0   :  { %v3414_v18 = vpop.f32.mrf.mxu1 }
 0xcd1   :  { %3419 = vmatmul.mubr.msk.bf16.vlgmr.msra.gmra.mxu0 %vm156_vm2, %v1183_v17 }
 0xcd2   :  { %v1180_v19 = vpop.f32.mrf.mxu1  ;;  %3438 = vmatprep.mubr.msk.bf16.mxu0 %vm3739_vm1, %v3738_v14 }
 0xcd4   :  { %v3415_v20 = vpop.f32.mrf.mxu1 }
 0xd91   :  { %v1226_v21 = vpop.f32.mrf.mxu0 }
 0xd92   :  { %v1233_v23 = vadd.f32 %v1226_v21, %v4035_v49 }
 0xd93   :  { %v3420_v24 = vpop.f32.mrf.mxu0 }
 0xd94   :  { %v1242_v25 = vadd.f32 %v3116_v22, %v1233_v23 }
 0xd95   :  { %v1229_v27 = vpop.f32.mrf.mxu0 }
 0xd96   :  { %v1234_v28 = vadd.f32 %v1229_v27, %v4039_v53  ;;  %v1244_v30 = vsel %vm40_vm0, %v1242_v25, 0.0 }
 0xd97   :  { %1245 = vadd.xlane.f32.xlu1 %v1244_v30  ;;  %v3421_v31 = vpop.f32.mrf.mxu0 }
 0xd98   :  { %v1243_v33 = vadd.f32 %v3116_v22, %v1234_v28 }
 0xd9a   :  { %v1247_v34 = vsel %vm40_vm0, %v1243_v33, 0.0 }
 0xd9b   :  { %1248 = vadd.xlane.f32.xlu0 %v1247_v34 }
 0xe20   :  { %v1246_v35 = vpop.xlane.xlu1 %1245 }
 0xe21   :  { %v1250_v41 = vmul.f32 0.03125, %v1246_v35 }
 0xe23   :  { %v1252_v37 = vsub.f32 %v1242_v25, %v1250_v41 }
 0xe24   :  { %v1249_v38 = vpop.xlane.xlu0 %1248 }
 0xe25   :  { %v1251_v39 = vmul.f32 0.03125, %v1249_v38  ;;  %v1254_v40 = vmul.f32 %v1252_v37, %v1252_v37 }
 0xe27   :  { %v1253_v42 = vsub.f32 %v1243_v33, %v1251_v39  ;;  %v1256_v43 = vsel %vm40_vm0, %v1254_v40, 0.0 }
 0xe28   :  { %1257 = vadd.xlane.f32.xlu0 %v1256_v43 }
 0xe29   :  { %v1255_v44 = vmul.f32 %v1253_v42, %v1253_v42 }
 0xe2b   :  { %v1259_v47 = vsel %vm40_vm0, %v1255_v44, 0.0 }
 0xe2c   :  { %1260 = vadd.xlane.f32.xlu1 %v1259_v47 }
 0xeb1   :  { %v1258_v49 = vpop.xlane.xlu0 %1257 }
 0xeb2   :  { %v1262_v50 = vmul.f32 0.03125, %v1258_v49 }
 0xeb4   :  { %v1264_v51 = vadd.f32 1e-05, %v1262_v50 }
 0xeb5   :  { %v1261_v52 = vpop.xlane.xlu1 %1260 }
 0xeb6   :  { %3656 = vrsqrt.f32 %v1264_v51  ;;  %v1263_v53 = vmul.f32 0.03125, %v1261_v52 }
 0xeb8   :  { %v1265_v54 = vadd.f32 1e-05, %v1263_v53 }
 0xeba   :  { %3658 = vrsqrt.f32 %v1265_v54 }
 0xec3   :  { %v3657_v55 = vpop.eup %3656 }
 0xec4   :  { %v1268_v57 = vmul.f32 %v3657_v55, %v1252_v37 }
 0xec6   :  { %v1277_v59 = vmul.f32 %v3117_v56, %v1268_v57 }
 0xec7   :  { %v3659_v26 = vpop.eup %3658 }
 0xec8   :  { %v1286_v46 = vadd.f32 %v3118_v58, %v1277_v59  ;;  %v1269_v60 = vmul.f32 %v3659_v26, %v1253_v42 }
 0xeca   :  { %v4082_v29 = vadd.f32 %v1286_v46, %v3810_v0  ;;  %v1278_v48 = vmul.f32 %v3117_v56, %v1269_v60 }
 0xecc   :  { %v1290_v61 = vsel %vm40_vm0, %v4082_v29, 0.0  ;;  %v1287_v45 = vadd.f32 %v3118_v58, %v1278_v48 }
 0xecd   :  { %1291 = vadd.xlane.f32.xlu0 %v1290_v61 }
 0xece   :  { %v4087_v62 = vadd.f32 %v1287_v45, %v3815_v1 }
 0xed0   :  { %v1293_v63 = vsel %vm40_vm0, %v4087_v62, 0.0 }
 0xed1   :  { %1294 = vadd.xlane.f32.xlu1 %v1293_v63 }
 0xf56   :  { %v1292_v36 = vpop.xlane.xlu0 %1291 }
 0xf57   :  { %v1296_v2 = vmul.f32 0.03125, %v1292_v36 }
 0xf59   :  { %v1298_v3 = vsub.f32 %v4082_v29, %v1296_v2 }
 0xf5a   :  { %v1295_v4 = vpop.xlane.xlu1 %1294 }
 0xf5b   :  { %v1297_v0 = vmul.f32 0.03125, %v1295_v4  ;;  %v1300_v5 = vmul.f32 %v1298_v3, %v1298_v3 }
 0xf5d   :  { %v1299_v6 = vsub.f32 %v4087_v62, %v1297_v0  ;;  %v1302_v7 = vsel %vm40_vm0, %v1300_v5, 0.0  ;;  %v3751_v0 = vmov -1.0  }
 0xf5e   :  { %1303 = vadd.xlane.f32.xlu0 %v1302_v7 }
 0xf5f   :  { %v1301_v32 = vmul.f32 %v1299_v6, %v1299_v6 }
 0xf61   :  { %v1305_v1 = vsel %vm40_vm0, %v1301_v32, 0.0 }
 0xf62   :  { %1306 = vadd.xlane.f32.xlu1 %v1305_v1 }
 0xfe7   :  { %v1304_v10 = vpop.xlane.xlu0 %1303 }
 0xfe8   :  { %v1308_v11 = vmul.f32 0.03125, %v1304_v10 }
 0xfea   :  { %v1310_v12 = vadd.f32 1e-05, %v1308_v11 }
 0xfeb   :  { %v1307_v13 = vpop.xlane.xlu1 %1306 }
 0xfec   :  { %v1309_v15 = vmul.f32 0.03125, %v1307_v13  ;;  %3660 = vrsqrt.f32 %v1310_v12 }
 0xfee   :  { %v1311_v16 = vadd.f32 1e-05, %v1309_v15 }
 0xff0   :  { %3662 = vrsqrt.f32 %v1311_v16 }
 0xff9   :  { %v3661_v17 = vpop.eup %3660 }
 0xffa   :  { %v1314_v19 = vmul.f32 %v3661_v17, %v1298_v3 }
 0xffd   :  { %v3663_v18 = vpop.eup %3662 }
 0xffe   :  { %v1315_v20 = vmul.f32 %v3663_v18, %v1299_v6 }
0x1000   :  { %v1316_v21 = vpack.c.bf16 %v1315_v20, %v1314_v19 }
0x1002   :  { %3427 = vmatmul.mubr.msk.bf16.vlgmr.msra.gmra.mxu1 %vm40_vm0, %v1316_v21 }
0x1003   :  { %3446 = vmatprep.mubr.msk.bf16.mxu1 %vm3739_vm1, %v3738_v14 }
0x10c2   :  { %v4106_v22 = vpop.f32.mrf.mxu1 }
0x10c3   :  { %v1379_v23 = vmul.f32 0.70710677, %v4106_v22  ;;  %v1377_v32 = vmul.f32 0.5, %v4106_v22 }
0x10c4   :  { %v3428_v24 = vpop.f32.mrf.mxu1 }
0x10c5   :  { %v1385_v25 = vand.u32 2147483647, %v1379_v23  ;;  %vm1381_vm4 = vcmp.ge.f32.partialorder %v1379_v23, 0.0 }
0x10c6   :  { %v4109_v27 = vpop.f32.mrf.mxu1  ;;  %v1383_v5 = vsel %vm1381_vm4, 1.0, %v3751_v0 }
0x10c7   :  { %v1387_v28 = vmul.f32 0.3275911, %v1385_v25  ;;  %v1380_v30 = vmul.f32 0.70710677, %v4109_v27  ;;  %v1413_v37 = vsub.f32 0.0, %v1385_v25  ;;  %v1378_v12 = vmul.f32 0.5, %v4109_v27 }
0x10c8   :  { %v3429_v31 = vpop.f32.mrf.mxu1 }
0x10c9   :  { %v1389_v33 = vadd.f32 1.0, %v1387_v28  ;;  %v1386_v34 = vand.u32 2147483647, %v1380_v30  ;;  %v1415_v38 = vmul.f32 %v1413_v37, %v1385_v25  ;;  %vm1382_vm5 = vcmp.ge.f32.partialorder %v1380_v30, 0.0  ;;  %v3610_v30 = vld [vmem:[%s4480_s9 + $0x8] sm:$0xff]   ;;  %v3611_v31 = vld [vmem:[%s4480_s9] sm:$0xff]  }
0x10ca   :  { %v1384_v9 = vsel %vm1382_vm5, 1.0, %v3751_v0 }
0x10cb   :  { %3664 = vrcp.f32 %v1389_v33  ;;  %v1388_v35 = vmul.f32 0.3275911, %v1386_v34  ;;  %v1414_v39 = vsub.f32 0.0, %v1386_v34  ;;  %v1417_v42 = vmul.f32 1.442695, %v1415_v38 }
0x10cd   :  { %v1390_v41 = vadd.f32 1.0, %v1388_v35  ;;  %v1416_v43 = vmul.f32 %v1414_v39, %v1386_v34 }
0x10cf   :  { %3666 = vrcp.f32 %v1390_v41  ;;  %v1419_v50 = vmul.f32 1.442695, %v1416_v43 }
0x10d0   :  { %3668 = vpow2.f32 %v1417_v42 }
0x10d1   :  { %3670 = vpow2.f32 %v1419_v50 }
0x10d8   :  { %v3665_v40 = vpop.eup %3664 }
0x10d9   :  { %v1395_v44 = vmul.f32 1.0614054, %v3665_v40 }
0x10db   :  { %v1397_v47 = vadd.f32 -1.4531521, %v1395_v44 }
0x10dc   :  { %v3667_v49 = vpop.eup %3666 }
0x10dd   :  { %v1399_v51 = vmul.f32 %v3665_v40, %v1397_v47  ;;  %v1396_v52 = vmul.f32 1.0614054, %v3667_v49  ;;  %v3669_v45 = vpop.eup %3668 }
0x10de   :  { %v3671_v4 = vpop.eup %3670 }
0x10df   :  { %v1401_v53 = vadd.f32 1.4214138, %v1399_v51  ;;  %v1398_v54 = vadd.f32 -1.4531521, %v1396_v52 }
0x10e1   :  { %v1403_v55 = vmul.f32 %v3665_v40, %v1401_v53  ;;  %v1400_v56 = vmul.f32 %v3667_v49, %v1398_v54 }
0x10e3   :  { %v1405_v57 = vadd.f32 -0.28449672, %v1403_v55  ;;  %v1402_v58 = vadd.f32 1.4214138, %v1400_v56 }
0x10e5   :  { %v1407_v59 = vmul.f32 %v3665_v40, %v1405_v57  ;;  %v1404_v26 = vmul.f32 %v3667_v49, %v1402_v58 }
0x10e7   :  { %v1409_v46 = vadd.f32 0.2548296, %v1407_v59  ;;  %v1406_v60 = vadd.f32 -0.28449672, %v1404_v26 }
0x10e9   :  { %v1411_v48 = vmul.f32 %v3665_v40, %v1409_v46  ;;  %v1408_v61 = vmul.f32 %v3667_v49, %v1406_v60 }
0x10eb   :  { %v1421_v63 = vmul.f32 %v3669_v45, %v1411_v48  ;;  %v1410_v36 = vadd.f32 0.2548296, %v1408_v61 }
0x10ed   :  { %v1423_v2 = vsub.f32 1.0, %v1421_v63  ;;  %v1412_v3 = vmul.f32 %v3667_v49, %v1410_v36 }
0x10ef   :  { %v1425_v6 = vmul.f32 %v1423_v2, %v1383_v5  ;;  %v1422_v7 = vmul.f32 %v3671_v4, %v1412_v3 }
0x10f1   :  { %v1427_v1 = vadd.f32 1.0, %v1425_v6  ;;  %v1424_v8 = vsub.f32 1.0, %v1422_v7 }
0x10f3   :  { %v1429_v10 = vmul.f32 %v1427_v1, %v1377_v32  ;;  %v1426_v11 = vmul.f32 %v1424_v8, %v1384_v9  ;;  %v3612_v32 = vld [vmem:[%s4472_s2 + $0x18] sm:$0xff]   ;;  %v3613_v1 = vld [vmem:[%s4472_s2 + $0x10] sm:$0xff]  }
0x10f4   :  { %3443 = vmatpush3.bf16.msra.mxu1 %v3612_v32 }
0x10f5   :  { %1433 = vrot.lane.b32.xlu0 %v1429_v10, %s3741_s27  ;;  %v1428_v13 = vadd.f32 1.0, %v1426_v11  ;;  %3444 = vmatprep.subr.bf16.mxu1 %v3738_v14 }
0x10f7   :  { %v1430_v15 = vmul.f32 %v1428_v13, %v1378_v12 }
0x10f8   :  { %3445 = vmatpush3.bf16.msra.mxu1 %v3613_v1 }
0x10f9   :  { %1435 = vrot.lane.b32.xlu1 %v1430_v15, %s3741_s27  ;;  %3450 = vmatprep.subr.bf16.mxu1 %v3738_v14 }
0x1167   :  { %v1434_v16 = vpop.permute.xlu0 %1433 }
0x1168   :  { %v1439_v17 = vmul.f32 %v1434_v16, %v4106_v22  ;;  %v3608_v22 = vld [vmem:[%s4480_s9 + $0x18] sm:$0xff]  }
0x1169   :  { %3431 = vmatpush3.bf16.msra.mxu0 %v3608_v22 }
0x116a   :  { %v1442_v18 = vsel %vm1441_vm6, %v1439_v17, 0.0  ;;  %v1450_v24 = vmul.f32 %v1439_v17, %v1439_v17  ;;  %3432 = vmatprep.subr.bf16.mxu0 %v3738_v14 }
0x116b   :  { %1443 = vadd.xlane.f32.xlu1 %v1442_v18  ;;  %v1436_v19 = vpop.permute.xlu1 %1435 }
0x116c   :  { %v1440_v20 = vmul.f32 %v1436_v19, %v4109_v27  ;;  %v1452_v28 = vsel %vm1441_vm6, %v1450_v24, 0.0  ;;  %v3609_v27 = vld [vmem:[%s4480_s9 + $0x10] sm:$0xff]  }
0x116d   :  { %3433 = vmatpush3.bf16.msra.mxu0 %v3609_v27 }
0x116e   :  { %v1445_v21 = vsel %vm1441_vm6, %v1440_v20, 0.0  ;;  %v1451_v23 = vmul.f32 %v1440_v20, %v1440_v20  ;;  %3434 = vmatprep.subr.bf16.mxu0 %v3738_v14 }
0x116f   :  { %1446 = vadd.xlane.f32.xlu0 %v1445_v21 }
0x1170   :  { %v1455_v25 = vsel %vm1441_vm6, %v1451_v23, 0.0 }
0x1171   :  { %1456 = vadd.xlane.f32.xlu1 %v1455_v25  ;;  %3435 = vmatpush3.bf16.msra.mxu0 %v3610_v30 }
0x1172   :  { %3436 = vmatprep.subr.bf16.mxu0 %v3738_v14 }
0x1173   :  { %1453 = vadd.xlane.f32.xlu0 %v1452_v28 }
0x1175   :  { %3437 = vmatpush3.bf16.msra.mxu0 %v3611_v31 }
0x1176   :  { %3456 = vmatprep.subr.bf16.mxu0 %v3738_v14 }
0x11f4   :  { %v1444_v33 = vpop.xlane.xlu1 %1443 }
0x11f5   :  { %v1448_v35 = vmul.f32 0.023809524, %v1444_v33 }
0x11f7   :  { %v1460_v42 = vmul.f32 %v1448_v35, %v1448_v35  ;;  %v1464_v52 = vsub.f32 %v1439_v17, %v1448_v35 }
0x11f8   :  { %v1447_v34 = vpop.xlane.xlu0 %1446 }
0x11f9   :  { %v1449_v41 = vmul.f32 0.023809524, %v1447_v34 }
0x11fa   :  { %v1457_v37 = vpop.xlane.xlu1 %1456 }
0x11fb   :  { %v1461_v38 = vmul.f32 %v1449_v41, %v1449_v41  ;;  %v1459_v39 = vmul.f32 0.023809524, %v1457_v37  ;;  %v1465_v53 = vsub.f32 %v1440_v20, %v1449_v41  ;;  %v3132_v20 = vld [vmem:[%s4473_s3 + $0x1] ss:$0 sm:$0xff]  ;;  %v4194_v37 = vld [vmem:[%s4474_s1] ss:$0 sm:$0xff] }
0x11fc   :  { %v1454_v40 = vpop.xlane.xlu0 %1453 }
0x11fd   :  { %v1463_v43 = vsub.f32 %v1459_v39, %v1461_v38  ;;  %v1458_v44 = vmul.f32 0.023809524, %v1454_v40 }
0x11ff   :  { %v1467_v47 = vadd.f32 1e-05, %v1463_v43  ;;  %v1462_v49 = vsub.f32 %v1458_v44, %v1460_v42  ;;  %v4201_v44 = vld [vmem:[%s4474_s1 + $0x1] ss:$0 sm:$0xff] }
0x1201   :  { %3672 = vrsqrt.f32 %v1467_v47  ;;  %v1466_v50 = vadd.f32 1e-05, %v1462_v49 }
0x1203   :  { %3674 = vrsqrt.f32 %v1466_v50 }
0x120e   :  { %v3673_v51 = vpop.eup %3672 }
0x120f   :  { %v1471_v56 = vmul.f32 %v3673_v51, %v1465_v53 }
0x1210   :  { %v3675_v54 = vpop.eup %3674 }
0x1211   :  { %v1470_v55 = vmul.f32 %v3675_v54, %v1464_v52 }
0x1213   :  { %v1472_v57 = vpack.c.bf16 %v1471_v56, %v1470_v55 }
0x1215   :  { %3439 = vmatmul.mubr.msk.bf16.vlgmr.msra.gmra.mxu0 %vm1441_vm6, %v1472_v57 }
0x1216   :  { %3458 = vmatprep.mubr.msk.bf16.mxu0 %vm3739_vm1, %v3738_v14 }
0x12d5   :  { %v1542_v58 = vpop.f32.mrf.mxu0 }
0x12d6   :  { %v4144_v59 = vadd.f32 %v1542_v58, %v4082_v29 }
0x12d7   :  { %v3440_v26 = vpop.f32.mrf.mxu0 }
0x12d8   :  { %v1551_v46 = vsel %vm40_vm0, %v4144_v59, 0.0 }
0x12d9   :  { %1552 = vadd.xlane.f32.xlu0 %v1551_v46  ;;  %v1545_v60 = vpop.f32.mrf.mxu0 }
0x12da   :  { %v4149_v48 = vadd.f32 %v1545_v60, %v4087_v62 }
0x12db   :  { %v3441_v61 = vpop.f32.mrf.mxu0 }
0x12dc   :  { %v1554_v45 = vsel %vm40_vm0, %v4149_v48, 0.0 }
0x12dd   :  { %1555 = vadd.xlane.f32.xlu1 %v1554_v45 }
0x1362   :  { %v1553_v63 = vpop.xlane.xlu0 %1552 }
0x1363   :  { %v1557_v36 = vmul.f32 0.03125, %v1553_v63 }
0x1365   :  { %v1559_v2 = vsub.f32 %v4144_v59, %v1557_v36 }
0x1366   :  { %v1556_v29 = vpop.xlane.xlu1 %1555 }
0x1367   :  { %v1558_v3 = vmul.f32 0.03125, %v1556_v29  ;;  %v1561_v4 = vmul.f32 %v1559_v2, %v1559_v2 }
0x1369   :  { %v1560_v5 = vsub.f32 %v4149_v48, %v1558_v3  ;;  %v1563_v6 = vsel %vm40_vm0, %v1561_v4, 0.0 }
0x136a   :  { %1564 = vadd.xlane.f32.xlu0 %v1563_v6 }
0x136b   :  { %v1562_v7 = vmul.f32 %v1560_v5, %v1560_v5 }
0x136d   :  { %v1566_v62 = vsel %vm40_vm0, %v1562_v7, 0.0 }
0x136e   :  { %1567 = vadd.xlane.f32.xlu1 %v1566_v62 }
0x13f3   :  { %v1565_v8 = vpop.xlane.xlu0 %1564 }
0x13f4   :  { %v1569_v9 = vmul.f32 0.03125, %v1565_v8 }
0x13f6   :  { %v1571_v10 = vadd.f32 1e-05, %v1569_v9 }
0x13f7   :  { %v1568_v11 = vpop.xlane.xlu1 %1567 }
0x13f8   :  { %v1570_v12 = vmul.f32 0.03125, %v1568_v11  ;;  %3676 = vrsqrt.f32 %v1571_v10 }
0x13fa   :  { %v1572_v13 = vadd.f32 1e-05, %v1570_v12 }
0x13fc   :  { %3678 = vrsqrt.f32 %v1572_v13 }
0x1405   :  { %v3677_v15 = vpop.eup %3676 }
0x1406   :  { %v1575_v17 = vmul.f32 %v3677_v15, %v1559_v2 }
0x1409   :  { %v3679_v16 = vpop.eup %3678 }
0x140a   :  { %v1576_v18 = vmul.f32 %v3679_v16, %v1560_v5 }
0x140c   :  { %v1577_v19 = vpack.c.bf16 %v1576_v18, %v1575_v17 }
0x140e   :  { %3447 = vmatmul.mubr.msk.bf16.vlgmr.msra.gmra.mxu1 %vm40_vm0, %v1577_v19 }
0x140f   :  { %3452 = vmatprep.mubr.msk.bf16.mxu1 %vm3739_vm1, %v3738_v14 }
0x14ce   :  { %v1640_v21 = vpop.f32.mrf.mxu1 }
0x14cf   :  { %v1641_v23 = vadd.f32 %v3132_v20, %v1640_v21 }
0x14d0   :  { %v3448_v24 = vpop.f32.mrf.mxu1 }
0x14d1   :  { %v4171_v25 = vpack.c.bf16 %v1641_v23, %v1641_v23 }
0x14d2   :  { %v1643_v28 = vpop.f32.mrf.mxu1 }
0x14d3   :  { %v1644_v22 = vadd.f32 %v3132_v20, %v1643_v28  ;;  %1653 = vrot.lane.b32.xlu0 %v4171_v25, %s3740_s22 }
0x14d4   :  { %v3449_v27 = vpop.f32.mrf.mxu1 }
0x14d5   :  { %v4175_v30 = vpack.c.bf16 %v1644_v22, %v1644_v22 }
0x14d7   :  { %1701 = vrot.lane.b32.xlu1 %v4175_v30, %s3740_s22 }
0x1545   :  { %v1654_v31 = vpop.permute.xlu0 %1653 }
0x1546   :  { %v1659_v33 = vsel %vm156_vm2, %v1654_v31, 0 }
0x1547   :  { %3451 = vmatpush3.bf16.xpose.msra.mxu1 %v1659_v33 }
0x1548   :  { %3462 = vmatprep.subr.bf16.mxu1 %v3738_v14 }
0x1549   :  { %v1702_v34 = vpop.permute.xlu1 %1701 }
0x154a   :  { %v1707_v35 = vsel %vm156_vm2, %v1702_v34, 0 }
0x154b   :  { %3457 = vmatpush3.bf16.xpose.msra.mxu0 %v1707_v35 }
0x154c   :  { %3468 = vmatprep.subr.bf16.mxu0 %v3738_v14 }
0x154e   :  { %3453 = vmatmul.mubr.msk.bf16.vlgmr.msra.gmra.mxu1 %vm156_vm2, %v4171_v25 }
0x154f   :  { %3464 = vmatprep.mubr.msk.bf16.mxu1 %vm3739_vm1, %v3738_v14 }
0x1552   :  { %3459 = vmatmul.mubr.msk.bf16.vlgmr.msra.gmra.mxu0 %vm156_vm2, %v4175_v30 }
0x1553   :  { %3470 = vmatprep.mubr.msk.bf16.mxu0 %vm3739_vm1, %v3738_v14 }
0x160e   :  { %v1695_v41 = vpop.f32.mrf.mxu1 }
0x160f   :  { %v1696_v38 = vadd.f32 %v4194_v37, %v1695_v41 }
0x1610   :  { %v3454_v39 = vpop.f32.mrf.mxu1 }
0x1611   :  { %v1749_v40 = vsel %vm156_vm2, %v1696_v38, -inf }
0x1612   :  { %v1743_v42 = vpop.f32.mrf.mxu0  ;;  %1750 = vmax.xlane.f32.xlu1 %v1749_v40  ;;  %v1698_v43 = vpop.f32.mrf.mxu1 }
0x1613   :  { %v1744_v47 = vadd.f32 %v4201_v44, %v1743_v42 }
0x1614   :  { %v3455_v49 = vpop.f32.mrf.mxu1  ;;  %v3460_v50 = vpop.f32.mrf.mxu0 }
0x1615   :  { %v1752_v51 = vsel %vm156_vm2, %v1744_v47, -inf }
0x1616   :  { %1753 = vmax.xlane.f32.xlu0 %v1752_v51  ;;  %v1746_v52 = vpop.f32.mrf.mxu0 }
0x1618   :  { %v3461_v53 = vpop.f32.mrf.mxu0 }
0x1623   :  { %1821 = vrot.lane.b32.xlu1 %v4175_v30, %s3741_s27 }
0x1627   :  { %1874 = vrot.lane.b32.xlu1 %v4171_v25, %s3742_s28 }
0x169b   :  { %v1751_v54 = vpop.xlane.xlu1 %1750 }
0x169c   :  { %v1755_v55 = vsub.f32 %v1696_v38, %v1751_v54 }
0x169e   :  { %v1757_v56 = vmul.f32 1.442695, %v1755_v55 }
0x169f   :  { %v1754_v57 = vpop.xlane.xlu0 %1753  ;;  %v1822_v58 = vpop.permute.xlu1 %1821 }
0x16a0   :  { %3680 = vpow2.f32 %v1757_v56  ;;  %v1756_v26 = vsub.f32 %v1744_v47, %v1754_v57  ;;  %v1827_v46 = vsel %vm280_vm3, %v1822_v58, 0 }
0x16a1   :  { %3469 = vmatpush3.bf16.msra.mxu0 %v1827_v46 }
0x16a2   :  { %v1759_v60 = vmul.f32 1.442695, %v1756_v26  ;;  %3480 = vmatprep.subr.bf16.mxu0 %v3738_v14 }
0x16a3   :  { %v1875_v2 = vpop.permute.xlu1 %1874 }
0x16a4   :  { %3682 = vpow2.f32 %v1759_v60  ;;  %v1880_v1 = vsel %vm156_vm2, %v1875_v2, 0 }
0x16ad   :  { %v3681_v61 = vpop.eup %3680 }
0x16ae   :  { %v1761_v45 = vsel %vm156_vm2, %v3681_v61, 0.0 }
0x16af   :  { %1762 = vadd.xlane.f32.xlu0 %v1761_v45 }
0x16b1   :  { %v3683_v63 = vpop.eup %3682 }
0x16b2   :  { %v1764_v36 = vsel %vm156_vm2, %v3683_v63, 0.0 }
0x16b3   :  { %1765 = vadd.xlane.f32.xlu1 %v1764_v36 }
0x16c4   :  { %1924 = vrot.lane.b32.xlu1 %v4175_v30, %s3742_s28 }
0x16c5   :  { %1773 = vrot.lane.b32.xlu0 %v4171_v25, %s3741_s27 }
0x16c8   :  { %1922 = vrot.lane.b32.xlu1 %v4175_v30, %s3743_s29 }
0x16c9   :  { %1872 = vrot.lane.b32.xlu0 %v4171_v25, %s3743_s29 }
0x1738   :  { %v1763_v29 = vpop.xlane.xlu0 %1762 }
0x1739   :  { %3684 = vrcp.f32 %v1763_v29  ;;  %v3142_v29 = vld [vmem:[%s4475_s4 + $0x10] sm:$0xf] }
0x173c   :  { %v1774_v3 = vpop.permute.xlu0 %1773  ;;  %v1766_v4 = vpop.xlane.xlu1 %1765 }
0x173d   :  { %v1779_v5 = vsel %vm280_vm3, %v1774_v3, 0  ;;  %3686 = vrcp.f32 %v1766_v4 }
0x173e   :  { %3463 = vmatpush3.bf16.msra.mxu1 %v1779_v5  ;;  %v2146_v5 = vsel %vm280_vm3, %v3142_v29, 0 }
0x173f   :  { %3474 = vmatprep.subr.bf16.mxu1 %v3738_v14 }
0x1740   :  { %v1925_v9 = vpop.permute.xlu1 %1924  ;;  %v1873_v12 = vpop.permute.xlu0 %1872 }
0x1741   :  { %v1930_v11 = vsel %vm156_vm2, %v1925_v9, 0 }
0x1744   :  { %v1923_v13 = vpop.permute.xlu1 %1922 }
0x1746   :  { %v3685_v6 = vpop.eup %3684 }
0x1747   :  { %v1769_v7 = vmul.f32 %v3685_v6, %v3681_v61 }
0x1749   :  { %v1771_v62 = vpack.c.bf16 %v1769_v7, %v1769_v7 }
0x174a   :  { %v3687_v32 = vpop.eup %3686 }
0x174b   :  { %3465 = vmatmul.mubr.msk.bf16.vlgmr.msra.gmra.mxu1 %vm156_vm2, %v1771_v62  ;;  %v1770_v8 = vmul.f32 %v3687_v32, %v3683_v63 }
0x174c   :  { %3475 = vmatpush3.bf16.xpose.msra.mxu1 %v1880_v1  ;;  %3476 = vmatprep.mubr.msk.bf16.mxu1 %vm3739_vm1, %v3738_v14  ;;  %v3147_v1 = vld [vmem:[%s4475_s4 + $0x14] sm:$0xf] }
0x174d   :  { %v1772_v10 = vpack.c.bf16 %v1770_v8, %v1770_v8  ;;  %3486 = vmatprep.subr.bf16.mxu1 %v3738_v14  ;;  %v2099_v8 = vsel %vm280_vm3, %v3147_v1, 0 }
0x174f   :  { %3471 = vmatmul.mubr.msk.bf16.vlgmr.msra.gmra.mxu0 %vm156_vm2, %v1772_v10 }
0x1750   :  { %3481 = vmatpush3.bf16.xpose.msra.mxu0 %v1930_v11  ;;  %3482 = vmatprep.mubr.msk.bf16.mxu0 %vm3739_vm1, %v3738_v14 }
0x1751   :  { %3492 = vmatprep.subr.bf16.mxu0 %v3738_v14 }
0x1753   :  { %3477 = vmatmul.mubr.msk.bf16.vlgmr.msra.gmra.mxu1 %vm156_vm2, %v1873_v12 }
0x1754   :  { %3488 = vmatprep.mubr.msk.bf16.mxu1 %vm3739_vm1, %v3738_v14 }
0x1757   :  { %3483 = vmatmul.mubr.msk.bf16.vlgmr.msra.gmra.mxu0 %vm156_vm2, %v1923_v13 }
0x1758   :  { %3494 = vmatprep.mubr.msk.bf16.mxu0 %vm3739_vm1, %v3738_v14 }
0x180b   :  { %v4239_v15 = vpop.f32.mrf.mxu1 }
0x180d   :  { %v3466_v16 = vpop.f32.mrf.mxu1 }
0x180f   :  { %v1818_v17 = vpop.f32.mrf.mxu1  ;;  %v4241_v18 = vpop.f32.mrf.mxu0 }
0x1810   :  { %v1869_v19 = vpack.c.bf16 %v4241_v18, %v4239_v15 }
0x1811   :  { %v3467_v20 = vpop.f32.mrf.mxu1  ;;  %v3472_v21 = vpop.f32.mrf.mxu0 }
0x1813   :  { %v1866_v23 = vpop.f32.mrf.mxu0  ;;  %v1916_v24 = vpop.f32.mrf.mxu1 }
0x1814   :  { %v1917_v28 = vadd.f32 %v4194_v37, %v1916_v24 }
0x1815   :  { %v3473_v22 = vpop.f32.mrf.mxu0  ;;  %v3478_v27 = vpop.f32.mrf.mxu1 }
0x1816   :  { %v1972_v31 = vsel %vm156_vm2, %v1917_v28, -inf }
0x1817   :  { %v1966_v33 = vpop.f32.mrf.mxu0  ;;  %1973 = vmax.xlane.f32.xlu0 %v1972_v31  ;;  %v1919_v34 = vpop.f32.mrf.mxu1 }
0x1818   :  { %v1967_v35 = vadd.f32 %v4201_v44, %v1966_v33 }
0x1819   :  { %v3479_v41 = vpop.f32.mrf.mxu1  ;;  %v3484_v38 = vpop.f32.mrf.mxu0 }
0x181a   :  { %v1975_v39 = vsel %vm156_vm2, %v1967_v35, -inf }
0x181b   :  { %1976 = vmax.xlane.f32.xlu1 %v1975_v39  ;;  %v1969_v40 = vpop.f32.mrf.mxu0 }
0x181d   :  { %v3485_v42 = vpop.f32.mrf.mxu0 }
0x182c   :  { %2044 = vrot.lane.b32.xlu1 %v4175_v30, %s3744_s30 }
0x1830   :  { %2191 = vrot.lane.b32.xlu1 %v4171_v25, %s3745_s11 }
0x1834   :  { %2241 = vrot.lane.b32.xlu1 %v4175_v30, %s3745_s11 }
0x1838   :  { %2239 = vrot.lane.b32.xlu1 %v4175_v30, %s3746_s12 }
0x18a0   :  { %v1974_v43 = vpop.xlane.xlu0 %1973 }
0x18a1   :  { %v1978_v47 = vsub.f32 %v1917_v28, %v1974_v43 }
0x18a3   :  { %v1980_v49 = vmul.f32 1.442695, %v1978_v47 }
0x18a4   :  { %v1977_v50 = vpop.xlane.xlu1 %1976 }
0x18a5   :  { %3688 = vpow2.f32 %v1980_v49  ;;  %v1979_v51 = vsub.f32 %v1967_v35, %v1977_v50 }
0x18a7   :  { %v1982_v52 = vmul.f32 1.442695, %v1979_v51 }
0x18a8   :  { %v2045_v53 = vpop.permute.xlu1 %2044 }
0x18a9   :  { %3690 = vpow2.f32 %v1982_v52  ;;  %v2050_v54 = vsel %vm280_vm3, %v2045_v53, 0 }
0x18aa   :  { %3493 = vmatpush3.bf16.msra.mxu0 %v2050_v54 }
0x18ab   :  { %3504 = vmatprep.subr.bf16.mxu0 %v3738_v14 }
0x18ac   :  { %v2192_v6 = vpop.permute.xlu1 %2191 }
0x18ad   :  { %v2197_v17 = vsel %vm156_vm2, %v2192_v6, 0 }
0x18b0   :  { %v2242_v7 = vpop.permute.xlu1 %2241 }
0x18b1   :  { %v2247_v62 = vsel %vm156_vm2, %v2242_v7, 0 }
0x18b2   :  { %v3689_v55 = vpop.eup %3688 }
0x18b3   :  { %v1984_v56 = vsel %vm156_vm2, %v3689_v55, 0.0 }
0x18b4   :  { %1985 = vadd.xlane.f32.xlu0 %v1984_v56  ;;  %v2240_v32 = vpop.permute.xlu1 %2239 }
0x18b6   :  { %v3691_v57 = vpop.eup %3690 }
0x18b7   :  { %v1987_v58 = vsel %vm156_vm2, %v3691_v57, 0.0 }
0x18b8   :  { %1988 = vadd.xlane.f32.xlu0 %v1987_v58 }
0x18ce   :  { %1996 = vrot.lane.b32.xlu0 %v4171_v25, %s3744_s30 }
0x18d2   :  { %2189 = vrot.lane.b32.xlu0 %v4171_v25, %s3746_s12 }
0x193d   :  { %v1986_v26 = vpop.xlane.xlu0 %1985 }
0x193e   :  { %3692 = vrcp.f32 %v1986_v26 }
0x1941   :  { %v1989_v46 = vpop.xlane.xlu0 %1988 }
0x1942   :  { %3694 = vrcp.f32 %v1989_v46 }
0x1945   :  { %v1997_v60 = vpop.permute.xlu0 %1996 }
0x1946   :  { %v2002_v61 = vsel %vm280_vm3, %v1997_v60, 0 }
0x1947   :  { %3487 = vmatpush3.bf16.msra.mxu1 %v2002_v61 }
0x1948   :  { %3498 = vmatprep.subr.bf16.mxu1 %v3738_v14 }
0x1949   :  { %v2190_v21 = vpop.permute.xlu0 %2189 }
0x194b   :  { %v3693_v45 = vpop.eup %3692 }
0x194c   :  { %v1992_v63 = vmul.f32 %v3693_v45, %v3689_v55 }
0x194e   :  { %v1994_v36 = vpack.c.bf16 %v1992_v63, %v1992_v63 }
0x194f   :  { %v3695_v2 = vpop.eup %3694 }
0x1950   :  { %3489 = vmatmul.mubr.msk.bf16.vlgmr.msra.gmra.mxu1 %vm156_vm2, %v1994_v36  ;;  %v1993_v3 = vmul.f32 %v3695_v2, %v3691_v57 }
0x1951   :  { %3500 = vmatprep.mubr.msk.bf16.mxu1 %vm3739_vm1, %v3738_v14  ;;  %3499 = vmatpush3.bf16.msra.mxu1 %v2099_v8 }
0x1952   :  { %v1995_v4 = vpack.c.bf16 %v1993_v3, %v1993_v3  ;;  %3510 = vmatprep.subr.bf16.mxu1 %v3738_v14 }
0x1954   :  { %3495 = vmatmul.mubr.msk.bf16.vlgmr.msra.gmra.mxu0 %vm156_vm2, %v1995_v4 }
0x1955   :  { %3505 = vmatpush3.bf16.msra.mxu0 %v2146_v5  ;;  %3506 = vmatprep.mubr.msk.bf16.mxu0 %vm3739_vm1, %v3738_v14 }
0x1956   :  { %3516 = vmatprep.subr.bf16.mxu0 %v3738_v14 }
0x195c   :  { %3507 = vmatmul.mubr.msk.bf16.vlgmr.msra.gmra.mxu0 %vm156_vm2, %v1869_v19 }
0x195d   :  { %3517 = vmatpush3.bf16.xpose.msra.mxu0 %v2247_v62  ;;  %3518 = vmatprep.mubr.msk.bf16.mxu0 %vm3739_vm1, %v3738_v14 }
0x195e   :  { %3528 = vmatprep.subr.bf16.mxu0 %v3738_v14 }
0x1964   :  { %3519 = vmatmul.mubr.msk.bf16.vlgmr.msra.gmra.mxu0 %vm156_vm2, %v2240_v32 }
0x1965   :  { %3530 = vmatprep.mubr.msk.bf16.mxu0 %vm3739_vm1, %v3738_v14 }
0x1a10   :  { %v2038_v9 = vpop.f32.mrf.mxu1 }
0x1a12   :  { %v3490_v10 = vpop.f32.mrf.mxu1 }
0x1a14   :  { %v2041_v11 = vpop.f32.mrf.mxu1  ;;  %v2086_v12 = vpop.f32.mrf.mxu0 }
0x1a15   :  { %v2092_v13 = vpack.c.bf16 %v2086_v12, %v2038_v9 }
0x1a16   :  { %v3491_v15 = vpop.f32.mrf.mxu1  ;;  %v3496_v16 = vpop.f32.mrf.mxu0 }
0x1a17   :  { %3501 = vmatmul.mubr.msk.bf16.vlgmr.msra.gmra.mxu1 %vm156_vm2, %v2092_v13  ;;  %v3154_v13 = vld [vmem:[%s4475_s4 + $0x18] sm:$0xf] }
0x1a18   :  { %3511 = vmatpush3.bf16.xpose.msra.mxu1 %v2197_v17  ;;  %v2089_v18 = vpop.f32.mrf.mxu0  ;;  %3512 = vmatprep.mubr.msk.bf16.mxu1 %vm3739_vm1, %v3738_v14  ;;  %v2416_v15 = vsel %vm280_vm3, %v3154_v13, 0 }
0x1a19   :  { %3522 = vmatprep.subr.bf16.mxu1 %v3738_v14 }
0x1a1a   :  { %v3497_v19 = vpop.f32.mrf.mxu0 }
0x1a1c   :  { %v4299_v20 = vpop.f32.mrf.mxu0 }
0x1a1e   :  { %v3508_v23 = vpop.f32.mrf.mxu0 }
0x1a1f   :  { %3513 = vmatmul.mubr.msk.bf16.vlgmr.msra.gmra.mxu1 %vm156_vm2, %v2190_v21 }
0x1a20   :  { %v4302_v24 = vpop.f32.mrf.mxu0  ;;  %3524 = vmatprep.mubr.msk.bf16.mxu1 %vm3739_vm1, %v3738_v14 }
0x1a22   :  { %v3509_v28 = vpop.f32.mrf.mxu0 }
0x1a24   :  { %v2283_v22 = vpop.f32.mrf.mxu0 }
0x1a25   :  { %v2284_v27 = vadd.f32 %v4201_v44, %v2283_v22 }
0x1a26   :  { %v3520_v31 = vpop.f32.mrf.mxu0 }
0x1a27   :  { %v2292_v33 = vsel %vm156_vm2, %v2284_v27, -inf }
0x1a28   :  { %2293 = vmax.xlane.f32.xlu1 %v2292_v33  ;;  %v2286_v34 = vpop.f32.mrf.mxu0 }
0x1a2a   :  { %v3521_v35 = vpop.f32.mrf.mxu0 }
0x1a39   :  { %2361 = vrot.lane.b32.xlu1 %v4175_v30, %s3747_s0 }
0x1a3d   :  { %2463 = vrot.lane.b32.xlu1 %v4171_v25, %s3748_s17 }
0x1a41   :  { %2513 = vrot.lane.b32.xlu1 %v4175_v30, %s3748_s17 }
0x1a45   :  { %2511 = vrot.lane.b32.xlu1 %v4175_v30, %s3749_s18 }
0x1ab1   :  { %v2294_v41 = vpop.xlane.xlu1 %2293 }
0x1ab2   :  { %v2296_v40 = vsub.f32 %v2284_v27, %v2294_v41 }
0x1ab4   :  { %v2299_v42 = vmul.f32 1.442695, %v2296_v40 }
0x1ab5   :  { %v2362_v38 = vpop.permute.xlu1 %2361 }
0x1ab6   :  { %v2367_v39 = vsel %vm280_vm3, %v2362_v38, 0  ;;  %3696 = vpow2.f32 %v2299_v42 }
0x1ab7   :  { %3529 = vmatpush3.bf16.msra.mxu0 %v2367_v39 }
0x1ab8   :  { %3540 = vmatprep.subr.bf16.mxu0 %v3738_v14 }
0x1ab9   :  { %v2464_v29 = vpop.permute.xlu1 %2463 }
0x1aba   :  { %v2469_v4 = vsel %vm156_vm2, %v2464_v29, 0 }
0x1abd   :  { %v2514_v28 = vpop.permute.xlu1 %2513 }
0x1abe   :  { %v2519_v33 = vsel %vm156_vm2, %v2514_v28, 0 }
0x1ac1   :  { %v2512_v35 = vpop.permute.xlu1 %2511 }
0x1ac3   :  { %v3697_v55 = vpop.eup %3696 }
0x1ac4   :  { %v2304_v58 = vsel %vm156_vm2, %v3697_v55, 0.0 }
0x1ad7   :  { %v4318_v43 = vpop.f32.mrf.mxu1 }
0x1ad9   :  { %v3502_v47 = vpop.f32.mrf.mxu1 }
0x1ada   :  { %v2183_v47 = vadd.f32 %v4299_v20, %v4318_v43 }
0x1adb   :  { %v4320_v49 = vpop.f32.mrf.mxu1 }
0x1add   :  { %v3503_v50 = vpop.f32.mrf.mxu1 }
0x1adf   :  { %v2233_v51 = vpop.f32.mrf.mxu1 }
0x1ae0   :  { %v2234_v52 = vadd.f32 %v4194_v37, %v2233_v51 }
0x1ae1   :  { %v3514_v53 = vpop.f32.mrf.mxu1 }
0x1ae2   :  { %v2289_v54 = vsel %vm156_vm2, %v2234_v52, -inf  ;;  %v2186_v53 = vadd.f32 %v4302_v24, %v4320_v49 }
0x1ae3   :  { %2290 = vmax.xlane.f32.xlu0 %v2289_v54  ;;  %v2236_v56 = vpop.f32.mrf.mxu1 }
0x1ae5   :  { %v3515_v57 = vpop.f32.mrf.mxu1 }
0x1ae7   :  { %2305 = vadd.xlane.f32.xlu0 %v2304_v58 }
0x1b6c   :  { %v2291_v26 = vpop.xlane.xlu0 %2290 }
0x1b6d   :  { %v2295_v46 = vsub.f32 %v2234_v52, %v2291_v26 }
0x1b6f   :  { %v2297_v60 = vmul.f32 1.442695, %v2295_v46 }
0x1b70   :  { %v2306_v61 = vpop.xlane.xlu0 %2305 }
0x1b71   :  { %3698 = vpow2.f32 %v2297_v60 }
0x1b72   :  { %3700 = vrcp.f32 %v2306_v61 }
0x1b7e   :  { %v3699_v45 = vpop.eup %3698 }
0x1b7f   :  { %v3701_v63 = vpop.eup %3700  ;;  %v2301_v36 = vsel %vm156_vm2, %v3699_v45, 0.0 }
0x1b80   :  { %2302 = vadd.xlane.f32.xlu0 %v2301_v36  ;;  %v2310_v2 = vmul.f32 %v3701_v63, %v3697_v55 }
0x1b82   :  { %v2312_v3 = vpack.c.bf16 %v2310_v2, %v2310_v2 }
0x1b84   :  { %3531 = vmatmul.mubr.msk.bf16.vlgmr.msra.gmra.mxu0 %vm156_vm2, %v2312_v3 }
0x1b85   :  { %3541 = vmatpush3.bf16.xpose.msra.mxu0 %v2469_v4  ;;  %3542 = vmatprep.mubr.msk.bf16.mxu0 %vm3739_vm1, %v3738_v14 }
0x1b86   :  { %3552 = vmatprep.subr.bf16.mxu0 %v3738_v14 }
0x1b96   :  { %2313 = vrot.lane.b32.xlu0 %v4171_v25, %s3747_s0 }
0x1b9a   :  { %2461 = vrot.lane.b32.xlu0 %v4171_v25, %s3749_s18 }
0x1c09   :  { %v2303_v5 = vpop.xlane.xlu0 %2302 }
0x1c0a   :  { %3702 = vrcp.f32 %v2303_v5 }
0x1c0d   :  { %v2314_v6 = vpop.permute.xlu0 %2313 }
0x1c0e   :  { %v2319_v7 = vsel %vm280_vm3, %v2314_v6, 0 }
0x1c0f   :  { %3523 = vmatpush3.bf16.msra.mxu1 %v2319_v7 }
0x1c10   :  { %3534 = vmatprep.subr.bf16.mxu1 %v3738_v14 }
0x1c11   :  { %v2462_v62 = vpop.permute.xlu0 %2461 }
0x1c12   :  { %3543 = vmatmul.mubr.msk.bf16.vlgmr.msra.gmra.mxu0 %vm156_vm2, %v2462_v62  ;;  %v3160_v62 = vld [vmem:[%s4475_s4 + $0x1c] sm:$0xf] }
0x1c13   :  { %3554 = vmatprep.mubr.msk.bf16.mxu0 %vm3739_vm1, %v3738_v14 }
0x1c17   :  { %v3703_v32 = vpop.eup %3702 }
0x1c18   :  { %v2309_v1 = vmul.f32 %v3703_v32, %v3699_v45  ;;  %v2688_v32 = vsel %vm280_vm3, %v3160_v62, 0  ;;  %v3614_v62 = vld [vmem:[%s4479_s8 + $0x18] sm:$0xff]  }
0x1c1a   :  { %v2311_v8 = vpack.c.bf16 %v2309_v1, %v2309_v1 }
0x1c1c   :  { %3525 = vmatmul.mubr.msk.bf16.vlgmr.msra.gmra.mxu1 %vm156_vm2, %v2311_v8 }
0x1c1d   :  { %3536 = vmatprep.mubr.msk.bf16.mxu1 %vm3739_vm1, %v3738_v14  ;;  %3535 = vmatpush3.bf16.msra.mxu1 %v2416_v15 }
0x1c1e   :  { %3546 = vmatprep.subr.bf16.mxu1 %v3738_v14 }
0x1c44   :  { %v2403_v9 = vpop.f32.mrf.mxu0 }
0x1c46   :  { %v3532_v10 = vpop.f32.mrf.mxu0 }
0x1c48   :  { %v2406_v11 = vpop.f32.mrf.mxu0 }
0x1c4a   :  { %v3533_v12 = vpop.f32.mrf.mxu0 }
0x1cd2   :  { %v2505_v16 = vpop.f32.mrf.mxu0 }
0x1cd3   :  { %v2506_v17 = vadd.f32 %v4194_v37, %v2505_v16 }
0x1cd4   :  { %v3544_v18 = vpop.f32.mrf.mxu0 }
0x1cd5   :  { %v2561_v19 = vsel %vm156_vm2, %v2506_v17, -inf  ;;  %v3163_v18 = vld [vmem:[%s4476_s5 + $0x1] ss:$0 sm:$0xff] }
0x1cd6   :  { %2562 = vmax.xlane.f32.xlu0 %v2561_v19  ;;  %v2508_v21 = vpop.f32.mrf.mxu0 }
0x1cd8   :  { %v3545_v23 = vpop.f32.mrf.mxu0 }
0x1cdc   :  { %v2355_v22 = vpop.f32.mrf.mxu1 }
0x1cdd   :  { %v2409_v27 = vpack.c.bf16 %v2403_v9, %v2355_v22 }
0x1cde   :  { %v3526_v31 = vpop.f32.mrf.mxu1 }
0x1cdf   :  { %3537 = vmatmul.mubr.msk.bf16.vlgmr.msra.gmra.mxu1 %vm156_vm2, %v2409_v27 }
0x1ce0   :  { %3547 = vmatpush3.bf16.xpose.msra.mxu1 %v2519_v33  ;;  %v2358_v34 = vpop.f32.mrf.mxu1  ;;  %3548 = vmatprep.mubr.msk.bf16.mxu1 %vm3739_vm1, %v3738_v14 }
0x1ce1   :  { %3558 = vmatprep.subr.bf16.mxu1 %v3738_v14 }
0x1ce2   :  { %v3527_v37 = vpop.f32.mrf.mxu1 }
0x1ce7   :  { %3549 = vmatmul.mubr.msk.bf16.vlgmr.msra.gmra.mxu1 %vm156_vm2, %v2512_v35 }
0x1ce8   :  { %3560 = vmatprep.mubr.msk.bf16.mxu1 %vm3739_vm1, %v3738_v14 }
0x1d5f   :  { %v2563_v41 = vpop.xlane.xlu0 %2562 }
0x1d60   :  { %v2567_v38 = vsub.f32 %v2506_v17, %v2563_v41 }
0x1d62   :  { %v2569_v39 = vmul.f32 1.442695, %v2567_v38 }
0x1d64   :  { %3704 = vpow2.f32 %v2569_v39 }
0x1d71   :  { %v3705_v40 = vpop.eup %3704 }
0x1d72   :  { %v2573_v42 = vsel %vm156_vm2, %v3705_v40, 0.0 }
0x1d73   :  { %2574 = vadd.xlane.f32.xlu0 %v2573_v42 }
0x1d9f   :  { %v2452_v50 = vpop.f32.mrf.mxu1 }
0x1da0   :  { %v2459_v51 = vadd.f32 %v2452_v50, %v2183_v47 }
0x1da1   :  { %v3538_v52 = vpop.f32.mrf.mxu1 }
0x1da3   :  { %v2455_v54 = vpop.f32.mrf.mxu1 }
0x1da4   :  { %v2460_v55 = vadd.f32 %v2455_v54, %v2186_v53 }
0x1da5   :  { %v3539_v56 = vpop.f32.mrf.mxu1 }
0x1da7   :  { %v2555_v57 = vpop.f32.mrf.mxu1 }
0x1da8   :  { %v2556_v58 = vadd.f32 %v4201_v44, %v2555_v57 }
0x1da9   :  { %v3550_v26 = vpop.f32.mrf.mxu1 }
0x1daa   :  { %v2564_v46 = vsel %vm156_vm2, %v2556_v58, -inf  ;;  %v3165_v26 = vld [vmem:[%s4477_s6 + $0x1] ss:$0 sm:$0xff] }
0x1dab   :  { %2565 = vmax.xlane.f32.xlu1 %v2564_v46  ;;  %v2558_v60 = vpop.f32.mrf.mxu1 }
0x1dac   :  { %v3167_v60 = vld [vmem:[%s4478_s7 + $0x1] ss:$0 sm:$0xff] }
0x1dad   :  { %v3551_v61 = vpop.f32.mrf.mxu1 }
0x1dbc   :  { %2633 = vrot.lane.b32.xlu1 %v4175_v30, %s3750_s21 }
0x1dfc   :  { %v2575_v36 = vpop.xlane.xlu0 %2574 }
0x1e34   :  { %v2566_v20 = vpop.xlane.xlu1 %2565 }
0x1e35   :  { %v2568_v43 = vsub.f32 %v2556_v58, %v2566_v20 }
0x1e37   :  { %v2571_v45 = vmul.f32 1.442695, %v2568_v43 }
0x1e38   :  { %v2634_v63 = vpop.permute.xlu1 %2633 }
0x1e39   :  { %3706 = vpow2.f32 %v2571_v45  ;;  %v2639_v24 = vsel %vm280_vm3, %v2634_v63, 0 }
0x1e3a   :  { %3559 = vmatpush3.bf16.msra.mxu1 %v2639_v24  ;;  %3708 = vrcp.f32 %v2575_v36 }
0x1e3b   :  { %3570 = vmatprep.subr.bf16.mxu1 %v3738_v14 }
0x1e46   :  { %v3707_v44 = vpop.eup %3706 }
0x1e47   :  { %v2576_v49 = vsel %vm156_vm2, %v3707_v44, 0.0  ;;  %v3709_v30 = vpop.eup %3708 }
0x1e48   :  { %2577 = vadd.xlane.f32.xlu0 %v2576_v49  ;;  %v2581_v29 = vmul.f32 %v3709_v30, %v3705_v40 }
0x1e4a   :  { %v2583_v5 = vpack.c.bf16 %v2581_v29, %v2581_v29 }
0x1e5e   :  { %2585 = vrot.lane.b32.xlu0 %v4171_v25, %s3750_s21 }
0x1ed1   :  { %v2578_v2 = vpop.xlane.xlu0 %2577 }
0x1ed2   :  { %3710 = vrcp.f32 %v2578_v2 }
0x1ed5   :  { %v2586_v3 = vpop.permute.xlu0 %2585 }
0x1ed6   :  { %v2591_v4 = vsel %vm280_vm3, %v2586_v3, 0 }
0x1ed7   :  { %3553 = vmatpush3.bf16.msra.mxu0 %v2591_v4 }
0x1ed8   :  { %3564 = vmatprep.subr.bf16.mxu0 %v3738_v14 }
0x1eda   :  { %3555 = vmatmul.mubr.msk.bf16.vlgmr.msra.gmra.mxu0 %vm156_vm2, %v2583_v5 }
0x1edb   :  { %3566 = vmatprep.mubr.msk.bf16.mxu0 %vm3739_vm1, %v3738_v14  ;;  %3565 = vmatpush3.bf16.msra.mxu0 %v2688_v32  ;;  %v3615_v32 = vld [vmem:[%s4479_s8 + $0x10] sm:$0xff]  }
0x1edc   :  { %3578 = vmatprep.subr.bf16.mxu0 %v3738_v14 }
0x1edf   :  { %v3711_v6 = vpop.eup %3710 }
0x1ee0   :  { %v2582_v25 = vmul.f32 %v3711_v6, %v3707_v44 }
0x1ee2   :  { %v2584_v7 = vpack.c.bf16 %v2582_v25, %v2582_v25 }
0x1ee4   :  { %3561 = vmatmul.mubr.msk.bf16.vlgmr.msra.gmra.mxu1 %vm156_vm2, %v2584_v7 }
0x1ee5   :  { %3574 = vmatprep.mubr.msk.bf16.mxu1 %vm3739_vm1, %v3738_v14  ;;  %3571 = vmatpush3.bf16.msra.mxu1 %v3614_v62 }
0x1ee6   :  { %3572 = vmatprep.subr.bf16.mxu1 %v3738_v14 }
0x1ee9   :  { %3573 = vmatpush3.bf16.msra.mxu1 %v3615_v32 }
0x1f9a   :  { %v2627_v1 = vpop.f32.mrf.mxu0 }
0x1f9c   :  { %v3556_v8 = vpop.f32.mrf.mxu0 }
0x1f9e   :  { %v2630_v9 = vpop.f32.mrf.mxu0 }
0x1fa0   :  { %v3557_v10 = vpop.f32.mrf.mxu0 }
0x1fa4   :  { %v2675_v11 = vpop.f32.mrf.mxu1 }
0x1fa5   :  { %v2681_v12 = vpack.c.bf16 %v2675_v11, %v2627_v1 }
0x1fa6   :  { %v3562_v13 = vpop.f32.mrf.mxu1 }
0x1fa7   :  { %3567 = vmatmul.mubr.msk.bf16.vlgmr.msra.gmra.mxu0 %vm156_vm2, %v2681_v12 }
0x1fa8   :  { %v2678_v15 = vpop.f32.mrf.mxu1  ;;  %3586 = vmatprep.mubr.msk.bf16.mxu0 %vm3739_vm1, %v3738_v14 }
0x1faa   :  { %v3563_v16 = vpop.f32.mrf.mxu1 }
0x2067   :  { %v2724_v17 = vpop.f32.mrf.mxu0 }
0x2068   :  { %v2731_v19 = vadd.f32 %v2724_v17, %v2459_v51 }
0x2069   :  { %v3568_v21 = vpop.f32.mrf.mxu0 }
0x206a   :  { %v2741_v23 = vadd.f32 %v3163_v18, %v2731_v19 }
0x206b   :  { %v2727_v28 = vpop.f32.mrf.mxu0 }
0x206c   :  { %v2732_v22 = vadd.f32 %v2727_v28, %v2460_v55  ;;  %v2743_v27 = vsel %vm40_vm0, %v2741_v23, 0.0 }
0x206d   :  { %2744 = vadd.xlane.f32.xlu1 %v2743_v27  ;;  %v3569_v31 = vpop.f32.mrf.mxu0 }
0x206e   :  { %v2742_v33 = vadd.f32 %v3163_v18, %v2732_v22 }
0x2070   :  { %v2746_v34 = vsel %vm40_vm0, %v2742_v33, 0.0 }
0x2071   :  { %2747 = vadd.xlane.f32.xlu0 %v2746_v34 }
0x20f6   :  { %v2745_v37 = vpop.xlane.xlu1 %2744 }
0x20f7   :  { %v2749_v35 = vmul.f32 0.03125, %v2745_v37 }
0x20f9   :  { %v2751_v41 = vsub.f32 %v2741_v23, %v2749_v35 }
0x20fa   :  { %v2748_v38 = vpop.xlane.xlu0 %2747 }
0x20fb   :  { %v2750_v39 = vmul.f32 0.03125, %v2748_v38  ;;  %v2753_v40 = vmul.f32 %v2751_v41, %v2751_v41 }
0x20fd   :  { %v2752_v42 = vsub.f32 %v2742_v33, %v2750_v39  ;;  %v2755_v47 = vsel %vm40_vm0, %v2753_v40, 0.0 }
0x20fe   :  { %2756 = vadd.xlane.f32.xlu0 %v2755_v47 }
0x20ff   :  { %v2754_v50 = vmul.f32 %v2752_v42, %v2752_v42 }
0x2101   :  { %v2758_v51 = vsel %vm40_vm0, %v2754_v50, 0.0 }
0x2102   :  { %2759 = vadd.xlane.f32.xlu1 %v2758_v51 }
0x2187   :  { %v2757_v52 = vpop.xlane.xlu0 %2756 }
0x2188   :  { %v2761_v53 = vmul.f32 0.03125, %v2757_v52 }
0x218a   :  { %v2763_v54 = vadd.f32 1e-05, %v2761_v53 }
0x218b   :  { %v2760_v55 = vpop.xlane.xlu1 %2759 }
0x218c   :  { %3712 = vrsqrt.f32 %v2763_v54  ;;  %v2762_v56 = vmul.f32 0.03125, %v2760_v55 }
0x218e   :  { %v2764_v57 = vadd.f32 1e-05, %v2762_v56 }
0x2190   :  { %3714 = vrsqrt.f32 %v2764_v57 }
0x2199   :  { %v3713_v58 = vpop.eup %3712 }
0x219a   :  { %v2767_v46 = vmul.f32 %v3713_v58, %v2751_v41 }
0x219c   :  { %v2777_v61 = vmul.f32 %v3165_v26, %v2767_v46 }
0x219d   :  { %v3715_v20 = vpop.eup %3714 }
0x219e   :  { %v2787_v43 = vadd.f32 %v3167_v60, %v2777_v61  ;;  %v2768_v45 = vmul.f32 %v3715_v20, %v2752_v42 }
0x21a0   :  { %v4402_v63 = vadd.f32 %v2787_v43, %v4144_v59  ;;  %v2778_v24 = vmul.f32 %v3165_v26, %v2768_v45 }
0x21a2   :  { %v2791_v44 = vsel %vm40_vm0, %v4402_v63, 0.0  ;;  %v2788_v49 = vadd.f32 %v3167_v60, %v2778_v24 }
0x21a3   :  { %2792 = vadd.xlane.f32.xlu0 %v2791_v44 }
0x21a4   :  { %v4407_v36 = vadd.f32 %v2788_v49, %v4149_v48 }
0x21a6   :  { %v2794_v30 = vsel %vm40_vm0, %v4407_v36, 0.0 }
0x21a7   :  { %2795 = vadd.xlane.f32.xlu1 %v2794_v30 }
0x222c   :  { %v2793_v2 = vpop.xlane.xlu0 %2792 }
0x222d   :  { %v2797_v29 = vmul.f32 0.03125, %v2793_v2 }
0x222f   :  { %v2799_v3 = vsub.f32 %v4402_v63, %v2797_v29 }
0x2230   :  { %v2796_v4 = vpop.xlane.xlu1 %2795 }
0x2231   :  { %v2798_v59 = vmul.f32 0.03125, %v2796_v4  ;;  %v2801_v5 = vmul.f32 %v2799_v3, %v2799_v3 }
0x2233   :  { %v2800_v6 = vsub.f32 %v4407_v36, %v2798_v59  ;;  %v2803_v25 = vsel %vm40_vm0, %v2801_v5, 0.0 }
0x2234   :  { %2804 = vadd.xlane.f32.xlu0 %v2803_v25 }
0x2235   :  { %v2802_v7 = vmul.f32 %v2800_v6, %v2800_v6 }
0x2237   :  { %v2806_v48 = vsel %vm40_vm0, %v2802_v7, 0.0 }
0x2238   :  { %2807 = vadd.xlane.f32.xlu1 %v2806_v48 }
0x22bd   :  { %v2805_v1 = vpop.xlane.xlu0 %2804 }
0x22be   :  { %v2809_v8 = vmul.f32 0.03125, %v2805_v1 }
0x22c0   :  { %v2811_v9 = vadd.f32 1e-05, %v2809_v8 }
0x22c1   :  { %v2808_v10 = vpop.xlane.xlu1 %2807 }
0x22c2   :  { %v2810_v11 = vmul.f32 0.03125, %v2808_v10  ;;  %3716 = vrsqrt.f32 %v2811_v9 }
0x22c4   :  { %v2812_v12 = vadd.f32 1e-05, %v2810_v11 }
0x22c6   :  { %3718 = vrsqrt.f32 %v2812_v12 }
0x22cf   :  { %v3717_v13 = vpop.eup %3716 }
0x22d0   :  { %v2815_v16 = vmul.f32 %v3717_v13, %v2799_v3 }
0x22d3   :  { %v3719_v15 = vpop.eup %3718 }
0x22d4   :  { %v2816_v17 = vmul.f32 %v3719_v15, %v2800_v6 }
0x22d6   :  { %v2817_v18 = vpack.c.bf16 %v2816_v17, %v2815_v16 }
0x22d8   :  { %3575 = vmatmul.mubr.msk.bf16.vlgmr.msra.gmra.mxu1 %vm40_vm0, %v2817_v18 }
0x2398   :  { %v4423_v19 = vpop.f32.mrf.mxu1 }
0x2399   :  { %v2881_v21 = vmul.f32 0.70710677, %v4423_v19  ;;  %v2879_v7 = vmul.f32 0.5, %v4423_v19 }
0x239a   :  { %v3576_v23 = vpop.f32.mrf.mxu1 }
0x239b   :  { %v2887_v28 = vand.u32 2147483647, %v2881_v21  ;;  %vm2883_vm7 = vcmp.ge.f32.partialorder %v2881_v21, 0.0 }
0x239c   :  { %v4426_v22 = vpop.f32.mrf.mxu1  ;;  %v2885_v5 = vsel %vm2883_vm7, 1.0, %v3751_v0 }
0x239d   :  { %v2889_v27 = vmul.f32 0.3275911, %v2887_v28  ;;  %v2882_v31 = vmul.f32 0.70710677, %v4426_v22  ;;  %v2915_v38 = vsub.f32 0.0, %v2887_v28  ;;  %v2880_v9 = vmul.f32 0.5, %v4426_v22 }
0x239e   :  { %v3577_v33 = vpop.f32.mrf.mxu1 }
0x239f   :  { %v2891_v34 = vadd.f32 1.0, %v2889_v27  ;;  %v2888_v37 = vand.u32 2147483647, %v2882_v31  ;;  %v2917_v39 = vmul.f32 %v2915_v38, %v2887_v28  ;;  %vm2884_vm8 = vcmp.ge.f32.partialorder %v2882_v31, 0.0  ;;  %v3618_v27 = vld [vmem:[%s4480_s9 + $0x28] sm:$0xff]   ;;  %v3619_v31 = vld [vmem:[%s4480_s9 + $0x20] sm:$0xff]  }
0x23a0   :  { %v2886_v32 = vsel %vm2884_vm8, 1.0, %v3751_v0 }
0x23a1   :  { %3720 = vrcp.f32 %v2891_v34  ;;  %v2890_v35 = vmul.f32 0.3275911, %v2888_v37  ;;  %v2916_v40 = vsub.f32 0.0, %v2888_v37  ;;  %v2919_v50 = vmul.f32 1.442695, %v2917_v39 }
0x23a3   :  { %v2892_v41 = vadd.f32 1.0, %v2890_v35  ;;  %v2918_v51 = vmul.f32 %v2916_v40, %v2888_v37 }
0x23a5   :  { %3722 = vrcp.f32 %v2892_v41  ;;  %v2921_v56 = vmul.f32 1.442695, %v2918_v51 }
0x23a6   :  { %3724 = vpow2.f32 %v2919_v50 }
0x23a7   :  { %3726 = vpow2.f32 %v2921_v56 }
0x23ae   :  { %v3721_v42 = vpop.eup %3720 }
0x23af   :  { %v2897_v47 = vmul.f32 1.0614054, %v3721_v42 }
0x23b1   :  { %v2899_v52 = vadd.f32 -1.4531521, %v2897_v47 }
0x23b2   :  { %v3723_v53 = vpop.eup %3722 }
0x23b3   :  { %v2901_v54 = vmul.f32 %v3721_v42, %v2899_v52  ;;  %v2898_v55 = vmul.f32 1.0614054, %v3723_v53  ;;  %v3725_v30 = vpop.eup %3724 }
0x23b4   :  { %v3727_v59 = vpop.eup %3726 }
0x23b5   :  { %v2903_v57 = vadd.f32 1.4214138, %v2901_v54  ;;  %v2900_v58 = vadd.f32 -1.4531521, %v2898_v55 }
0x23b7   :  { %v2905_v26 = vmul.f32 %v3721_v42, %v2903_v57  ;;  %v2902_v46 = vmul.f32 %v3723_v53, %v2900_v58 }
0x23b9   :  { %v2907_v60 = vadd.f32 -0.28449672, %v2905_v26  ;;  %v2904_v61 = vadd.f32 1.4214138, %v2902_v46 }
0x23bb   :  { %v2909_v20 = vmul.f32 %v3721_v42, %v2907_v60  ;;  %v2906_v43 = vmul.f32 %v3723_v53, %v2904_v61 }
0x23bd   :  { %v2911_v45 = vadd.f32 0.2548296, %v2909_v20  ;;  %v2908_v24 = vadd.f32 -0.28449672, %v2906_v43 }
0x23bf   :  { %v2913_v44 = vmul.f32 %v3721_v42, %v2911_v45  ;;  %v2910_v49 = vmul.f32 %v3723_v53, %v2908_v24 }
0x23c1   :  { %v2923_v2 = vmul.f32 %v3725_v30, %v2913_v44  ;;  %v2912_v29 = vadd.f32 0.2548296, %v2910_v49 }
0x23c3   :  { %v2925_v3 = vsub.f32 1.0, %v2923_v2  ;;  %v2914_v4 = vmul.f32 %v3723_v53, %v2912_v29 }
0x23c5   :  { %v2927_v6 = vmul.f32 %v2925_v3, %v2885_v5  ;;  %v2924_v25 = vmul.f32 %v3727_v59, %v2914_v4 }
0x23c7   :  { %v2929_v48 = vadd.f32 1.0, %v2927_v6  ;;  %v2926_v62 = vsub.f32 1.0, %v2924_v25 }
0x23c9   :  { %v2931_v1 = vmul.f32 %v2929_v48, %v2879_v7  ;;  %v2928_v8 = vmul.f32 %v2926_v62, %v2886_v32 }
0x23cb   :  { %v2930_v10 = vadd.f32 1.0, %v2928_v8  ;;  %2935 = vrot.lane.b32.xlu0 %v2931_v1, %s3741_s27 }
0x23cd   :  { %v2932_v11 = vmul.f32 %v2930_v10, %v2880_v9 }
0x23cf   :  { %2937 = vrot.lane.b32.xlu1 %v2932_v11, %s3741_s27 }
0x243d   :  { %v2936_v12 = vpop.permute.xlu0 %2935 }
0x243e   :  { %v2941_v13 = vmul.f32 %v2936_v12, %v4423_v19  ;;  %v3616_v19 = vld [vmem:[%s4480_s9 + $0x38] sm:$0xff]  }
0x243f   :  { %3579 = vmatpush3.bf16.msra.mxu0 %v3616_v19 }
0x2440   :  { %v2943_v15 = vsel %vm1441_vm6, %v2941_v13, 0.0  ;;  %v2951_v21 = vmul.f32 %v2941_v13, %v2941_v13  ;;  %3580 = vmatprep.subr.bf16.mxu0 %v3738_v14 }
0x2441   :  { %2944 = vadd.xlane.f32.xlu1 %v2943_v15  ;;  %v2938_v16 = vpop.permute.xlu1 %2937 }
0x2442   :  { %v2942_v17 = vmul.f32 %v2938_v16, %v4426_v22  ;;  %v2953_v28 = vsel %vm1441_vm6, %v2951_v21, 0.0  ;;  %v3617_v22 = vld [vmem:[%s4480_s9 + $0x30] sm:$0xff]  }
0x2443   :  { %3581 = vmatpush3.bf16.msra.mxu0 %v3617_v22 }
0x2444   :  { %v2946_v0 = vsel %vm1441_vm6, %v2942_v17, 0.0  ;;  %v2952_v18 = vmul.f32 %v2942_v17, %v2942_v17  ;;  %3582 = vmatprep.subr.bf16.mxu0 %v3738_v14 }
0x2445   :  { %2947 = vadd.xlane.f32.xlu0 %v2946_v0 }
0x2446   :  { %v2956_v23 = vsel %vm1441_vm6, %v2952_v18, 0.0 }
0x2447   :  { %2957 = vadd.xlane.f32.xlu1 %v2956_v23  ;;  %3583 = vmatpush3.bf16.msra.mxu0 %v3618_v27 }
0x2448   :  { %3584 = vmatprep.subr.bf16.mxu0 %v3738_v14 }
0x2449   :  { %2954 = vadd.xlane.f32.xlu0 %v2953_v28 }
0x244b   :  { %3585 = vmatpush3.bf16.msra.mxu0 %v3619_v31 }
0x24ca   :  { %v2945_v33 = vpop.xlane.xlu1 %2944 }
0x24cb   :  { %v2949_v37 = vmul.f32 0.023809524, %v2945_v33 }
0x24cd   :  { %v2961_v42 = vmul.f32 %v2949_v37, %v2949_v37  ;;  %v2965_v55 = vsub.f32 %v2941_v13, %v2949_v37 }
0x24ce   :  { %v2948_v34 = vpop.xlane.xlu0 %2947 }
0x24cf   :  { %v2950_v35 = vmul.f32 0.023809524, %v2948_v34 }
0x24d0   :  { %v2958_v41 = vpop.xlane.xlu1 %2957 }
0x24d1   :  { %v2962_v38 = vmul.f32 %v2950_v35, %v2950_v35  ;;  %v2960_v39 = vmul.f32 0.023809524, %v2958_v41  ;;  %v2966_v14 = vsub.f32 %v2942_v17, %v2950_v35 }
0x24d2   :  { %v2955_v40 = vpop.xlane.xlu0 %2954 }
0x24d3   :  { %v2964_v47 = vsub.f32 %v2960_v39, %v2962_v38  ;;  %v2959_v50 = vmul.f32 0.023809524, %v2955_v40 }
0x24d5   :  { %v2968_v51 = vadd.f32 1e-05, %v2964_v47  ;;  %v2963_v52 = vsub.f32 %v2959_v50, %v2961_v42 }
0x24d7   :  { %3728 = vrsqrt.f32 %v2968_v51  ;;  %v2967_v53 = vadd.f32 1e-05, %v2963_v52 }
0x24d9   :  { %3730 = vrsqrt.f32 %v2967_v53 }
0x24e4   :  { %v3729_v54 = vpop.eup %3728 }
0x24e5   :  { %v2972_v58 = vmul.f32 %v3729_v54, %v2966_v14 }
0x24e6   :  { %v3731_v56 = vpop.eup %3730 }
0x24e7   :  { %v2971_v57 = vmul.f32 %v3731_v56, %v2965_v55 }
0x24e9   :  { %v2973_v26 = vpack.c.bf16 %v2972_v58, %v2971_v57 }
0x24eb   :  { %3587 = vmatmul.mubr.msk.bf16.vlgmr.msra.gmra.mxu0 %vm1441_vm6, %v2973_v26 }
0x25ab   :  { %v3044_v46 = vpop.f32.mrf.mxu0 }
0x25ac   :  { %v3051_v60 = vadd.f32 %v3044_v46, %v4402_v63 }
0x25ad   :  { %v3588_v61 = vpop.f32.mrf.mxu0 }
0x25ae   :  { %v3053_v20 = vsel %vm40_vm0, %v3051_v60, 0.0 }
0x25af   :  { %3054 = vadd.xlane.f32.xlu0 %v3053_v20  ;;  %v3047_v43 = vpop.f32.mrf.mxu0 }
0x25b0   :  { %v3052_v45 = vadd.f32 %v3047_v43, %v4407_v36 }
0x25b1   :  { %v3589_v24 = vpop.f32.mrf.mxu0 }
0x25b2   :  { %v3056_v44 = vsel %vm40_vm0, %v3052_v45, 0.0 }
0x25b3   :  { %3057 = vadd.xlane.f32.xlu1 %v3056_v44 }
0x2638   :  { %v3055_v49 = vpop.xlane.xlu0 %3054 }
0x2639   :  { %v3059_v30 = vmul.f32 0.03125, %v3055_v49 }
0x263b   :  { %v3061_v2 = vsub.f32 %v3051_v60, %v3059_v30 }
0x263c   :  { %v3058_v29 = vpop.xlane.xlu1 %3057 }
0x263d   :  { %v3060_v3 = vmul.f32 0.03125, %v3058_v29  ;;  %v3063_v4 = vmul.f32 %v3061_v2, %v3061_v2 }
0x263f   :  { %v3062_v59 = vsub.f32 %v3052_v45, %v3060_v3  ;;  %v3065_v63 = vsel %vm40_vm0, %v3063_v4, 0.0 }
0x2640   :  { %3066 = vadd.xlane.f32.xlu0 %v3065_v63 }
0x2641   :  { %v3064_v5 = vmul.f32 %v3062_v59, %v3062_v59 }
0x2643   :  { %v3068_v6 = vsel %vm40_vm0, %v3064_v5, 0.0 }
0x2644   :  { %3069 = vadd.xlane.f32.xlu1 %v3068_v6 }
0x26c9   :  { %v3067_v25 = vpop.xlane.xlu0 %3066 }
0x26ca   :  { %v3071_v36 = vmul.f32 0.03125, %v3067_v25 }
0x26cc   :  { %v3073_v7 = vadd.f32 1e-05, %v3071_v36 }
0x26cd   :  { %v3070_v48 = vpop.xlane.xlu1 %3069 }
0x26ce   :  { %3732 = vrsqrt.f32 %v3073_v7  ;;  %v3072_v62 = vmul.f32 0.03125, %v3070_v48 }
0x26d0   :  { %v3074_v32 = vadd.f32 1e-05, %v3072_v62 }
0x26d2   :  { %3734 = vrsqrt.f32 %v3074_v32 }
0x26db   :  { %v3733_v1 = vpop.eup %3732 }
0x26dc   :  { %v3077_v8 = vmul.f32 %v3733_v1, %v3061_v2 }
0x26de   :  { %3079 = vst.msk [vmem:[%s4481_s10] sm:$0xff] %vm40_vm0, %v3077_v8 }
0x26df   :  { %v3735_v9 = vpop.eup %3734 }
0x26e0   :  { %v3078_v10 = vmul.f32 %v3735_v9, %v3062_v59 }
0x26e2   :  { %3080 = vst.msk [vmem:[%s4481_s10 + $0x8] sm:$0xff] %vm40_vm0, %v3078_v10 }

</bundles_post_ra>
